<compile_context>
chip_gen: v7x
topology: tpu7x:2x2x1
jax: 0.10.0
libtpu: 0.0.40
codegen_flags: <defaults>
</compile_context>

<pallas_src>
import functools

import jax
import jax.numpy as jnp
from jax import lax
from jax.experimental import pallas as pl
from jax.experimental.pallas import tpu as pltpu


def _gru_freq_kernel(xt_ref, xf_ref, h0_ref, w_ih_ref, w_hh_ref, b_i_ref,
                     b_hn_ref, out_ref, xT_ref, hT_ref, *, matmul_dtype):
    # xt_ref / xf_ref : (TN, M*D)  natural-layout blocks of x_time / x_freq
    # h0_ref          : (D, 1)     initial hidden state (module parameter), column
    # w_ih_ref        : (3D, D)    torch weight_ih as-is (gates stacked [r|z|n])
    # w_hh_ref        : (3D, D)    torch weight_hh as-is
    # b_i_ref         : (3D, 1)    folded biases [b_ir+b_hr | b_iz+b_hz | b_in]
    # b_hn_ref        : (D, 1)     b_hn (stays inside r * (W_hn h + b_hn))
    # out_ref         : (TN, M*D)  output block, natural layout
    # xT_ref, hT_ref  : VMEM scratch (M*D, TN) in the lane-dense transposed layout
    MD, TN = xT_ref.shape
    D = w_ih_ref.shape[1]
    M = MD // D

    # (1) Lane-dense add of the two natural-layout streams, then one in-kernel
    #     XLU transpose into the (feature-on-sublanes, batch-on-lanes) layout
    #     used by the whole recurrence.
    x_sum = xt_ref[...] + xf_ref[...]                # (TN, M*D), full 128 lanes
    xT_ref[...] = jnp.transpose(x_sum)               # (M*D, TN), lane-dense on N

    # Resident weights / biases; broadcasts hoisted out of the unrolled loop
    # (JAX does not CSE broadcast_in_dim across unrolled iterations).
    w_ih = w_ih_ref[...].astype(matmul_dtype)        # (3D, D)
    w_hh = w_hh_ref[...].astype(matmul_dtype)        # (3D, D)
    b_i = jnp.broadcast_to(b_i_ref[...], (3 * D, TN))
    b_hn = jnp.broadcast_to(b_hn_ref[...], (D, TN))
    h = jnp.broadcast_to(h0_ref[...], (D, TN))       # (D, TN) f32 carry

    # (2) GRU recurrence over the M frequency steps, fully unrolled (M is small
    #     and static).  The gx matmul does not depend on h, so with the loop
    #     unrolled the scheduler overlaps it (and the hT stores) with the
    #     previous step's VPU/EUP gate math; the only serial chain is
    #     gh -> gates -> h.  All elementwise / EUP work is on (·, TN) slabs.
    for m in range(M):
        x_m = xT_ref[pl.ds(m * D, D), :].astype(matmul_dtype)              # (D, TN)
        gx = jnp.dot(w_ih, x_m, preferred_element_type=jnp.float32) + b_i  # (3D, TN)
        gh = jnp.dot(w_hh, h.astype(matmul_dtype),
                     preferred_element_type=jnp.float32)                   # (3D, TN)
        r = jax.nn.sigmoid(gx[:D] + gh[:D])
        z = jax.nn.sigmoid(gx[D:2 * D] + gh[D:2 * D])
        n = jnp.tanh(gx[2 * D:] + r * (gh[2 * D:] + b_hn))
        h = (1.0 - z) * n + z * h
        hT_ref[pl.ds(m * D, D), :] = h

    # (3) One transpose back and a single lane-dense, unmasked (TN, M*D) store;
    #     the wrapper's (N, M*D) -> (B, T, M, D) reshape is metadata-only.
    out_ref[...] = jnp.transpose(hT_ref[...]).astype(out_ref.dtype)


def _round_up(x, m):
    return ((x + m - 1) // m) * m


def _vmem_capacity_bytes():
    try:
        return int(pltpu.get_tpu_info().vmem_capacity_bytes)
    except Exception:
        return 128 << 20


def _pick_tn(N, M, D, block_budget_bytes, tn_cap):
    # Per-unit-TN f32 footprint: 2 double-buffered input blocks + 1 double-
    # buffered output block (each M*D wide) + two (M*D, TN) scratch slabs.
    MD = M * D
    per_tn = 8 * MD * 4
    tn = (block_budget_bytes // max(per_tn, 1)) // 8 * 8
    tn = max(8, min(tn, tn_cap))
    # Keep >=2 grid blocks when N allows (megacore split + pipeline overlap).
    tn = min(tn, _round_up(pl.cdiv(N, 2), 8))
    tn = max(tn, 8)
    if N <= 8:
        tn = N          # single block equal to the full (possibly sub-8) dim
    return tn


def frequency_delayed_stack(x_time, x_freq, params, *, use_bf16_matmul=False):
    """Forward pass of FrequencyDelayedStack.

    x_time, x_freq: (B, T, M, D) float32.  Returns (B, T, M, D) float32.
    """
    B, T, M, D = x_time.shape
    N = B * T
    MD = M * D

    # Natural-layout streams; reshape is metadata-only (no HBM relayout), the
    # add itself happens inside the kernel.
    xt = x_time.reshape(N, MD).astype(jnp.float32)
    xf = x_freq.reshape(N, MD).astype(jnp.float32)

    # torch.nn.GRU weights are (3D, D) with gates stacked [r|z|n].  In the
    # kernel's transposed layout we need exactly gx^T = W_ih @ x^T, so the
    # weights are used as-is (no transpose / gate regrouping).
    w_ih = params["w_ih"].astype(jnp.float32)
    w_hh = params["w_hh"].astype(jnp.float32)
    b_ih = params["b_ih"].astype(jnp.float32)
    b_hh = params["b_hh"].astype(jnp.float32)
    # Fold r/z biases; b_hn must stay separate (inside r * (.)).  Column
    # vectors so they broadcast over the lane (batch) axis in-kernel.
    b_i = jnp.concatenate([b_ih[:2 * D] + b_hh[:2 * D],
                           b_ih[2 * D:]]).reshape(3 * D, 1)
    b_hn = b_hh[2 * D:].reshape(D, 1)
    h0 = params["hidden"].reshape(D, 1).astype(jnp.float32)

    # Generation-aware VMEM budgeting: conservative on 64-MiB-VMEM parts
    # (v7x-class, 32 MiB scoped default), larger tiles on 128-MiB parts.
    vmem_cap = _vmem_capacity_bytes()
    small_vmem = vmem_cap <= (64 << 20)
    block_budget = (20 << 20) if small_vmem else (48 << 20)
    tn_cap = 1024 if small_vmem else 2048
    vmem_limit_cap = (40 << 20) if small_vmem else (100 << 20)

    tn = _pick_tn(N, M, D, block_budget, tn_cap)
    grid = (pl.cdiv(N, tn),)

    est = (8 * tn * MD + 4 * 3 * D * D + 8 * D) * 4 + (2 << 20)
    vmem_limit = int(min(vmem_limit_cap, max(16 << 20, 2 * est)))

    kernel = functools.partial(
        _gru_freq_kernel,
        matmul_dtype=jnp.bfloat16 if use_bf16_matmul else jnp.float32)

    out = pl.pallas_call(
        kernel,
        out_shape=jax.ShapeDtypeStruct((N, MD), jnp.float32),
        grid_spec=pltpu.PrefetchScalarGridSpec(
            num_scalar_prefetch=0,
            grid=grid,
            in_specs=[
                pl.BlockSpec((tn, MD), lambda i: (i, 0)),      # x_time block
                pl.BlockSpec((tn, MD), lambda i: (i, 0)),      # x_freq block
                pl.BlockSpec((D, 1), lambda i: (0, 0)),        # h0 column (resident)
                pl.BlockSpec((3 * D, D), lambda i: (0, 0)),    # W_ih (resident)
                pl.BlockSpec((3 * D, D), lambda i: (0, 0)),    # W_hh (resident)
                pl.BlockSpec((3 * D, 1), lambda i: (0, 0)),    # folded biases
                pl.BlockSpec((D, 1), lambda i: (0, 0)),        # b_hn
            ],
            out_specs=pl.BlockSpec((tn, MD), lambda i: (i, 0)),
            scratch_shapes=[
                pltpu.VMEM((MD, tn), jnp.float32),   # x^T in batch-on-lanes layout
                pltpu.VMEM((MD, tn), jnp.float32),   # per-step hidden states
            ],
        ),
        compiler_params=pltpu.CompilerParams(
            dimension_semantics=("parallel",),
            vmem_limit_bytes=vmem_limit,
        ),
    )(xt, xf, h0, w_ih, w_hh, b_i, b_hn)

    return out.reshape(B, T, M, D)


def _reference(x_time, x_freq, params):
    """Pure-JAX reference matching torch.nn.GRU semantics."""
    B, T, M, D = x_time.shape
    N = B * T
    x = (x_time + x_freq).reshape(N, M, D)
    x = jnp.transpose(x, (1, 0, 2))  # (M, N, D)

    w_ih = params["w_ih"]
    w_hh = params["w_hh"]
    b_ih = params["b_ih"]
    b_hh = params["b_hh"]
    h0 = jnp.broadcast_to(params["hidden"].reshape(1, D), (N, D))

    def cell(h, x_m):
        gx = x_m @ w_ih.T + b_ih
        gh = h @ w_hh.T + b_hh
        gxr, gxz, gxn = gx[:, :D], gx[:, D:2 * D], gx[:, 2 * D:]
        ghr, ghz, ghn = gh[:, :D], gh[:, D:2 * D], gh[:, 2 * D:]
        r = jax.nn.sigmoid(gxr + ghr)
        z = jax.nn.sigmoid(gxz + ghz)
        n = jnp.tanh(gxn + r * ghn)
        h_new = (1.0 - z) * n + z * h
        return h_new, h_new

    _, ys = lax.scan(cell, h0, x)            # ys: (M, N, D)
    return jnp.transpose(ys, (1, 0, 2)).reshape(B, T, M, D)


if __name__ == "__main__":
    B, T, M, D = 2, 4, 8, 32
    key = jax.random.PRNGKey(0)
    k1, k2, k3, k4, k5, k6, k7, k8 = jax.random.split(key, 8)

    # Deterministic parameter init (GRU: dims -> dims; `hidden` parameter is
    # zeros exactly as in the module's __init__, but kept general).
    scale = 1.0 / jnp.sqrt(jnp.float32(D))
    params = {
        "w_ih": jax.random.uniform(k1, (3 * D, D), jnp.float32, -scale, scale),
        "w_hh": jax.random.uniform(k2, (3 * D, D), jnp.float32, -scale, scale),
        "b_ih": jax.random.uniform(k3, (3 * D,), jnp.float32, -scale, scale),
        "b_hh": jax.random.uniform(k4, (3 * D,), jnp.float32, -scale, scale),
        "hidden": jnp.zeros((1, 1, D), jnp.float32),
    }

    x_time = jax.random.normal(k5, (B, T, M, D), jnp.float32)
    x_freq = jax.random.normal(k6, (B, T, M, D), jnp.float32)

    out = jax.block_until_ready(frequency_delayed_stack(x_time, x_freq, params))
    ref = jax.block_until_ready(_reference(x_time, x_freq, params))
    assert out.shape == (B, T, M, D)
    err = float(jnp.max(jnp.abs(out - ref)))
    assert jnp.allclose(out, ref, atol=1e-5, rtol=1e-5), err

    # Second shape: exercises the multi-block grid and the ragged (masked)
    # last N block without any HBM padding.
    B2, T2 = 3, 5
    x_time2 = jax.random.normal(k7, (B2, T2, M, D), jnp.float32)
    x_freq2 = jax.random.normal(k8, (B2, T2, M, D), jnp.float32)
    out2 = jax.block_until_ready(frequency_delayed_stack(x_time2, x_freq2, params))
    ref2 = jax.block_until_ready(_reference(x_time2, x_freq2, params))
    err2 = float(jnp.max(jnp.abs(out2 - ref2)))
    assert jnp.allclose(out2, ref2, atol=1e-5, rtol=1e-5), err2

    print("KERNEL_OK")
</pallas_src>

<mosaic_0001>
module attributes {stable_mosaic.version = 11 : i64} {
  func.func @_gru_freq_kernel(%arg0: i32, %arg1: memref<8x256xf32, #tpu.memory_space<vmem>>, %arg2: memref<8x256xf32, #tpu.memory_space<vmem>>, %arg3: memref<32x1xf32, #tpu.memory_space<vmem>>, %arg4: memref<96x32xf32, #tpu.memory_space<vmem>>, %arg5: memref<96x32xf32, #tpu.memory_space<vmem>>, %arg6: memref<96x1xf32, #tpu.memory_space<vmem>>, %arg7: memref<32x1xf32, #tpu.memory_space<vmem>>, %arg8: memref<8x256xf32, #tpu.memory_space<vmem>>, %arg9: memref<256x8xf32, #tpu.memory_space<vmem>>, %arg10: memref<256x8xf32, #tpu.memory_space<vmem>>) attributes {dimension_semantics = [#tpu.dimension_semantics<parallel>], iteration_bounds = array<i64: 1>, scalar_prefetch = 0 : i64, scratch_operands = 2 : i64, tpu.core_type = #tpu.core_type<tc>, window_params = [{transform_indices = @transform_0, window_bounds = array<i64: 8, 256>}, {transform_indices = @transform_1, window_bounds = array<i64: 8, 256>}, {pipeline_mode = #tpu.pipeline_mode<synchronous>, transform_indices = @transform_2, window_bounds = array<i64: 32, 1>}, {pipeline_mode = #tpu.pipeline_mode<synchronous>, transform_indices = @transform_3, window_bounds = array<i64: 96, 32>}, {pipeline_mode = #tpu.pipeline_mode<synchronous>, transform_indices = @transform_4, window_bounds = array<i64: 96, 32>}, {pipeline_mode = #tpu.pipeline_mode<synchronous>, transform_indices = @transform_5, window_bounds = array<i64: 96, 1>}, {pipeline_mode = #tpu.pipeline_mode<synchronous>, transform_indices = @transform_6, window_bounds = array<i64: 32, 1>}, {transform_indices = @transform_7, window_bounds = array<i64: 8, 256>}]} {
    %c0 = arith.constant 0 : index
    %c0_0 = arith.constant 0 : index
    %0 = vector.load %arg1[%c0, %c0_0] : memref<8x256xf32, #tpu.memory_space<vmem>>, vector<8x256xf32>
    %c0_1 = arith.constant 0 : index
    %c0_2 = arith.constant 0 : index
    %1 = vector.load %arg2[%c0_1, %c0_2] : memref<8x256xf32, #tpu.memory_space<vmem>>, vector<8x256xf32>
    %2 = arith.addf %0, %1 : vector<8x256xf32>
    %3 = tpu.transpose %2, [1, 0] : vector<8x256xf32> -> vector<256x8xf32>
    %c0_3 = arith.constant 0 : index
    %c0_4 = arith.constant 0 : index
    %4 = vector.load %arg9[%c0_3, %c0_4] : memref<256x8xf32, #tpu.memory_space<vmem>>, vector<256x8xf32>
    tpu.vector_store %arg9[%c0_3, %c0_4], %3 {strides = array<i32>} : memref<256x8xf32, #tpu.memory_space<vmem>>, vector<256x8xf32>,
    %c0_5 = arith.constant 0 : index
    %c0_6 = arith.constant 0 : index
    %5 = vector.load %arg4[%c0_5, %c0_6] : memref<96x32xf32, #tpu.memory_space<vmem>>, vector<96x32xf32>
    %c0_7 = arith.constant 0 : index
    %c0_8 = arith.constant 0 : index
    %6 = vector.load %arg5[%c0_7, %c0_8] : memref<96x32xf32, #tpu.memory_space<vmem>>, vector<96x32xf32>
    %c0_9 = arith.constant 0 : index
    %c0_10 = arith.constant 0 : index
    %7 = vector.load %arg6[%c0_9, %c0_10] : memref<96x1xf32, #tpu.memory_space<vmem>>, vector<96x1xf32>
    %8 = vector.shape_cast %7 : vector<96x1xf32> to vector<96x1xf32>
    %9 = vector.broadcast %8 : vector<96x1xf32> to vector<96x8xf32>
    %c0_11 = arith.constant 0 : index
    %c0_12 = arith.constant 0 : index
    %10 = vector.load %arg7[%c0_11, %c0_12] : memref<32x1xf32, #tpu.memory_space<vmem>>, vector<32x1xf32>
    %11 = vector.shape_cast %10 : vector<32x1xf32> to vector<32x1xf32>
    %12 = vector.broadcast %11 : vector<32x1xf32> to vector<32x8xf32>
    %c0_13 = arith.constant 0 : index
    %c0_14 = arith.constant 0 : index
    %13 = vector.load %arg3[%c0_13, %c0_14] : memref<32x1xf32, #tpu.memory_space<vmem>>, vector<32x1xf32>
    %14 = vector.shape_cast %13 : vector<32x1xf32> to vector<32x1xf32>
    %15 = vector.broadcast %14 : vector<32x1xf32> to vector<32x8xf32>
    %c0_15 = arith.constant 0 : index
    %c0_16 = arith.constant 0 : index
    %16 = vector.load %arg9[%c0_15, %c0_16] : memref<256x8xf32, #tpu.memory_space<vmem>>, vector<32x8xf32>
    %cst = arith.constant dense<0.000000e+00> : vector<96x8xf32>
    %17 = tpu.matmul %5, %16, %cst {dimension_numbers = #tpu.dot_dimension_numbers<[1], [0], [0], [1], [0, 0, 1, 1], [], []>} : vector<96x32xf32>, vector<32x8xf32>, vector<96x8xf32> -> vector<96x8xf32>
    %18 = arith.addf %17, %9 : vector<96x8xf32>
    %cst_17 = arith.constant dense<0.000000e+00> : vector<96x8xf32>
    %19 = tpu.matmul %6, %15, %cst_17 {dimension_numbers = #tpu.dot_dimension_numbers<[1], [0], [0], [1], [0, 0, 1, 1], [], []>} : vector<96x32xf32>, vector<32x8xf32>, vector<96x8xf32> -> vector<96x8xf32>
    %20 = vector.extract_strided_slice %18 {offsets = [0, 0], sizes = [32, 8], strides = [1, 1]} : vector<96x8xf32> to vector<32x8xf32>
    %21 = vector.extract_strided_slice %19 {offsets = [0, 0], sizes = [32, 8], strides = [1, 1]} : vector<96x8xf32> to vector<32x8xf32>
    %22 = arith.addf %20, %21 : vector<32x8xf32>
    %23 = arith.negf %22 : vector<32x8xf32>
    %24 = math.exp %23 : vector<32x8xf32>
    %cst_18 = arith.constant 1.000000e+00 : f32
    %25 = vector.broadcast %cst_18 : f32 to vector<32x8xf32>
    %26 = arith.addf %25, %24 : vector<32x8xf32>
    %27 = arith.divf %25, %26 : vector<32x8xf32>
    %28 = vector.extract_strided_slice %18 {offsets = [32, 0], sizes = [32, 8], strides = [1, 1]} : vector<96x8xf32> to vector<32x8xf32>
    %29 = vector.extract_strided_slice %19 {offsets = [32, 0], sizes = [32, 8], strides = [1, 1]} : vector<96x8xf32> to vector<32x8xf32>
    %30 = arith.addf %28, %29 : vector<32x8xf32>
    %31 = arith.negf %30 : vector<32x8xf32>
    %32 = math.exp %31 : vector<32x8xf32>
    %cst_19 = arith.constant 1.000000e+00 : f32
    %33 = vector.broadcast %cst_19 : f32 to vector<32x8xf32>
    %34 = arith.addf %33, %32 : vector<32x8xf32>
    %35 = arith.divf %33, %34 : vector<32x8xf32>
    %36 = vector.extract_strided_slice %18 {offsets = [64, 0], sizes = [32, 8], strides = [1, 1]} : vector<96x8xf32> to vector<32x8xf32>
    %37 = vector.extract_strided_slice %19 {offsets = [64, 0], sizes = [32, 8], strides = [1, 1]} : vector<96x8xf32> to vector<32x8xf32>
    %38 = arith.addf %37, %12 : vector<32x8xf32>
    %39 = arith.mulf %27, %38 : vector<32x8xf32>
    %40 = arith.addf %36, %39 : vector<32x8xf32>
    %41 = math.tanh %40 : vector<32x8xf32>
    %cst_20 = arith.constant 1.000000e+00 : f32
    %42 = vector.broadcast %cst_20 : f32 to vector<32x8xf32>
    %43 = arith.subf %42, %35 : vector<32x8xf32>
    %44 = arith.mulf %43, %41 : vector<32x8xf32>
    %45 = arith.mulf %35, %15 : vector<32x8xf32>
    %46 = arith.addf %44, %45 : vector<32x8xf32>
    %c0_21 = arith.constant 0 : index
    %c0_22 = arith.constant 0 : index
    %47 = vector.load %arg10[%c0_21, %c0_22] : memref<256x8xf32, #tpu.memory_space<vmem>>, vector<32x8xf32>
    tpu.vector_store %arg10[%c0_21, %c0_22], %46 {strides = array<i32>} : memref<256x8xf32, #tpu.memory_space<vmem>>, vector<32x8xf32>,
    %c32 = arith.constant 32 : index
    %c0_23 = arith.constant 0 : index
    %48 = vector.load %arg9[%c32, %c0_23] : memref<256x8xf32, #tpu.memory_space<vmem>>, vector<32x8xf32>
    %cst_24 = arith.constant dense<0.000000e+00> : vector<96x8xf32>
    %49 = tpu.matmul %5, %48, %cst_24 {dimension_numbers = #tpu.dot_dimension_numbers<[1], [0], [0], [1], [0, 0, 1, 1], [], []>} : vector<96x32xf32>, vector<32x8xf32>, vector<96x8xf32> -> vector<96x8xf32>
    %50 = arith.addf %49, %9 : vector<96x8xf32>
    %cst_25 = arith.constant dense<0.000000e+00> : vector<96x8xf32>
    %51 = tpu.matmul %6, %46, %cst_25 {dimension_numbers = #tpu.dot_dimension_numbers<[1], [0], [0], [1], [0, 0, 1, 1], [], []>} : vector<96x32xf32>, vector<32x8xf32>, vector<96x8xf32> -> vector<96x8xf32>
    %52 = vector.extract_strided_slice %50 {offsets = [0, 0], sizes = [32, 8], strides = [1, 1]} : vector<96x8xf32> to vector<32x8xf32>
    %53 = vector.extract_strided_slice %51 {offsets = [0, 0], sizes = [32, 8], strides = [1, 1]} : vector<96x8xf32> to vector<32x8xf32>
    %54 = arith.addf %52, %53 : vector<32x8xf32>
    %55 = arith.negf %54 : vector<32x8xf32>
    %56 = math.exp %55 : vector<32x8xf32>
    %cst_26 = arith.constant 1.000000e+00 : f32
    %57 = vector.broadcast %cst_26 : f32 to vector<32x8xf32>
    %58 = arith.addf %57, %56 : vector<32x8xf32>
    %59 = arith.divf %57, %58 : vector<32x8xf32>
    %60 = vector.extract_strided_slice %50 {offsets = [32, 0], sizes = [32, 8], strides = [1, 1]} : vector<96x8xf32> to vector<32x8xf32>
    %61 = vector.extract_strided_slice %51 {offsets = [32, 0], sizes = [32, 8], strides = [1, 1]} : vector<96x8xf32> to vector<32x8xf32>
    %62 = arith.addf %60, %61 : vector<32x8xf32>
    %63 = arith.negf %62 : vector<32x8xf32>
    %64 = math.exp %63 : vector<32x8xf32>
    %cst_27 = arith.constant 1.000000e+00 : f32
    %65 = vector.broadcast %cst_27 : f32 to vector<32x8xf32>
    %66 = arith.addf %65, %64 : vector<32x8xf32>
    %67 = arith.divf %65, %66 : vector<32x8xf32>
    %68 = vector.extract_strided_slice %50 {offsets = [64, 0], sizes = [32, 8], strides = [1, 1]} : vector<96x8xf32> to vector<32x8xf32>
    %69 = vector.extract_strided_slice %51 {offsets = [64, 0], sizes = [32, 8], strides = [1, 1]} : vector<96x8xf32> to vector<32x8xf32>
    %70 = arith.addf %69, %12 : vector<32x8xf32>
    %71 = arith.mulf %59, %70 : vector<32x8xf32>
    %72 = arith.addf %68, %71 : vector<32x8xf32>
    %73 = math.tanh %72 : vector<32x8xf32>
    %cst_28 = arith.constant 1.000000e+00 : f32
    %74 = vector.broadcast %cst_28 : f32 to vector<32x8xf32>
    %75 = arith.subf %74, %67 : vector<32x8xf32>
    %76 = arith.mulf %75, %73 : vector<32x8xf32>
    %77 = arith.mulf %67, %46 : vector<32x8xf32>
    %78 = arith.addf %76, %77 : vector<32x8xf32>
    %c32_29 = arith.constant 32 : index
    %c0_30 = arith.constant 0 : index
    %79 = vector.load %arg10[%c32_29, %c0_30] : memref<256x8xf32, #tpu.memory_space<vmem>>, vector<32x8xf32>
    tpu.vector_store %arg10[%c32_29, %c0_30], %78 {strides = array<i32>} : memref<256x8xf32, #tpu.memory_space<vmem>>, vector<32x8xf32>,
    %c64 = arith.constant 64 : index
    %c0_31 = arith.constant 0 : index
    %80 = vector.load %arg9[%c64, %c0_31] : memref<256x8xf32, #tpu.memory_space<vmem>>, vector<32x8xf32>
    %cst_32 = arith.constant dense<0.000000e+00> : vector<96x8xf32>
    %81 = tpu.matmul %5, %80, %cst_32 {dimension_numbers = #tpu.dot_dimension_numbers<[1], [0], [0], [1], [0, 0, 1, 1], [], []>} : vector<96x32xf32>, vector<32x8xf32>, vector<96x8xf32> -> vector<96x8xf32>
    %82 = arith.addf %81, %9 : vector<96x8xf32>
    %cst_33 = arith.constant dense<0.000000e+00> : vector<96x8xf32>
    %83 = tpu.matmul %6, %78, %cst_33 {dimension_numbers = #tpu.dot_dimension_numbers<[1], [0], [0], [1], [0, 0, 1, 1], [], []>} : vector<96x32xf32>, vector<32x8xf32>, vector<96x8xf32> -> vector<96x8xf32>
    %84 = vector.extract_strided_slice %82 {offsets = [0, 0], sizes = [32, 8], strides = [1, 1]} : vector<96x8xf32> to vector<32x8xf32>
    %85 = vector.extract_strided_slice %83 {offsets = [0, 0], sizes = [32, 8], strides = [1, 1]} : vector<96x8xf32> to vector<32x8xf32>
    %86 = arith.addf %84, %85 : vector<32x8xf32>
    %87 = arith.negf %86 : vector<32x8xf32>
    %88 = math.exp %87 : vector<32x8xf32>
    %cst_34 = arith.constant 1.000000e+00 : f32
    %89 = vector.broadcast %cst_34 : f32 to vector<32x8xf32>
    %90 = arith.addf %89, %88 : vector<32x8xf32>
    %91 = arith.divf %89, %90 : vector<32x8xf32>
    %92 = vector.extract_strided_slice %82 {offsets = [32, 0], sizes = [32, 8], strides = [1, 1]} : vector<96x8xf32> to vector<32x8xf32>
    %93 = vector.extract_strided_slice %83 {offsets = [32, 0], sizes = [32, 8], strides = [1, 1]} : vector<96x8xf32> to vector<32x8xf32>
    %94 = arith.addf %92, %93 : vector<32x8xf32>
    %95 = arith.negf %94 : vector<32x8xf32>
    %96 = math.exp %95 : vector<32x8xf32>
    %cst_35 = arith.constant 1.000000e+00 : f32
    %97 = vector.broadcast %cst_35 : f32 to vector<32x8xf32>
    %98 = arith.addf %97, %96 : vector<32x8xf32>
    %99 = arith.divf %97, %98 : vector<32x8xf32>
    %100 = vector.extract_strided_slice %82 {offsets = [64, 0], sizes = [32, 8], strides = [1, 1]} : vector<96x8xf32> to vector<32x8xf32>
    %101 = vector.extract_strided_slice %83 {offsets = [64, 0], sizes = [32, 8], strides = [1, 1]} : vector<96x8xf32> to vector<32x8xf32>
    %102 = arith.addf %101, %12 : vector<32x8xf32>
    %103 = arith.mulf %91, %102 : vector<32x8xf32>
    %104 = arith.addf %100, %103 : vector<32x8xf32>
    %105 = math.tanh %104 : vector<32x8xf32>
    %cst_36 = arith.constant 1.000000e+00 : f32
    %106 = vector.broadcast %cst_36 : f32 to vector<32x8xf32>
    %107 = arith.subf %106, %99 : vector<32x8xf32>
    %108 = arith.mulf %107, %105 : vector<32x8xf32>
    %109 = arith.mulf %99, %78 : vector<32x8xf32>
    %110 = arith.addf %108, %109 : vector<32x8xf32>
    %c64_37 = arith.constant 64 : index
    %c0_38 = arith.constant 0 : index
    %111 = vector.load %arg10[%c64_37, %c0_38] : memref<256x8xf32, #tpu.memory_space<vmem>>, vector<32x8xf32>
    tpu.vector_store %arg10[%c64_37, %c0_38], %110 {strides = array<i32>} : memref<256x8xf32, #tpu.memory_space<vmem>>, vector<32x8xf32>,
    %c96 = arith.constant 96 : index
    %c0_39 = arith.constant 0 : index
    %112 = vector.load %arg9[%c96, %c0_39] : memref<256x8xf32, #tpu.memory_space<vmem>>, vector<32x8xf32>
    %cst_40 = arith.constant dense<0.000000e+00> : vector<96x8xf32>
    %113 = tpu.matmul %5, %112, %cst_40 {dimension_numbers = #tpu.dot_dimension_numbers<[1], [0], [0], [1], [0, 0, 1, 1], [], []>} : vector<96x32xf32>, vector<32x8xf32>, vector<96x8xf32> -> vector<96x8xf32>
    %114 = arith.addf %113, %9 : vector<96x8xf32>
    %cst_41 = arith.constant dense<0.000000e+00> : vector<96x8xf32>
    %115 = tpu.matmul %6, %110, %cst_41 {dimension_numbers = #tpu.dot_dimension_numbers<[1], [0], [0], [1], [0, 0, 1, 1], [], []>} : vector<96x32xf32>, vector<32x8xf32>, vector<96x8xf32> -> vector<96x8xf32>
    %116 = vector.extract_strided_slice %114 {offsets = [0, 0], sizes = [32, 8], strides = [1, 1]} : vector<96x8xf32> to vector<32x8xf32>
    %117 = vector.extract_strided_slice %115 {offsets = [0, 0], sizes = [32, 8], strides = [1, 1]} : vector<96x8xf32> to vector<32x8xf32>
    %118 = arith.addf %116, %117 : vector<32x8xf32>
    %119 = arith.negf %118 : vector<32x8xf32>
    %120 = math.exp %119 : vector<32x8xf32>
    %cst_42 = arith.constant 1.000000e+00 : f32
    %121 = vector.broadcast %cst_42 : f32 to vector<32x8xf32>
    %122 = arith.addf %121, %120 : vector<32x8xf32>
    %123 = arith.divf %121, %122 : vector<32x8xf32>
    %124 = vector.extract_strided_slice %114 {offsets = [32, 0], sizes = [32, 8], strides = [1, 1]} : vector<96x8xf32> to vector<32x8xf32>
    %125 = vector.extract_strided_slice %115 {offsets = [32, 0], sizes = [32, 8], strides = [1, 1]} : vector<96x8xf32> to vector<32x8xf32>
    %126 = arith.addf %124, %125 : vector<32x8xf32>
    %127 = arith.negf %126 : vector<32x8xf32>
    %128 = math.exp %127 : vector<32x8xf32>
    %cst_43 = arith.constant 1.000000e+00 : f32
    %129 = vector.broadcast %cst_43 : f32 to vector<32x8xf32>
    %130 = arith.addf %129, %128 : vector<32x8xf32>
    %131 = arith.divf %129, %130 : vector<32x8xf32>
    %132 = vector.extract_strided_slice %114 {offsets = [64, 0], sizes = [32, 8], strides = [1, 1]} : vector<96x8xf32> to vector<32x8xf32>
    %133 = vector.extract_strided_slice %115 {offsets = [64, 0], sizes = [32, 8], strides = [1, 1]} : vector<96x8xf32> to vector<32x8xf32>
    %134 = arith.addf %133, %12 : vector<32x8xf32>
    %135 = arith.mulf %123, %134 : vector<32x8xf32>
    %136 = arith.addf %132, %135 : vector<32x8xf32>
    %137 = math.tanh %136 : vector<32x8xf32>
    %cst_44 = arith.constant 1.000000e+00 : f32
    %138 = vector.broadcast %cst_44 : f32 to vector<32x8xf32>
    %139 = arith.subf %138, %131 : vector<32x8xf32>
    %140 = arith.mulf %139, %137 : vector<32x8xf32>
    %141 = arith.mulf %131, %110 : vector<32x8xf32>
    %142 = arith.addf %140, %141 : vector<32x8xf32>
    %c96_45 = arith.constant 96 : index
    %c0_46 = arith.constant 0 : index
    %143 = vector.load %arg10[%c96_45, %c0_46] : memref<256x8xf32, #tpu.memory_space<vmem>>, vector<32x8xf32>
    tpu.vector_store %arg10[%c96_45, %c0_46], %142 {strides = array<i32>} : memref<256x8xf32, #tpu.memory_space<vmem>>, vector<32x8xf32>,
    %c128 = arith.constant 128 : index
    %c0_47 = arith.constant 0 : index
    %144 = vector.load %arg9[%c128, %c0_47] : memref<256x8xf32, #tpu.memory_space<vmem>>, vector<32x8xf32>
    %cst_48 = arith.constant dense<0.000000e+00> : vector<96x8xf32>
    %145 = tpu.matmul %5, %144, %cst_48 {dimension_numbers = #tpu.dot_dimension_numbers<[1], [0], [0], [1], [0, 0, 1, 1], [], []>} : vector<96x32xf32>, vector<32x8xf32>, vector<96x8xf32> -> vector<96x8xf32>
    %146 = arith.addf %145, %9 : vector<96x8xf32>
    %cst_49 = arith.constant dense<0.000000e+00> : vector<96x8xf32>
    %147 = tpu.matmul %6, %142, %cst_49 {dimension_numbers = #tpu.dot_dimension_numbers<[1], [0], [0], [1], [0, 0, 1, 1], [], []>} : vector<96x32xf32>, vector<32x8xf32>, vector<96x8xf32> -> vector<96x8xf32>
    %148 = vector.extract_strided_slice %146 {offsets = [0, 0], sizes = [32, 8], strides = [1, 1]} : vector<96x8xf32> to vector<32x8xf32>
    %149 = vector.extract_strided_slice %147 {offsets = [0, 0], sizes = [32, 8], strides = [1, 1]} : vector<96x8xf32> to vector<32x8xf32>
    %150 = arith.addf %148, %149 : vector<32x8xf32>
    %151 = arith.negf %150 : vector<32x8xf32>
    %152 = math.exp %151 : vector<32x8xf32>
    %cst_50 = arith.constant 1.000000e+00 : f32
    %153 = vector.broadcast %cst_50 : f32 to vector<32x8xf32>
    %154 = arith.addf %153, %152 : vector<32x8xf32>
    %155 = arith.divf %153, %154 : vector<32x8xf32>
    %156 = vector.extract_strided_slice %146 {offsets = [32, 0], sizes = [32, 8], strides = [1, 1]} : vector<96x8xf32> to vector<32x8xf32>
    %157 = vector.extract_strided_slice %147 {offsets = [32, 0], sizes = [32, 8], strides = [1, 1]} : vector<96x8xf32> to vector<32x8xf32>
    %158 = arith.addf %156, %157 : vector<32x8xf32>
    %159 = arith.negf %158 : vector<32x8xf32>
    %160 = math.exp %159 : vector<32x8xf32>
    %cst_51 = arith.constant 1.000000e+00 : f32
    %161 = vector.broadcast %cst_51 : f32 to vector<32x8xf32>
    %162 = arith.addf %161, %160 : vector<32x8xf32>
    %163 = arith.divf %161, %162 : vector<32x8xf32>
    %164 = vector.extract_strided_slice %146 {offsets = [64, 0], sizes = [32, 8], strides = [1, 1]} : vector<96x8xf32> to vector<32x8xf32>
    %165 = vector.extract_strided_slice %147 {offsets = [64, 0], sizes = [32, 8], strides = [1, 1]} : vector<96x8xf32> to vector<32x8xf32>
    %166 = arith.addf %165, %12 : vector<32x8xf32>
    %167 = arith.mulf %155, %166 : vector<32x8xf32>
    %168 = arith.addf %164, %167 : vector<32x8xf32>
    %169 = math.tanh %168 : vector<32x8xf32>
    %cst_52 = arith.constant 1.000000e+00 : f32
    %170 = vector.broadcast %cst_52 : f32 to vector<32x8xf32>
    %171 = arith.subf %170, %163 : vector<32x8xf32>
    %172 = arith.mulf %171, %169 : vector<32x8xf32>
    %173 = arith.mulf %163, %142 : vector<32x8xf32>
    %174 = arith.addf %172, %173 : vector<32x8xf32>
    %c128_53 = arith.constant 128 : index
    %c0_54 = arith.constant 0 : index
    %175 = vector.load %arg10[%c128_53, %c0_54] : memref<256x8xf32, #tpu.memory_space<vmem>>, vector<32x8xf32>
    tpu.vector_store %arg10[%c128_53, %c0_54], %174 {strides = array<i32>} : memref<256x8xf32, #tpu.memory_space<vmem>>, vector<32x8xf32>,
    %c160 = arith.constant 160 : index
    %c0_55 = arith.constant 0 : index
    %176 = vector.load %arg9[%c160, %c0_55] : memref<256x8xf32, #tpu.memory_space<vmem>>, vector<32x8xf32>
    %cst_56 = arith.constant dense<0.000000e+00> : vector<96x8xf32>
    %177 = tpu.matmul %5, %176, %cst_56 {dimension_numbers = #tpu.dot_dimension_numbers<[1], [0], [0], [1], [0, 0, 1, 1], [], []>} : vector<96x32xf32>, vector<32x8xf32>, vector<96x8xf32> -> vector<96x8xf32>
    %178 = arith.addf %177, %9 : vector<96x8xf32>
    %cst_57 = arith.constant dense<0.000000e+00> : vector<96x8xf32>
    %179 = tpu.matmul %6, %174, %cst_57 {dimension_numbers = #tpu.dot_dimension_numbers<[1], [0], [0], [1], [0, 0, 1, 1], [], []>} : vector<96x32xf32>, vector<32x8xf32>, vector<96x8xf32> -> vector<96x8xf32>
    %180 = vector.extract_strided_slice %178 {offsets = [0, 0], sizes = [32, 8], strides = [1, 1]} : vector<96x8xf32> to vector<32x8xf32>
    %181 = vector.extract_strided_slice %179 {offsets = [0, 0], sizes = [32, 8], strides = [1, 1]} : vector<96x8xf32> to vector<32x8xf32>
    %182 = arith.addf %180, %181 : vector<32x8xf32>
    %183 = arith.negf %182 : vector<32x8xf32>
    %184 = math.exp %183 : vector<32x8xf32>
    %cst_58 = arith.constant 1.000000e+00 : f32
    %185 = vector.broadcast %cst_58 : f32 to vector<32x8xf32>
    %186 = arith.addf %185, %184 : vector<32x8xf32>
    %187 = arith.divf %185, %186 : vector<32x8xf32>
    %188 = vector.extract_strided_slice %178 {offsets = [32, 0], sizes = [32, 8], strides = [1, 1]} : vector<96x8xf32> to vector<32x8xf32>
    %189 = vector.extract_strided_slice %179 {offsets = [32, 0], sizes = [32, 8], strides = [1, 1]} : vector<96x8xf32> to vector<32x8xf32>
    %190 = arith.addf %188, %189 : vector<32x8xf32>
    %191 = arith.negf %190 : vector<32x8xf32>
    %192 = math.exp %191 : vector<32x8xf32>
    %cst_59 = arith.constant 1.000000e+00 : f32
    %193 = vector.broadcast %cst_59 : f32 to vector<32x8xf32>
    %194 = arith.addf %193, %192 : vector<32x8xf32>
    %195 = arith.divf %193, %194 : vector<32x8xf32>
    %196 = vector.extract_strided_slice %178 {offsets = [64, 0], sizes = [32, 8], strides = [1, 1]} : vector<96x8xf32> to vector<32x8xf32>
    %197 = vector.extract_strided_slice %179 {offsets = [64, 0], sizes = [32, 8], strides = [1, 1]} : vector<96x8xf32> to vector<32x8xf32>
    %198 = arith.addf %197, %12 : vector<32x8xf32>
    %199 = arith.mulf %187, %198 : vector<32x8xf32>
    %200 = arith.addf %196, %199 : vector<32x8xf32>
    %201 = math.tanh %200 : vector<32x8xf32>
    %cst_60 = arith.constant 1.000000e+00 : f32
    %202 = vector.broadcast %cst_60 : f32 to vector<32x8xf32>
    %203 = arith.subf %202, %195 : vector<32x8xf32>
    %204 = arith.mulf %203, %201 : vector<32x8xf32>
    %205 = arith.mulf %195, %174 : vector<32x8xf32>
    %206 = arith.addf %204, %205 : vector<32x8xf32>
    %c160_61 = arith.constant 160 : index
    %c0_62 = arith.constant 0 : index
    %207 = vector.load %arg10[%c160_61, %c0_62] : memref<256x8xf32, #tpu.memory_space<vmem>>, vector<32x8xf32>
    tpu.vector_store %arg10[%c160_61, %c0_62], %206 {strides = array<i32>} : memref<256x8xf32, #tpu.memory_space<vmem>>, vector<32x8xf32>,
    %c192 = arith.constant 192 : index
    %c0_63 = arith.constant 0 : index
    %208 = vector.load %arg9[%c192, %c0_63] : memref<256x8xf32, #tpu.memory_space<vmem>>, vector<32x8xf32>
    %cst_64 = arith.constant dense<0.000000e+00> : vector<96x8xf32>
    %209 = tpu.matmul %5, %208, %cst_64 {dimension_numbers = #tpu.dot_dimension_numbers<[1], [0], [0], [1], [0, 0, 1, 1], [], []>} : vector<96x32xf32>, vector<32x8xf32>, vector<96x8xf32> -> vector<96x8xf32>
    %210 = arith.addf %209, %9 : vector<96x8xf32>
    %cst_65 = arith.constant dense<0.000000e+00> : vector<96x8xf32>
    %211 = tpu.matmul %6, %206, %cst_65 {dimension_numbers = #tpu.dot_dimension_numbers<[1], [0], [0], [1], [0, 0, 1, 1], [], []>} : vector<96x32xf32>, vector<32x8xf32>, vector<96x8xf32> -> vector<96x8xf32>
    %212 = vector.extract_strided_slice %210 {offsets = [0, 0], sizes = [32, 8], strides = [1, 1]} : vector<96x8xf32> to vector<32x8xf32>
    %213 = vector.extract_strided_slice %211 {offsets = [0, 0], sizes = [32, 8], strides = [1, 1]} : vector<96x8xf32> to vector<32x8xf32>
    %214 = arith.addf %212, %213 : vector<32x8xf32>
    %215 = arith.negf %214 : vector<32x8xf32>
    %216 = math.exp %215 : vector<32x8xf32>
    %cst_66 = arith.constant 1.000000e+00 : f32
    %217 = vector.broadcast %cst_66 : f32 to vector<32x8xf32>
    %218 = arith.addf %217, %216 : vector<32x8xf32>
    %219 = arith.divf %217, %218 : vector<32x8xf32>
    %220 = vector.extract_strided_slice %210 {offsets = [32, 0], sizes = [32, 8], strides = [1, 1]} : vector<96x8xf32> to vector<32x8xf32>
    %221 = vector.extract_strided_slice %211 {offsets = [32, 0], sizes = [32, 8], strides = [1, 1]} : vector<96x8xf32> to vector<32x8xf32>
    %222 = arith.addf %220, %221 : vector<32x8xf32>
    %223 = arith.negf %222 : vector<32x8xf32>
    %224 = math.exp %223 : vector<32x8xf32>
    %cst_67 = arith.constant 1.000000e+00 : f32
    %225 = vector.broadcast %cst_67 : f32 to vector<32x8xf32>
    %226 = arith.addf %225, %224 : vector<32x8xf32>
    %227 = arith.divf %225, %226 : vector<32x8xf32>
    %228 = vector.extract_strided_slice %210 {offsets = [64, 0], sizes = [32, 8], strides = [1, 1]} : vector<96x8xf32> to vector<32x8xf32>
    %229 = vector.extract_strided_slice %211 {offsets = [64, 0], sizes = [32, 8], strides = [1, 1]} : vector<96x8xf32> to vector<32x8xf32>
    %230 = arith.addf %229, %12 : vector<32x8xf32>
    %231 = arith.mulf %219, %230 : vector<32x8xf32>
    %232 = arith.addf %228, %231 : vector<32x8xf32>
    %233 = math.tanh %232 : vector<32x8xf32>
    %cst_68 = arith.constant 1.000000e+00 : f32
    %234 = vector.broadcast %cst_68 : f32 to vector<32x8xf32>
    %235 = arith.subf %234, %227 : vector<32x8xf32>
    %236 = arith.mulf %235, %233 : vector<32x8xf32>
    %237 = arith.mulf %227, %206 : vector<32x8xf32>
    %238 = arith.addf %236, %237 : vector<32x8xf32>
    %c192_69 = arith.constant 192 : index
    %c0_70 = arith.constant 0 : index
    %239 = vector.load %arg10[%c192_69, %c0_70] : memref<256x8xf32, #tpu.memory_space<vmem>>, vector<32x8xf32>
    tpu.vector_store %arg10[%c192_69, %c0_70], %238 {strides = array<i32>} : memref<256x8xf32, #tpu.memory_space<vmem>>, vector<32x8xf32>,
    %c224 = arith.constant 224 : index
    %c0_71 = arith.constant 0 : index
    %240 = vector.load %arg9[%c224, %c0_71] : memref<256x8xf32, #tpu.memory_space<vmem>>, vector<32x8xf32>
    %cst_72 = arith.constant dense<0.000000e+00> : vector<96x8xf32>
    %241 = tpu.matmul %5, %240, %cst_72 {dimension_numbers = #tpu.dot_dimension_numbers<[1], [0], [0], [1], [0, 0, 1, 1], [], []>} : vector<96x32xf32>, vector<32x8xf32>, vector<96x8xf32> -> vector<96x8xf32>
    %242 = arith.addf %241, %9 : vector<96x8xf32>
    %cst_73 = arith.constant dense<0.000000e+00> : vector<96x8xf32>
    %243 = tpu.matmul %6, %238, %cst_73 {dimension_numbers = #tpu.dot_dimension_numbers<[1], [0], [0], [1], [0, 0, 1, 1], [], []>} : vector<96x32xf32>, vector<32x8xf32>, vector<96x8xf32> -> vector<96x8xf32>
    %244 = vector.extract_strided_slice %242 {offsets = [0, 0], sizes = [32, 8], strides = [1, 1]} : vector<96x8xf32> to vector<32x8xf32>
    %245 = vector.extract_strided_slice %243 {offsets = [0, 0], sizes = [32, 8], strides = [1, 1]} : vector<96x8xf32> to vector<32x8xf32>
    %246 = arith.addf %244, %245 : vector<32x8xf32>
    %247 = arith.negf %246 : vector<32x8xf32>
    %248 = math.exp %247 : vector<32x8xf32>
    %cst_74 = arith.constant 1.000000e+00 : f32
    %249 = vector.broadcast %cst_74 : f32 to vector<32x8xf32>
    %250 = arith.addf %249, %248 : vector<32x8xf32>
    %251 = arith.divf %249, %250 : vector<32x8xf32>
    %252 = vector.extract_strided_slice %242 {offsets = [32, 0], sizes = [32, 8], strides = [1, 1]} : vector<96x8xf32> to vector<32x8xf32>
    %253 = vector.extract_strided_slice %243 {offsets = [32, 0], sizes = [32, 8], strides = [1, 1]} : vector<96x8xf32> to vector<32x8xf32>
    %254 = arith.addf %252, %253 : vector<32x8xf32>
    %255 = arith.negf %254 : vector<32x8xf32>
    %256 = math.exp %255 : vector<32x8xf32>
    %cst_75 = arith.constant 1.000000e+00 : f32
    %257 = vector.broadcast %cst_75 : f32 to vector<32x8xf32>
    %258 = arith.addf %257, %256 : vector<32x8xf32>
    %259 = arith.divf %257, %258 : vector<32x8xf32>
    %260 = vector.extract_strided_slice %242 {offsets = [64, 0], sizes = [32, 8], strides = [1, 1]} : vector<96x8xf32> to vector<32x8xf32>
    %261 = vector.extract_strided_slice %243 {offsets = [64, 0], sizes = [32, 8], strides = [1, 1]} : vector<96x8xf32> to vector<32x8xf32>
    %262 = arith.addf %261, %12 : vector<32x8xf32>
    %263 = arith.mulf %251, %262 : vector<32x8xf32>
    %264 = arith.addf %260, %263 : vector<32x8xf32>
    %265 = math.tanh %264 : vector<32x8xf32>
    %cst_76 = arith.constant 1.000000e+00 : f32
    %266 = vector.broadcast %cst_76 : f32 to vector<32x8xf32>
    %267 = arith.subf %266, %259 : vector<32x8xf32>
    %268 = arith.mulf %267, %265 : vector<32x8xf32>
    %269 = arith.mulf %259, %238 : vector<32x8xf32>
    %270 = arith.addf %268, %269 : vector<32x8xf32>
    %c224_77 = arith.constant 224 : index
    %c0_78 = arith.constant 0 : index
    %271 = vector.load %arg10[%c224_77, %c0_78] : memref<256x8xf32, #tpu.memory_space<vmem>>, vector<32x8xf32>
    tpu.vector_store %arg10[%c224_77, %c0_78], %270 {strides = array<i32>} : memref<256x8xf32, #tpu.memory_space<vmem>>, vector<32x8xf32>,
    %c0_79 = arith.constant 0 : index
    %c0_80 = arith.constant 0 : index
    %272 = vector.load %arg10[%c0_79, %c0_80] : memref<256x8xf32, #tpu.memory_space<vmem>>, vector<256x8xf32>
    %273 = tpu.transpose %272, [1, 0] : vector<256x8xf32> -> vector<8x256xf32>
    %c0_81 = arith.constant 0 : index
    %c0_82 = arith.constant 0 : index
    %274 = vector.load %arg8[%c0_81, %c0_82] : memref<8x256xf32, #tpu.memory_space<vmem>>, vector<8x256xf32>
    tpu.vector_store %arg8[%c0_81, %c0_82], %273 {strides = array<i32>} : memref<8x256xf32, #tpu.memory_space<vmem>>, vector<8x256xf32>,
    return
  }
  func.func @transform_0(%arg0: i32) -> (i32, i32) {
    %c0_i32 = arith.constant 0 : i32
    %c0_i32_0 = arith.constant 0 : i32
    return %arg0, %c0_i32 : i32, i32
  }
  func.func @transform_1(%arg0: i32) -> (i32, i32) {
    %c0_i32 = arith.constant 0 : i32
    %c0_i32_0 = arith.constant 0 : i32
    return %arg0, %c0_i32 : i32, i32
  }
  func.func @transform_2(%arg0: i32) -> (i32, i32) {
    %c0_i32 = arith.constant 0 : i32
    %c0_i32_0 = arith.constant 0 : i32
    %c0_i32_1 = arith.constant 0 : i32
    return %c0_i32, %c0_i32_0 : i32, i32
  }
  func.func @transform_3(%arg0: i32) -> (i32, i32) {
    %c0_i32 = arith.constant 0 : i32
    %c0_i32_0 = arith.constant 0 : i32
    %c0_i32_1 = arith.constant 0 : i32
    return %c0_i32, %c0_i32_0 : i32, i32
  }
  func.func @transform_4(%arg0: i32) -> (i32, i32) {
    %c0_i32 = arith.constant 0 : i32
    %c0_i32_0 = arith.constant 0 : i32
    %c0_i32_1 = arith.constant 0 : i32
    return %c0_i32, %c0_i32_0 : i32, i32
  }
  func.func @transform_5(%arg0: i32) -> (i32, i32) {
    %c0_i32 = arith.constant 0 : i32
    %c0_i32_0 = arith.constant 0 : i32
    %c0_i32_1 = arith.constant 0 : i32
    return %c0_i32, %c0_i32_0 : i32, i32
  }
  func.func @transform_6(%arg0: i32) -> (i32, i32) {
    %c0_i32 = arith.constant 0 : i32
    %c0_i32_0 = arith.constant 0 : i32
    %c0_i32_1 = arith.constant 0 : i32
    return %c0_i32, %c0_i32_0 : i32, i32
  }
  func.func @transform_7(%arg0: i32) -> (i32, i32) {
    %c0_i32 = arith.constant 0 : i32
    %c0_i32_0 = arith.constant 0 : i32
    return %arg0, %c0_i32 : i32, i32
  }
}

</mosaic_0001>

<bundles_post_ra>
// kernel: tpu_custom_call.1
= control target key start
LH: loop header
LB: loop body
LE: loop exit
PB: predicated region body
PF: predicated region fallthrough
CT: control target
= control target key end

     0   :  { %v4796_v4 = vmov 0   ;;  %s6046_s0 = inlined_call_operand.vmem [shape: f32[8,256], index: 0, kind: input, shape index: {}]   ;;  %s6047_s1 = inlined_call_operand.vmem [shape: f32[8,256], index: 1, kind: input, shape index: {}]   ;;  %s6048_s2 = inlined_call_operand.vmem [shape: f32[32,1], index: 2, kind: input, shape index: {}]   ;;  %s6049_s3 = inlined_call_operand.vmem [shape: f32[96,32], index: 3, kind: input, shape index: {}]   ;;  %s6050_s4 = inlined_call_operand.vmem [shape: f32[96,32], index: 4, kind: input, shape index: {}]   ;;  %s6051_s5 = inlined_call_operand.vmem [shape: f32[96,1], index: 5, kind: input, shape index: {}]   ;;  %s6052_s6 = inlined_call_operand.vmem [shape: f32[32,1], index: 6, kind: input, shape index: {}]   ;;  %s6053_s7 = inlined_call_operand.hbm [shape: f32[8,256], index: 7, kind: output, shape index: {}]  }
   0x1   :  { %v27_v0 = vld [vmem:[%s6046_s0] sm:$0xff]  ;;  %v251_v2 = vld [vmem:[%s6048_s2 + $0x8] sm:$0xff]  ;;  %4415 = vset.pattern.permute.xlu1 %v4796_v4  ;;  %v252_v5 = vld [vmem:[%s6048_s2 + $0x10] sm:$0xff] }
   0x2   :  { %v29_v1 = vld [vmem:[%s6047_s1] sm:$0xff]  ;;  %261 = vperm.xlu1 %4415, %v251_v2   ;;  %v253_v6 = vld [vmem:[%s6048_s2 + $0x18] sm:$0xff] }
   0x3   :  { %v31_v3 = vadd.f32 %v29_v1, %v27_v0 }
   0x5   :  { %33 = vxpose.xlu0.b32.start.end [1/1] (short) %v31_v3, 128 }
   0x6   :  { %266 = vperm.xlu1 %4415, %v252_v5  }
   0x7   :  { %12 = vsyncpa [#allocation5], 0  ;;  %v154_v7 = vld [vmem:[%s6051_s5] sm:$0xff]  ;;  %v155_v8 = vld [vmem:[%s6051_s5 + $0x8] sm:$0xff]  ;;  %vm278_vm0 = vcmask 261120   ;;  %vm97_vm1 = vcmask 64512  }
   0x8   :  { %v156_v9 = vld [vmem:[%s6051_s5 + $0x10] sm:$0xff]  ;;  %v157_v10 = vld [vmem:[%s6051_s5 + $0x18] sm:$0xff]  ;;  %v158_v11 = vld [vmem:[%s6051_s5 + $0x20] sm:$0xff] }
   0x9   :  { %v4871_v12 = vld [vmem:[%s6049_s3] sm:$0xff]  ;;  %v159_v13 = vld [vmem:[%s6051_s5 + $0x28] sm:$0xff]  ;;  %v160_v14 = vld [vmem:[%s6051_s5 + $0x30] sm:$0xff] }
   0xa   :  { %271 = vperm.xlu1 %4415, %v253_v6   ;;  %3747 = vmatprep.mubr.msk.f32.mxu0 %vm278_vm0, %v4871_v12  ;;  %v161_v15 = vld [vmem:[%s6051_s5 + $0x38] sm:$0xff]  ;;  %v226_v16 = vld [vmem:[%s6052_s6] sm:$0xff]  ;;  %v227_v17 = vld [vmem:[%s6052_s6 + $0x8] sm:$0xff] }
   0xb   :  { %3799 = vmatprep.mubr.msk.f32.mxu1 %vm278_vm0, %v4871_v12  ;;  %v162_v18 = vld [vmem:[%s6051_s5 + $0x40] sm:$0xff]  ;;  %v163_v19 = vld [vmem:[%s6051_s5 + $0x48] sm:$0xff]  ;;  %v228_v20 = vld [vmem:[%s6052_s6 + $0x10] sm:$0xff] }
   0xc   :  { %v229_v21 = vld [vmem:[%s6052_s6 + $0x18] sm:$0xff]  ;;  %v164_v22 = vld [vmem:[%s6051_s5 + $0x50] sm:$0xff]  ;;  %v250_v24 = vld [vmem:[%s6048_s2] sm:$0xff] }
   0xd   :  { %v165_v23 = vld [vmem:[%s6051_s5 + $0x58] sm:$0xff]  ;;  %v4922_v38 = vld [vmem:[%s6049_s3 + $0x8] sm:$0xff]  ;;  %v4928_v39 = vld [vmem:[%s6049_s3 + $0x10] sm:$0xff] }
   0xe   :  { %168 = vperm.xlu1 %4415, %v154_v7   ;;  %v4937_v42 = vld [vmem:[%s6049_s3 + $0x18] sm:$0xff]  ;;  %v4943_v44 = vld [vmem:[%s6049_s3 + $0x20] sm:$0xff]  ;;  %v4952_v46 = vld [vmem:[%s6049_s3 + $0x28] sm:$0xff] }
   0xf   :  { %v4957_v48 = vld [vmem:[%s6049_s3 + $0x30] sm:$0xff]  ;;  %v4967_v50 = vld [vmem:[%s6049_s3 + $0x38] sm:$0xff]  ;;  %v4972_v54 = vld [vmem:[%s6049_s3 + $0x40] sm:$0xff] }
  0x10   :  { %v4982_v55 = vld [vmem:[%s6049_s3 + $0x48] sm:$0xff]  ;;  %v4987_v57 = vld [vmem:[%s6049_s3 + $0x50] sm:$0xff]  ;;  %v5001_v58 = vld [vmem:[%s6049_s3 + $0x58] sm:$0xff] }
  0x11   :  { %v5007_v60 = vld [vmem:[%s6050_s4] sm:$0xff] }
  0x12   :  { %173 = vperm.xlu1 %4415, %v155_v8  }
  0x16   :  { %178 = vperm.xlu1 %4415, %v156_v9  }
  0x1a   :  { %183 = vperm.xlu1 %4415, %v157_v10   ;;  %v5052_v10 = vld [vmem:[%s6050_s4 + $0x8] sm:$0xff] }
  0x1e   :  { %188 = vperm.xlu1 %4415, %v158_v11  }
  0x22   :  { %193 = vperm.xlu1 %4415, %v159_v13  }
  0x26   :  { %198 = vperm.xlu1 %4415, %v160_v14   ;;  %v5057_v14 = vld [vmem:[%s6050_s4 + $0x10] sm:$0xff] }
  0x2a   :  { %203 = vperm.xlu1 %4415, %v161_v15  }
  0x2e   :  { %4414 = vset.pattern.permute.xlu0 %v4796_v4  ;;  %232 = vperm.xlu1 %4415, %v226_v16   ;;  %v5066_v16 = vld [vmem:[%s6050_s4 + $0x18] sm:$0xff] }
  0x32   :  { %237 = vperm.xlu1 %4415, %v227_v17   ;;  %v5071_v17 = vld [vmem:[%s6050_s4 + $0x20] sm:$0xff] }
  0x36   :  { %208 = vperm.xlu1 %4415, %v162_v18   ;;  %v5080_v18 = vld [vmem:[%s6050_s4 + $0x28] sm:$0xff] }
  0x3a   :  { %213 = vperm.xlu1 %4415, %v163_v19   ;;  %v5085_v19 = vld [vmem:[%s6050_s4 + $0x30] sm:$0xff] }
  0x3e   :  { %242 = vperm.xlu1 %4415, %v228_v20   ;;  %v5094_v20 = vld [vmem:[%s6050_s4 + $0x38] sm:$0xff] }
  0x42   :  { %247 = vperm.xlu1 %4415, %v229_v21   ;;  %v5099_v21 = vld [vmem:[%s6050_s4 + $0x40] sm:$0xff] }
  0x46   :  { %218 = vperm.xlu1 %4415, %v164_v22   ;;  %v5108_v22 = vld [vmem:[%s6050_s4 + $0x48] sm:$0xff] }
  0x4a   :  { %223 = vperm.xlu1 %4415, %v165_v23   ;;  %v5113_v23 = vld [vmem:[%s6050_s4 + $0x50] sm:$0xff] }
  0x6a   :  { %256 = vperm.xlu0 %4414, %v250_v24   ;;  %v5122_v24 = vld [vmem:[%s6050_s4 + $0x58] sm:$0xff] }
  0x81   :  { %v5037_v1 = vpop.permute.xlu1 %261 }
  0x85   :  { %v49_v25 = vpop.trf.xlu0  ;;  %v5039_v2 = vpop.permute.xlu1 %266 }
  0x86   :  { %98 = vst.msk [vmem:[#allocation2] sm:$0xff] %vm97_vm1, %v49_v25 }
  0x89   :  { %v50_v26 = vpop.trf.xlu0  ;;  %v5045_v5 = vpop.permute.xlu1 %271 }
  0x8a   :  { %99 = vst.msk [vmem:[#allocation2 + $0x8] sm:$0xff] %vm97_vm1, %v50_v26  ;;  %v4167_v6 = vpack.c.bf16 %v5045_v5, %v5039_v2 }
  0x8d   :  { %v51_v27 = vpop.trf.xlu0  ;;  %v274_v28 = vld [vmem:[#allocation2] sm:$0xff] }
  0x8e   :  { %100 = vst.msk [vmem:[#allocation2 + $0x10] sm:$0xff] %vm97_vm1, %v51_v27 }
  0x91   :  { %v52_v29 = vpop.trf.xlu0  ;;  %v275_v30 = vld [vmem:[#allocation2 + $0x8] sm:$0xff] }
  0x92   :  { %101 = vst.msk [vmem:[#allocation2 + $0x18] sm:$0xff] %vm97_vm1, %v52_v29  ;;  %v4155_v31 = vpack.c.bf16 %v275_v30, %v274_v28  ;;  %v5160_v29 = vpop.permute.xlu1 %168 }
  0x94   :  { %4156 = vmatprep.subr.bf16.mxu0 %v4155_v31 }
  0x95   :  { %v53_v32 = vpop.trf.xlu0  ;;  %4158 = vmatpush3.bf16.msra.mxu0 %v4155_v31  ;;  %v276_v33 = vld [vmem:[#allocation2 + $0x10] sm:$0xff] }
  0x96   :  { %102 = vst.msk [vmem:[#allocation2 + $0x20] sm:$0xff] %vm97_vm1, %v53_v32  ;;  %v5162_v30 = vpop.permute.xlu1 %173 }
  0x99   :  { %v54_v34 = vpop.trf.xlu0  ;;  %v277_v35 = vld [vmem:[#allocation2 + $0x18] sm:$0xff] }
  0x9a   :  { %103 = vst.msk [vmem:[#allocation2 + $0x28] sm:$0xff] %vm97_vm1, %v54_v34  ;;  %v4159_v36 = vpack.c.bf16 %v277_v35, %v276_v33  ;;  %v5172_v35 = vpop.permute.xlu1 %178 }
  0x9c   :  { %4160 = vmatprep.subr.bf16.mxu0 %v4159_v36 }
  0x9d   :  { %4162 = vmatpush3.bf16.msra.mxu0 %v4159_v36  ;;  %v55_v37 = vpop.trf.xlu0  ;;  %v693_v40 = vld [vmem:[#allocation2 + $0x20] sm:$0xff] }
  0x9e   :  { %104 = vst.msk [vmem:[#allocation2 + $0x30] sm:$0xff] %vm97_vm1, %v55_v37  ;;  %v5174_v36 = vpop.permute.xlu1 %183 }
  0xa0   :  { %3748 = vmatmul.mubr.msk.f32.vlgmr.msra.gmra.mrb[0].mxu0 %vm278_vm0, %v4922_v38 }
  0xa1   :  { %v56_v41 = vpop.trf.xlu0  ;;  %3750 = vmatprep.mubr.msk.f32.mxu0 %vm278_vm0, %v4928_v39  ;;  %v694_v43 = vld [vmem:[#allocation2 + $0x28] sm:$0xff] }
  0xa2   :  { %105 = vst.msk [vmem:[#allocation2 + $0x38] sm:$0xff] %vm97_vm1, %v56_v41  ;;  %v4171_v45 = vpack.c.bf16 %v694_v43, %v693_v40  ;;  %v5176_v37 = vpop.permute.xlu1 %188  ;;  %v28_v41 = vld [vmem:[%s6046_s0 + $0x8] sm:$0xff] }
  0xa3   :  { %v30_v43 = vld [vmem:[%s6047_s1 + $0x8] sm:$0xff] }
  0xa4   :  { %3751 = vmatmul.mubr.msk.f32.gmra.mrb[2].mxu0 %vm278_vm0, %v4937_v42  ;;  %4172 = vmatprep.subr.bf16.mxu1 %v4171_v45 }
  0xa5   :  { %3753 = vmatprep.mubr.msk.f32.mxu0 %vm278_vm0, %v4943_v44  ;;  %4174 = vmatpush3.bf16.msra.mxu1 %v4171_v45  ;;  %v57_v47 = vpop.trf.xlu0  ;;  %v695_v49 = vld [vmem:[#allocation2 + $0x30] sm:$0xff]  ;;  %v32_v45 = vadd.f32 %v30_v43, %v28_v41 }
  0xa6   :  { %106 = vst.msk [vmem:[#allocation2 + $0x40] sm:$0xff] %vm97_vm1, %v57_v47  ;;  %v5178_v40 = vpop.permute.xlu1 %193 }
  0xa7   :  { %65 = vxpose.xlu1.b32.start.end [1/1] (short) %v32_v45, 128 }
  0xa8   :  { %3754 = vmatmul.mubr.msk.f32.gmra.mrb[4].mxu0 %vm278_vm0, %v4952_v46 }
  0xa9   :  { %3756 = vmatprep.mubr.msk.f32.mxu0 %vm278_vm0, %v4957_v48  ;;  %v696_v51 = vld [vmem:[#allocation2 + $0x38] sm:$0xff]  ;;  %v58_v52 = vpop.trf.xlu0 }
  0xaa   :  { %v4175_v53 = vpack.c.bf16 %v696_v51, %v695_v49  ;;  %107 = vst.msk [vmem:[#allocation2 + $0x48] sm:$0xff] %vm97_vm1, %v58_v52  ;;  %v5186_v47 = vpop.permute.xlu1 %198 }
  0xab   :  { %6070 = vst [vmem:[#allocation11_spill] sm:$0xff] %v5186_v47 }
  0xac   :  { %3757 = vmatmul.mubr.msk.f32.gmra.mrb[6].mxu0 %vm278_vm0, %v4967_v50  ;;  %4176 = vmatprep.subr.bf16.mxu1 %v4175_v53 }
  0xad   :  { %4178 = vmatpush3.bf16.msra.mxu1 %v4175_v53  ;;  %3759 = vmatprep.mubr.msk.f32.mxu0 %vm278_vm0, %v4972_v54  ;;  %v59_v56 = vpop.trf.xlu0  ;;  %v1039_v7 = vld [vmem:[#allocation2 + $0x40] sm:$0xff] }
  0xae   :  { %108 = vst.msk [vmem:[#allocation2 + $0x50] sm:$0xff] %vm97_vm1, %v59_v56  ;;  %v5188_v49 = vpop.permute.xlu1 %203 }
  0xaf   :  { %6071 = vst [vmem:[#allocation12_spill] sm:$0xff] %v5188_v49 }
  0xb0   :  { %3760 = vmatmul.mubr.msk.f32.gmra.mrb[8].mxu0 %vm278_vm0, %v4982_v55  ;;  %3800 = vmatmul.mubr.msk.f32.vlgmr.msra.gmra.mrb[0].mxu1 %vm278_vm0, %v4922_v38 }
  0xb1   :  { %3762 = vmatprep.mubr.msk.f32.mxu0 %vm278_vm0, %v4987_v57  ;;  %3802 = vmatprep.mubr.msk.f32.mxu1 %vm278_vm0, %v4928_v39  ;;  %v60_v59 = vpop.trf.xlu0  ;;  %v1040_v8 = vld [vmem:[#allocation2 + $0x48] sm:$0xff] }
  0xb2   :  { %109 = vst.msk [vmem:[#allocation2 + $0x58] sm:$0xff] %vm97_vm1, %v60_v59  ;;  %v4187_v9 = vpack.c.bf16 %v1040_v8, %v1039_v7  ;;  %v5190_v51 = vpop.permute.xlu1 %232 }
  0xb3   :  { %6072 = vst [vmem:[#allocation13_spill] sm:$0xff] %v5190_v51 }
  0xb4   :  { %3763 = vmatmul.mubr.msk.f32.gmra.mrb[10].mxu0 %vm278_vm0, %v5001_v58  ;;  %3803 = vmatmul.mubr.msk.f32.gmra.mrb[2].mxu1 %vm278_vm0, %v4937_v42 }
  0xb5   :  { %3805 = vmatprep.mubr.msk.f32.mxu1 %vm278_vm0, %v4943_v44  ;;  %v61_v61 = vpop.trf.xlu0  ;;  %3773 = vmatprep.mubr.msk.f32.mxu0 %vm278_vm0, %v5007_v60  ;;  %v1041_v11 = vld [vmem:[#allocation2 + $0x50] sm:$0xff] }
  0xb6   :  { %110 = vst.msk [vmem:[#allocation2 + $0x60] sm:$0xff] %vm97_vm1, %v61_v61  ;;  %v5192_v52 = vpop.permute.xlu1 %237 }
  0xb7   :  { %6073 = vst [vmem:[#allocation14_spill] sm:$0xff] %v5192_v52 }
  0xb8   :  { %3806 = vmatmul.mubr.msk.f32.gmra.mrb[4].mxu1 %vm278_vm0, %v4952_v46 }
  0xb9   :  { %3808 = vmatprep.mubr.msk.f32.mxu1 %vm278_vm0, %v4957_v48  ;;  %v62_v62 = vpop.trf.xlu0  ;;  %v1042_v13 = vld [vmem:[#allocation2 + $0x58] sm:$0xff] }
  0xba   :  { %111 = vst.msk [vmem:[#allocation2 + $0x68] sm:$0xff] %vm97_vm1, %v62_v62  ;;  %v4191_v15 = vpack.c.bf16 %v1042_v13, %v1041_v11  ;;  %v5195_v61 = vpop.permute.xlu1 %208 }
  0xbc   :  { %3809 = vmatmul.mubr.msk.f32.gmra.mrb[6].mxu1 %vm278_vm0, %v4967_v50 }
  0xbd   :  { %3811 = vmatprep.mubr.msk.f32.mxu1 %vm278_vm0, %v4972_v54  ;;  %v63_v63 = vpop.trf.xlu0 }
  0xbe   :  { %112 = vst.msk [vmem:[#allocation2 + $0x70] sm:$0xff] %vm97_vm1, %v63_v63  ;;  %v5200_v11 = vpop.permute.xlu1 %213 }
  0xc0   :  { %3812 = vmatmul.mubr.msk.f32.gmra.mrb[8].mxu1 %vm278_vm0, %v4982_v55 }
  0xc1   :  { %3814 = vmatprep.mubr.msk.f32.mxu1 %vm278_vm0, %v4987_v57  ;;  %v64_v0 = vpop.trf.xlu0 }
  0xc2   :  { %113 = vst.msk [vmem:[#allocation2 + $0x78] sm:$0xff] %vm97_vm1, %v64_v0 }
  0xc4   :  { %3815 = vmatmul.mubr.msk.f32.gmra.mrb[10].mxu1 %vm278_vm0, %v5001_v58 }
  0xc5   :  { %3825 = vmatprep.mubr.msk.f32.mxu1 %vm278_vm0, %v5007_v60 }
  0xe9   :  { %v5041_v3 = vpop.permute.xlu0 %256 }
  0xea   :  { %v4163_v4 = vpack.c.bf16 %v5037_v1, %v5041_v3 }
  0xec   :  { %4164 = vmatprep.subr.bf16.mxu0 %v4163_v4 }
  0xed   :  { %4166 = vmatpush3.bf16.msra.mxu0 %v4163_v4 }
  0xee   :  { %4168 = vmatprep.subr.bf16.mxu0 %v4167_v6 }
  0xf1   :  { %4170 = vmatpush3.bf16.msra.mxu0 %v4167_v6 }
  0xf2   :  { %4188 = vmatprep.subr.bf16.mxu0 %v4187_v9 }
  0xf4   :  { %3774 = vmatmul.mubr.msk.f32.vlgmr.msra.gmra.mrb[0].mxu0 %vm278_vm0, %v5052_v10 }
  0xf5   :  { %4190 = vmatpush3.bf16.msra.mxu0 %v4187_v9  ;;  %3776 = vmatprep.mubr.msk.f32.mxu0 %vm278_vm0, %v5057_v14 }
  0xf6   :  { %4192 = vmatprep.subr.bf16.mxu0 %v4191_v15 }
  0xf8   :  { %3777 = vmatmul.mubr.msk.f32.gmra.mrb[2].mxu0 %vm278_vm0, %v5066_v16 }
  0xf9   :  { %4194 = vmatpush3.bf16.msra.mxu0 %v4191_v15  ;;  %3779 = vmatprep.mubr.msk.f32.mxu0 %vm278_vm0, %v5071_v17 }
  0xfc   :  { %3780 = vmatmul.mubr.msk.f32.gmra.mrb[4].mxu0 %vm278_vm0, %v5080_v18 }
  0xfd   :  { %3782 = vmatprep.mubr.msk.f32.mxu0 %vm278_vm0, %v5085_v19 }
 0x100   :  { %3783 = vmatmul.mubr.msk.f32.gmra.mrb[6].mxu0 %vm278_vm0, %v5094_v20 }
 0x101   :  { %3785 = vmatprep.mubr.msk.f32.mxu0 %vm278_vm0, %v5099_v21 }
 0x104   :  { %3786 = vmatmul.mubr.msk.f32.gmra.mrb[12].mxu0 %vm278_vm0, %v5108_v22 }
 0x105   :  { %3788 = vmatprep.mubr.msk.f32.mxu0 %vm278_vm0, %v5113_v23 }
 0x108   :  { %3789 = vmatmul.mubr.msk.f32.gmra.mrb[14].mxu0 %vm278_vm0, %v5122_v24 }
 0x109   :  { %3851 = vmatprep.mubr.msk.f32.mxu0 %vm278_vm0, %v4871_v12 }
 0x10c   :  { %3852 = vmatmul.mubr.msk.f32.vlgmr.msra.gmra.mrb[16].mxu0 %vm278_vm0, %v4922_v38 }
 0x10d   :  { %3854 = vmatprep.mubr.msk.f32.mxu0 %vm278_vm0, %v4928_v39 }
 0x110   :  { %3855 = vmatmul.mubr.msk.f32.gmra.mrb[18].mxu0 %vm278_vm0, %v4937_v42 }
 0x111   :  { %3857 = vmatprep.mubr.msk.f32.mxu0 %vm278_vm0, %v4943_v44 }
 0x114   :  { %3858 = vmatmul.mubr.msk.f32.gmra.mrb[20].mxu0 %vm278_vm0, %v4952_v46 }
 0x115   :  { %3860 = vmatprep.mubr.msk.f32.mxu0 %vm278_vm0, %v4957_v48 }
 0x118   :  { %3861 = vmatmul.mubr.msk.f32.gmra.mrb[22].mxu0 %vm278_vm0, %v4967_v50 }
 0x119   :  { %3863 = vmatprep.mubr.msk.f32.mxu0 %vm278_vm0, %v4972_v54 }
 0x11c   :  { %3864 = vmatmul.mubr.msk.f32.gmra.mrb[24].mxu0 %vm278_vm0, %v4982_v55 }
 0x11d   :  { %3866 = vmatprep.mubr.msk.f32.mxu0 %vm278_vm0, %v4987_v57 }
 0x120   :  { %3867 = vmatmul.mubr.msk.f32.gmra.mrb[26].mxu0 %vm278_vm0, %v5001_v58 }
 0x121   :  { %3877 = vmatprep.mubr.msk.f32.mxu0 %vm278_vm0, %v5007_v60 }
 0x183   :  { %v5152_v25 = vpop.f32.mrb[8].mxu0 }
 0x184   :  { %v5154_v26 = vpop.f32.mrb[9].mxu0 }
 0x187   :  { %v5156_v27 = vpop.f32.mrb[10].mxu0 }
 0x188   :  { %v5158_v28 = vpop.f32.mrb[11].mxu0 }
 0x193   :  { %v5164_v31 = vpop.f32.mrb[8].mxu1 }
 0x194   :  { %6066 = vst [vmem:[#allocation7_spill] sm:$0xff] %v5164_v31  ;;  %v5166_v32 = vpop.f32.mrb[9].mxu1 }
 0x195   :  { %6067 = vst [vmem:[#allocation8_spill] sm:$0xff] %v5166_v32 }
 0x197   :  { %v5168_v33 = vpop.f32.mrb[10].mxu1 }
 0x198   :  { %6068 = vst [vmem:[#allocation9_spill] sm:$0xff] %v5168_v33  ;;  %v5170_v34 = vpop.f32.mrb[11].mxu1 }
 0x199   :  { %6069 = vst [vmem:[#allocation10_spill] sm:$0xff] %v5170_v34 }
 0x1c7   :  { %v3775_v53 = vpop.f32.mrb[0].mxu0 }
 0x1c8   :  { %v4283_v56 = vadd.f32 %v3775_v53, %v5162_v30  ;;  %v542_v59 = vpop.f32.mrb[1].mxu0 }
 0x1c9   :  { %v4284_v62 = vadd.f32 %v542_v59, %v5160_v29 }
 0x1ca   :  { %v3252_v63 = vmul.f32 -1.442695, %v4283_v56 }
 0x1cb   :  { %v3251_v0 = vmul.f32 -1.442695, %v4284_v62  ;;  %v3778_v4 = vpop.f32.mrb[2].mxu0 }
 0x1cc   :  { %4416 = vpow2.f32 %v3252_v63  ;;  %v4285_v6 = vadd.f32 %v3778_v4, %v5174_v36  ;;  %v552_v7 = vpop.f32.mrb[3].mxu0 }
 0x1cd   :  { %4418 = vpow2.f32 %v3251_v0  ;;  %v4286_v8 = vadd.f32 %v552_v7, %v5172_v35  ;;  %v5205_v0 = vpop.permute.xlu1 %242 }
 0x1ce   :  { %v3254_v9 = vmul.f32 -1.442695, %v4285_v6 }
 0x1cf   :  { %v3253_v13 = vmul.f32 -1.442695, %v4286_v8  ;;  %v3781_v15 = vpop.f32.mrb[4].mxu0 }
 0x1d0   :  { %4420 = vpow2.f32 %v3254_v9  ;;  %v4287_v41 = vadd.f32 %v3781_v15, %v5178_v40  ;;  %v562_v43 = vpop.f32.mrb[5].mxu0 }
 0x1d1   :  { %4422 = vpow2.f32 %v3253_v13  ;;  %v4288_v45 = vadd.f32 %v562_v43, %v5176_v37 }
 0x1d2   :  { %v3256_v53 = vmul.f32 -1.442695, %v4287_v41 }
 0x1d3   :  { %v3255_v56 = vmul.f32 -1.442695, %v4288_v45  ;;  %v3784_v59 = vpop.f32.mrb[6].mxu0 }
 0x1d4   :  { %4424 = vpow2.f32 %v3256_v53  ;;  %v4289_v62 = vadd.f32 %v3784_v59, %v5188_v49  ;;  %v572_v63 = vpop.f32.mrb[7].mxu0  ;;  %v5208_v53 = vpop.permute.xlu1 %247 }
 0x1d5   :  { %4426 = vpow2.f32 %v3255_v56  ;;  %v4290_v4 = vadd.f32 %v572_v63, %v5186_v47 }
 0x1d6   :  { %v4417_v6 = vpop.eup %4416  ;;  %v3258_v7 = vmul.f32 -1.442695, %v4289_v62 }
 0x1d7   :  { %v4419_v8 = vpop.eup %4418  ;;  %v618_v9 = vadd.f32 1.0, %v4417_v6  ;;  %v3257_v15 = vmul.f32 -1.442695, %v4290_v4  ;;  %v3787_v13 = vpop.f32.mrb[12].mxu0 }
 0x1d8   :  { %v617_v34 = vadd.f32 1.0, %v4419_v8  ;;  %4428 = vpow2.f32 %v3258_v7  ;;  %v582_v41 = vpop.f32.mrb[13].mxu0  ;;  %v5210_v4 = vpop.permute.xlu1 %218 }
 0x1d9   :  { %4430 = vrcp.f32 %v618_v9  ;;  %v658_v9 = vadd.f32 %v3787_v13, %v5192_v52  ;;  %v657_v47 = vadd.f32 %v582_v41, %v5190_v51 }
 0x1da   :  { %v4421_v43 = vpop.eup %4420  ;;  %4432 = vrcp.f32 %v617_v34 }
 0x1db   :  { %v4423_v45 = vpop.eup %4422  ;;  %v620_v59 = vadd.f32 1.0, %v4421_v43  ;;  %4434 = vpow2.f32 %v3257_v15  ;;  %v3790_v56 = vpop.f32.mrb[14].mxu0  ;;  %v427_v15 = vadd.f32 %v5152_v25, %v5200_v11 }
 0x1dc   :  { %v619_v33 = vadd.f32 1.0, %v4423_v45  ;;  %v592_v63 = vpop.f32.mrb[15].mxu0  ;;  %v660_v13 = vadd.f32 %v3790_v56, %v5208_v53 }
 0x1dd   :  { %4436 = vrcp.f32 %v620_v59  ;;  %v659_v51 = vadd.f32 %v592_v63, %v5205_v0 }
 0x1de   :  { %v4425_v62 = vpop.eup %4424  ;;  %4438 = vrcp.f32 %v619_v33  ;;  %v422_v33 = vadd.f32 %v5154_v26, %v5195_v61 }
 0x1df   :  { %v4427_v6 = vpop.eup %4426  ;;  %v646_v8 = vadd.f32 1.0, %v4425_v62 }
 0x1e0   :  { %v645_v32 = vadd.f32 1.0, %v4427_v6 }
 0x1e1   :  { %4440 = vrcp.f32 %v646_v8 }
 0x1e2   :  { %v4429_v7 = vpop.eup %4428  ;;  %4442 = vrcp.f32 %v645_v32  ;;  %v432_v32 = vadd.f32 %v5158_v28, %v5210_v4 }
 0x1e3   :  { %v4431_v34 = vpop.eup %4430  ;;  %v648_v31 = vadd.f32 1.0, %v4429_v7  ;;  %v5219_v7 = vpop.permute.xlu1 %223 }
 0x1e4   :  { %v4433_v43 = vpop.eup %4432  ;;  %v662_v45 = vmul.f32 %v4431_v34, %v658_v9  ;;  %v437_v9 = vadd.f32 %v5156_v27, %v5219_v7 }
 0x1e5   :  { %v4435_v59 = vpop.eup %4434  ;;  %v661_v49 = vmul.f32 %v4433_v43, %v657_v47  ;;  %4444 = vrcp.f32 %v648_v31 }
 0x1e6   :  { %v647_v62 = vadd.f32 1.0, %v4435_v59  ;;  %v666_v6 = vadd.f32 %v662_v45, %v427_v15 }
 0x1e7   :  { %v4437_v52 = vpop.eup %4436  ;;  %v665_v41 = vadd.f32 %v661_v49, %v422_v33 }
 0x1e8   :  { %v4439_v25 = vpop.eup %4438  ;;  %4446 = vrcp.f32 %v647_v62  ;;  %v664_v26 = vmul.f32 %v4437_v52, %v660_v13 }
 0x1e9   :  { %4448 = vtanh.f32 %v666_v6  ;;  %v663_v47 = vmul.f32 %v4439_v25, %v659_v51 }
 0x1ea   :  { %4450 = vtanh.f32 %v665_v41  ;;  %v668_v56 = vadd.f32 %v664_v26, %v437_v9 }
 0x1eb   :  { %v667_v8 = vadd.f32 %v663_v47, %v432_v32  ;;  %v4441_v31 = vpop.eup %4440 }
 0x1ec   :  { %4452 = vtanh.f32 %v668_v56  ;;  %v4443_v63 = vpop.eup %4442  ;;  %v674_v15 = vsub.f32 1.0, %v4441_v31  ;;  %v682_v62 = vmul.f32 %v4441_v31, %v5037_v1 }
 0x1ed   :  { %4454 = vtanh.f32 %v667_v8  ;;  %v673_v28 = vsub.f32 1.0, %v4443_v63  ;;  %v681_v13 = vmul.f32 %v4443_v63, %v5041_v3 }
 0x1ef   :  { %v5226_v49 = vpop.f32.mrb[24].mxu0  ;;  %v4445_v43 = vpop.eup %4444 }
 0x1f0   :  { %6074 = vst [vmem:[#allocation15_spill] sm:$0xff] %v5226_v49  ;;  %v5228_v34 = vpop.f32.mrb[25].mxu0  ;;  %v676_v41 = vsub.f32 1.0, %v4445_v43  ;;  %v684_v8 = vmul.f32 %v4445_v43, %v5045_v5  ;;  %v1385_v5 = vld [vmem:[#allocation2 + $0x60] sm:$0xff]  ;;  %v1386_v43 = vld [vmem:[#allocation2 + $0x68] sm:$0xff] }
 0x1f1   :  { %6075 = vst [vmem:[#allocation16_spill] sm:$0xff] %v5228_v34 }
 0x1f2   :  { %v4447_v27 = vpop.eup %4446 }
 0x1f3   :  { %v4449_v52 = vpop.eup %4448  ;;  %v5230_v45 = vpop.f32.mrb[26].mxu0  ;;  %v675_v26 = vsub.f32 1.0, %v4447_v27  ;;  %v683_v1 = vmul.f32 %v4447_v27, %v5039_v2  ;;  %v4203_v27 = vpack.c.bf16 %v1386_v43, %v1385_v5 }
 0x1f4   :  { %6076 = vst [vmem:[#allocation17_spill] sm:$0xff] %v5230_v45  ;;  %v4451_v59 = vpop.eup %4450  ;;  %v5232_v51 = vpop.f32.mrb[27].mxu0  ;;  %v678_v33 = vmul.f32 %v4449_v52, %v674_v15 }
 0x1f5   :  { %6077 = vst [vmem:[#allocation18_spill] sm:$0xff] %v5232_v51  ;;  %v677_v6 = vmul.f32 %v4451_v59, %v673_v28  ;;  %v1387_v28 = vld [vmem:[#allocation2 + $0x70] sm:$0xff]  ;;  %v1388_v59 = vld [vmem:[#allocation2 + $0x78] sm:$0xff] }
 0x1f6   :  { %v4453_v25 = vpop.eup %4452  ;;  %v5236_v9 = vadd.f32 %v682_v62, %v678_v33  ;;  %v4207_v33 = vpack.c.bf16 %v1388_v59, %v1387_v28 }
 0x1f7   :  { %v4455_v32 = vpop.eup %4454  ;;  %v5238_v47 = vadd.f32 %v681_v13, %v677_v6  ;;  %v680_v56 = vmul.f32 %v4453_v25, %v676_v41 }
 0x1f8   :  { %690 = vst.msk [vmem:[#allocation3 + $0x8] sm:$0xff] %vm97_vm1, %v5236_v9  ;;  %v679_v15 = vmul.f32 %v4455_v32, %v675_v26 }
 0x1f9   :  { %689 = vst.msk [vmem:[#allocation3] sm:$0xff] %vm97_vm1, %v5238_v47  ;;  %v4179_v3 = vpack.c.bf16 %v5236_v9, %v5238_v47  ;;  %v5248_v31 = vadd.f32 %v684_v8, %v680_v56 }
 0x1fa   :  { %v5250_v63 = vadd.f32 %v683_v1, %v679_v15 }
 0x1fb   :  { %4180 = vmatprep.subr.bf16.mxu1 %v4179_v3  ;;  %692 = vst.msk [vmem:[#allocation3 + $0x18] sm:$0xff] %vm97_vm1, %v5248_v31 }
 0x1fc   :  { %4182 = vmatpush3.bf16.msra.mxu1 %v4179_v3  ;;  %691 = vst.msk [vmem:[#allocation3 + $0x10] sm:$0xff] %vm97_vm1, %v5250_v63  ;;  %v4183_v2 = vpack.c.bf16 %v5248_v31, %v5250_v63 }
 0x1fe   :  { %4184 = vmatprep.subr.bf16.mxu1 %v4183_v2 }
 0x1ff   :  { %v3116_v62 = vld [vmem:[#allocation3 + $0x8] sm:$0xff] }
 0x200   :  { %4186 = vmatpush3.bf16.msra.mxu1 %v4183_v2  ;;  %v3115_v52 = vld [vmem:[#allocation3] sm:$0xff] }
 0x201   :  { %3147 = vxpose.xlu0.b32.start [1/16] (narrow) %v3115_v52, 8  ;;  %4204 = vmatprep.subr.bf16.mxu1 %v4203_v27 }
 0x202   :  { %v3118_v13 = vld [vmem:[#allocation3 + $0x18] sm:$0xff] }
 0x203   :  { %3826 = vmatmul.mubr.msk.f32.vlgmr.msra.gmra.mrb[0].mxu1 %vm278_vm0, %v5052_v10  ;;  %v3117_v6 = vld [vmem:[#allocation3 + $0x10] sm:$0xff] }
 0x204   :  { %4206 = vmatpush3.bf16.msra.mxu1 %v4203_v27  ;;  %3828 = vmatprep.mubr.msk.f32.mxu1 %vm278_vm0, %v5057_v14 }
 0x205   :  { %3148 = vxpose.xlu0.b32.cont [2/16] (narrow) %v3116_v62, 8  ;;  %4208 = vmatprep.subr.bf16.mxu1 %v4207_v33 }
 0x207   :  { %3829 = vmatmul.mubr.msk.f32.gmra.mrb[2].mxu1 %vm278_vm0, %v5066_v16 }
 0x208   :  { %4210 = vmatpush3.bf16.msra.mxu1 %v4207_v33  ;;  %3831 = vmatprep.mubr.msk.f32.mxu1 %vm278_vm0, %v5071_v17 }
 0x209   :  { %3149 = vxpose.xlu0.b32.cont [3/16] (narrow) %v3117_v6, 8 }
 0x20b   :  { %3832 = vmatmul.mubr.msk.f32.gmra.mrb[4].mxu1 %vm278_vm0, %v5080_v18 }
 0x20c   :  { %3834 = vmatprep.mubr.msk.f32.mxu1 %vm278_vm0, %v5085_v19 }
 0x20d   :  { %3150 = vxpose.xlu0.b32.cont [4/16] (narrow) %v3118_v13, 8 }
 0x20f   :  { %3835 = vmatmul.mubr.msk.f32.gmra.mrb[6].mxu1 %vm278_vm0, %v5094_v20 }
 0x210   :  { %3837 = vmatprep.mubr.msk.f32.mxu1 %vm278_vm0, %v5099_v21 }
 0x213   :  { %3838 = vmatmul.mubr.msk.f32.gmra.mrb[12].mxu1 %vm278_vm0, %v5108_v22 }
 0x214   :  { %3840 = vmatprep.mubr.msk.f32.mxu1 %vm278_vm0, %v5113_v23 }
 0x217   :  { %3841 = vmatmul.mubr.msk.f32.gmra.mrb[14].mxu1 %vm278_vm0, %v5122_v24 }
 0x218   :  { %3903 = vmatprep.mubr.msk.f32.mxu1 %vm278_vm0, %v4871_v12  ;;  %v81_v12 = vpop.trf.xlu1 }
 0x219   :  { %114 = vst.msk [vmem:[#allocation2 + $0x80] sm:$0xff] %vm97_vm1, %v81_v12 }
 0x21b   :  { %3904 = vmatmul.mubr.msk.f32.vlgmr.msra.gmra.mrb[16].mxu1 %vm278_vm0, %v4922_v38 }
 0x21c   :  { %3906 = vmatprep.mubr.msk.f32.mxu1 %vm278_vm0, %v4928_v39  ;;  %v82_v41 = vpop.trf.xlu1 }
 0x21d   :  { %115 = vst.msk [vmem:[#allocation2 + $0x88] sm:$0xff] %vm97_vm1, %v82_v41 }
 0x21f   :  { %3907 = vmatmul.mubr.msk.f32.gmra.mrb[18].mxu1 %vm278_vm0, %v4937_v42 }
 0x220   :  { %3909 = vmatprep.mubr.msk.f32.mxu1 %vm278_vm0, %v4943_v44  ;;  %v83_v25 = vpop.trf.xlu1 }
 0x221   :  { %116 = vst.msk [vmem:[#allocation2 + $0x90] sm:$0xff] %vm97_vm1, %v83_v25  ;;  %v6078_v25 = vld [vmem:[#allocation12_spill] sm:$0xff] }
 0x223   :  { %3910 = vmatmul.mubr.msk.f32.gmra.mrb[20].mxu1 %vm278_vm0, %v4952_v46 }
 0x224   :  { %3912 = vmatprep.mubr.msk.f32.mxu1 %vm278_vm0, %v4957_v48  ;;  %v84_v26 = vpop.trf.xlu1 }
 0x225   :  { %117 = vst.msk [vmem:[#allocation2 + $0x98] sm:$0xff] %vm97_vm1, %v84_v26 }
 0x227   :  { %3913 = vmatmul.mubr.msk.f32.gmra.mrb[22].mxu1 %vm278_vm0, %v4967_v50 }
 0x228   :  { %3915 = vmatprep.mubr.msk.f32.mxu1 %vm278_vm0, %v4972_v54 }
 0x22b   :  { %3916 = vmatmul.mubr.msk.f32.gmra.mrb[24].mxu1 %vm278_vm0, %v4982_v55 }
 0x22c   :  { %3918 = vmatprep.mubr.msk.f32.mxu1 %vm278_vm0, %v4987_v57 }
 0x22f   :  { %3919 = vmatmul.mubr.msk.f32.gmra.mrb[26].mxu1 %vm278_vm0, %v5001_v58 }
 0x230   :  { %3929 = vmatprep.mubr.msk.f32.mxu1 %vm278_vm0, %v5007_v60 }
 0x2d6   :  { %v3827_v32 = vpop.f32.mrb[0].mxu1 }
 0x2d7   :  { %v4291_v56 = vadd.f32 %v3827_v32, %v5162_v30  ;;  %v888_v8 = vpop.f32.mrb[1].mxu1 }
 0x2d8   :  { %v4292_v15 = vadd.f32 %v888_v8, %v5160_v29 }
 0x2d9   :  { %v3284_v1 = vmul.f32 -1.442695, %v4291_v56  ;;  %v6079_v56 = vld [vmem:[#allocation11_spill] sm:$0xff] }
 0x2da   :  { %v3283_v3 = vmul.f32 -1.442695, %v4292_v15  ;;  %v3830_v2 = vpop.f32.mrb[2].mxu1 }
 0x2db   :  { %4456 = vpow2.f32 %v3284_v1  ;;  %v4293_v5 = vadd.f32 %v3830_v2, %v5174_v36  ;;  %v898_v43 = vpop.f32.mrb[3].mxu1 }
 0x2dc   :  { %4458 = vpow2.f32 %v3283_v3  ;;  %v4294_v27 = vadd.f32 %v898_v43, %v5172_v35 }
 0x2dd   :  { %v3286_v52 = vmul.f32 -1.442695, %v4293_v5 }
 0x2de   :  { %v3285_v28 = vmul.f32 -1.442695, %v4294_v27  ;;  %v3833_v59 = vpop.f32.mrb[4].mxu1 }
 0x2df   :  { %4460 = vpow2.f32 %v3286_v52  ;;  %v4295_v33 = vadd.f32 %v3833_v59, %v5178_v40  ;;  %v908_v62 = vpop.f32.mrb[5].mxu1 }
 0x2e0   :  { %4462 = vpow2.f32 %v3285_v28  ;;  %v4296_v6 = vadd.f32 %v908_v62, %v5176_v37 }
 0x2e1   :  { %v3288_v13 = vmul.f32 -1.442695, %v4295_v33 }
 0x2e2   :  { %v3287_v12 = vmul.f32 -1.442695, %v4296_v6  ;;  %v3836_v41 = vpop.f32.mrb[6].mxu1 }
 0x2e3   :  { %4464 = vpow2.f32 %v3288_v13  ;;  %v4297_v26 = vadd.f32 %v3836_v41, %v6078_v25  ;;  %v918_v32 = vpop.f32.mrb[7].mxu1 }
 0x2e4   :  { %4466 = vpow2.f32 %v3287_v12  ;;  %v4298_v8 = vadd.f32 %v918_v32, %v6079_v56 }
 0x2e5   :  { %v4457_v15 = vpop.eup %4456  ;;  %v3290_v1 = vmul.f32 -1.442695, %v4297_v26 }
 0x2e6   :  { %v4459_v3 = vpop.eup %4458  ;;  %v964_v2 = vadd.f32 1.0, %v4457_v15  ;;  %v3289_v5 = vmul.f32 -1.442695, %v4298_v8  ;;  %v3839_v43 = vpop.f32.mrb[12].mxu1  ;;  %v6080_v15 = vld [vmem:[#allocation14_spill] sm:$0xff] }
 0x2e7   :  { %v963_v27 = vadd.f32 1.0, %v4459_v3  ;;  %4468 = vpow2.f32 %v3290_v1  ;;  %v928_v52 = vpop.f32.mrb[13].mxu1  ;;  %v1004_v3 = vadd.f32 %v3839_v43, %v6080_v15 }
 0x2e8   :  { %4470 = vrcp.f32 %v964_v2  ;;  %v6081_v2 = vld [vmem:[#allocation13_spill] sm:$0xff] }
 0x2e9   :  { %v4461_v28 = vpop.eup %4460  ;;  %4472 = vrcp.f32 %v963_v27  ;;  %v1003_v45 = vadd.f32 %v928_v52, %v6081_v2 }
 0x2ea   :  { %v4463_v59 = vpop.eup %4462  ;;  %v966_v33 = vadd.f32 1.0, %v4461_v28  ;;  %4474 = vpow2.f32 %v3289_v5  ;;  %v3842_v62 = vpop.f32.mrb[14].mxu1  ;;  %v6082_v28 = vld [vmem:[#allocation7_spill] sm:$0xff] }
 0x2eb   :  { %v965_v6 = vadd.f32 1.0, %v4463_v59  ;;  %v938_v13 = vpop.f32.mrb[15].mxu1  ;;  %v809_v5 = vadd.f32 %v6082_v28, %v5200_v11  ;;  %v1006_v43 = vadd.f32 %v3842_v62, %v5208_v53  ;;  %v6084_v28 = vld [vmem:[#allocation9_spill] sm:$0xff] }
 0x2ec   :  { %4476 = vrcp.f32 %v966_v33  ;;  %v6083_v33 = vld [vmem:[#allocation8_spill] sm:$0xff]  ;;  %v1005_v52 = vadd.f32 %v938_v13, %v5205_v0 }
 0x2ed   :  { %v4465_v12 = vpop.eup %4464  ;;  %4478 = vrcp.f32 %v965_v6  ;;  %v804_v49 = vadd.f32 %v6083_v33, %v5195_v61  ;;  %v6085_v33 = vld [vmem:[#allocation10_spill] sm:$0xff] }
 0x2ee   :  { %v4467_v41 = vpop.eup %4466  ;;  %v992_v26 = vadd.f32 1.0, %v4465_v12 }
 0x2ef   :  { %v991_v8 = vadd.f32 1.0, %v4467_v41 }
 0x2f0   :  { %4480 = vrcp.f32 %v992_v26  ;;  %v814_v26 = vadd.f32 %v6085_v33, %v5210_v4 }
 0x2f1   :  { %v4469_v32 = vpop.eup %4468  ;;  %4482 = vrcp.f32 %v991_v8 }
 0x2f2   :  { %v4471_v1 = vpop.eup %4470  ;;  %v994_v51 = vadd.f32 1.0, %v4469_v32 }
 0x2f3   :  { %v4473_v27 = vpop.eup %4472  ;;  %v1008_v34 = vmul.f32 %v4471_v1, %v1004_v3  ;;  %v819_v3 = vadd.f32 %v6084_v28, %v5219_v7 }
 0x2f4   :  { %v4475_v59 = vpop.eup %4474  ;;  %v1007_v6 = vmul.f32 %v4473_v27, %v1003_v45  ;;  %4484 = vrcp.f32 %v994_v51 }
 0x2f5   :  { %v993_v12 = vadd.f32 1.0, %v4475_v59  ;;  %v1012_v41 = vadd.f32 %v1008_v34, %v809_v5 }
 0x2f6   :  { %v4477_v15 = vpop.eup %4476  ;;  %v1011_v32 = vadd.f32 %v1007_v6, %v804_v49 }
 0x2f7   :  { %v4479_v2 = vpop.eup %4478  ;;  %4486 = vrcp.f32 %v993_v12  ;;  %v1010_v1 = vmul.f32 %v4477_v15, %v1006_v43 }
 0x2f8   :  { %4488 = vtanh.f32 %v1012_v41  ;;  %v1009_v45 = vmul.f32 %v4479_v2, %v1005_v52 }
 0x2f9   :  { %4490 = vtanh.f32 %v1011_v32  ;;  %v1014_v34 = vadd.f32 %v1010_v1, %v819_v3 }
 0x2fa   :  { %v1013_v8 = vadd.f32 %v1009_v45, %v814_v26  ;;  %v4481_v51 = vpop.eup %4480 }
 0x2fb   :  { %4492 = vtanh.f32 %v1014_v34  ;;  %v4483_v62 = vpop.eup %4482  ;;  %v1020_v59 = vsub.f32 1.0, %v4481_v51  ;;  %v1028_v32 = vmul.f32 %v4481_v51, %v5236_v9 }
 0x2fc   :  { %4494 = vtanh.f32 %v1013_v8  ;;  %v1019_v12 = vsub.f32 1.0, %v4483_v62  ;;  %v1027_v28 = vmul.f32 %v4483_v62, %v5238_v47 }
 0x2fe   :  { %v5330_v49 = vpop.f32.mrb[24].mxu1  ;;  %v4485_v27 = vpop.eup %4484 }
 0x2ff   :  { %v5332_v13 = vpop.f32.mrb[25].mxu1  ;;  %v1022_v3 = vsub.f32 1.0, %v4485_v27 }
 0x301   :  { %v4487_v5 = vpop.eup %4486 }
 0x302   :  { %v4489_v15 = vpop.eup %4488  ;;  %v5334_v6 = vpop.f32.mrb[26].mxu1  ;;  %v1021_v26 = vsub.f32 1.0, %v4487_v5  ;;  %v1029_v9 = vmul.f32 %v4487_v5, %v5250_v63  ;;  %v1734_v5 = vld [vmem:[#allocation2 + $0x98] sm:$0xff] }
 0x303   :  { %6086 = vst [vmem:[#allocation7_spill] sm:$0xff] %v5334_v6  ;;  %v4491_v41 = vpop.eup %4490  ;;  %v5336_v2 = vpop.f32.mrb[27].mxu1  ;;  %v1024_v43 = vmul.f32 %v4489_v15, %v1020_v59  ;;  %v1030_v6 = vmul.f32 %v4485_v27, %v5248_v31  ;;  %v1731_v15 = vld [vmem:[#allocation2 + $0x80] sm:$0xff]  ;;  %v1733_v27 = vld [vmem:[#allocation2 + $0x90] sm:$0xff] }
 0x304   :  { %v1023_v52 = vmul.f32 %v4491_v41, %v1019_v12  ;;  %v1732_v12 = vld [vmem:[#allocation2 + $0x88] sm:$0xff]  ;;  %v4223_v41 = vpack.c.bf16 %v1734_v5, %v1733_v27 }
 0x305   :  { %v4493_v1 = vpop.eup %4492  ;;  %v5340_v33 = vadd.f32 %v1028_v32, %v1024_v43  ;;  %v4219_v63 = vpack.c.bf16 %v1732_v12, %v1731_v15 }
 0x306   :  { %v4495_v45 = vpop.eup %4494  ;;  %v5342_v34 = vadd.f32 %v1027_v28, %v1023_v52  ;;  %v1026_v8 = vmul.f32 %v4493_v1, %v1022_v3 }
 0x307   :  { %1036 = vst.msk [vmem:[#allocation3 + $0x28] sm:$0xff] %vm97_vm1, %v5340_v33  ;;  %v1025_v59 = vmul.f32 %v4495_v45, %v1021_v26 }
 0x308   :  { %1035 = vst.msk [vmem:[#allocation3 + $0x20] sm:$0xff] %vm97_vm1, %v5342_v34  ;;  %v4195_v47 = vpack.c.bf16 %v5340_v33, %v5342_v34  ;;  %v5352_v51 = vadd.f32 %v1030_v6, %v1026_v8 }
 0x309   :  { %v5354_v62 = vadd.f32 %v1029_v9, %v1025_v59 }
 0x30a   :  { %4196 = vmatprep.subr.bf16.mxu0 %v4195_v47  ;;  %1038 = vst.msk [vmem:[#allocation3 + $0x38] sm:$0xff] %vm97_vm1, %v5352_v51 }
 0x30b   :  { %4198 = vmatpush3.bf16.msra.mxu0 %v4195_v47  ;;  %1037 = vst.msk [vmem:[#allocation3 + $0x30] sm:$0xff] %vm97_vm1, %v5354_v62  ;;  %v4199_v31 = vpack.c.bf16 %v5352_v51, %v5354_v62 }
 0x30d   :  { %4200 = vmatprep.subr.bf16.mxu0 %v4199_v31 }
 0x30e   :  { %v3120_v43 = vld [vmem:[#allocation3 + $0x28] sm:$0xff] }
 0x30f   :  { %4202 = vmatpush3.bf16.msra.mxu0 %v4199_v31  ;;  %v3119_v6 = vld [vmem:[#allocation3 + $0x20] sm:$0xff] }
 0x310   :  { %3151 = vxpose.xlu0.b32.cont [5/16] (narrow) %v3119_v6, 8  ;;  %4220 = vmatprep.subr.bf16.mxu0 %v4219_v63 }
 0x312   :  { %3878 = vmatmul.mubr.msk.f32.vlgmr.msra.gmra.mrb[16].mxu0 %vm278_vm0, %v5052_v10  ;;  %v3121_v32 = vld [vmem:[#allocation3 + $0x30] sm:$0xff]  ;;  %v3122_v10 = vld [vmem:[#allocation3 + $0x38] sm:$0xff] }
 0x313   :  { %3880 = vmatprep.mubr.msk.f32.mxu0 %vm278_vm0, %v5057_v14  ;;  %4222 = vmatpush3.bf16.msra.mxu0 %v4219_v63  ;;  %v5387_v14 = vld [vmem:[%s6049_s3] sm:$0xff] }
 0x314   :  { %3152 = vxpose.xlu0.b32.cont [6/16] (narrow) %v3120_v43, 8  ;;  %4224 = vmatprep.subr.bf16.mxu0 %v4223_v41 }
 0x316   :  { %3881 = vmatmul.mubr.msk.f32.gmra.mrb[18].mxu0 %vm278_vm0, %v5066_v16 }
 0x317   :  { %3883 = vmatprep.mubr.msk.f32.mxu0 %vm278_vm0, %v5071_v17  ;;  %4226 = vmatpush3.bf16.msra.mxu0 %v4223_v41 }
 0x318   :  { %3153 = vxpose.xlu0.b32.cont [7/16] (narrow) %v3121_v32, 8 }
 0x31a   :  { %3884 = vmatmul.mubr.msk.f32.gmra.mrb[20].mxu0 %vm278_vm0, %v5080_v18 }
 0x31b   :  { %3886 = vmatprep.mubr.msk.f32.mxu0 %vm278_vm0, %v5085_v19 }
 0x31c   :  { %3154 = vxpose.xlu0.b32.cont [8/16] (narrow) %v3122_v10, 8 }
 0x31e   :  { %3887 = vmatmul.mubr.msk.f32.gmra.mrb[22].mxu0 %vm278_vm0, %v5094_v20 }
 0x31f   :  { %3889 = vmatprep.mubr.msk.f32.mxu0 %vm278_vm0, %v5099_v21 }
 0x322   :  { %3890 = vmatmul.mubr.msk.f32.gmra.mrb[28].mxu0 %vm278_vm0, %v5108_v22 }
 0x323   :  { %3892 = vmatprep.mubr.msk.f32.mxu0 %vm278_vm0, %v5113_v23 }
 0x326   :  { %3893 = vmatmul.mubr.msk.f32.gmra.mrb[30].mxu0 %vm278_vm0, %v5122_v24 }
 0x327   :  { %3955 = vmatprep.mubr.msk.f32.mxu0 %vm278_vm0, %v5387_v14 }
 0x32a   :  { %3956 = vmatmul.mubr.msk.f32.vlgmr.msra.gmra.mrb[32].mxu0 %vm278_vm0, %v4922_v38  ;;  %v85_v38 = vpop.trf.xlu1 }
 0x32b   :  { %3958 = vmatprep.mubr.msk.f32.mxu0 %vm278_vm0, %v4928_v39  ;;  %118 = vst.msk [vmem:[#allocation2 + $0xa0] sm:$0xff] %vm97_vm1, %v85_v38 }
 0x32e   :  { %3959 = vmatmul.mubr.msk.f32.gmra.mrb[34].mxu0 %vm278_vm0, %v4937_v42  ;;  %v86_v39 = vpop.trf.xlu1 }
 0x32f   :  { %3961 = vmatprep.mubr.msk.f32.mxu0 %vm278_vm0, %v4943_v44  ;;  %119 = vst.msk [vmem:[#allocation2 + $0xa8] sm:$0xff] %vm97_vm1, %v86_v39 }
 0x332   :  { %3962 = vmatmul.mubr.msk.f32.gmra.mrb[36].mxu0 %vm278_vm0, %v4952_v46  ;;  %v87_v42 = vpop.trf.xlu1 }
 0x333   :  { %3964 = vmatprep.mubr.msk.f32.mxu0 %vm278_vm0, %v4957_v48  ;;  %120 = vst.msk [vmem:[#allocation2 + $0xb0] sm:$0xff] %vm97_vm1, %v87_v42 }
 0x336   :  { %3965 = vmatmul.mubr.msk.f32.gmra.mrb[38].mxu0 %vm278_vm0, %v4967_v50  ;;  %v88_v44 = vpop.trf.xlu1 }
 0x337   :  { %3967 = vmatprep.mubr.msk.f32.mxu0 %vm278_vm0, %v4972_v54  ;;  %121 = vst.msk [vmem:[#allocation2 + $0xb8] sm:$0xff] %vm97_vm1, %v88_v44  ;;  %v6087_v44 = vld [vmem:[#allocation14_spill] sm:$0xff] }
 0x33a   :  { %3968 = vmatmul.mubr.msk.f32.gmra.mrb[40].mxu0 %vm278_vm0, %v4982_v55 }
 0x33b   :  { %3970 = vmatprep.mubr.msk.f32.mxu0 %vm278_vm0, %v4987_v57 }
 0x33e   :  { %3971 = vmatmul.mubr.msk.f32.gmra.mrb[42].mxu0 %vm278_vm0, %v5001_v58 }
 0x33f   :  { %3981 = vmatprep.mubr.msk.f32.mxu0 %vm278_vm0, %v5007_v60 }
 0x3e5   :  { %v3879_v46 = vpop.f32.mrb[16].mxu0 }
 0x3e6   :  { %v4299_v48 = vadd.f32 %v3879_v46, %v5162_v30  ;;  %v1234_v50 = vpop.f32.mrb[17].mxu0 }
 0x3e7   :  { %v4300_v54 = vadd.f32 %v1234_v50, %v5160_v29 }
 0x3e8   :  { %v3316_v55 = vmul.f32 -1.442695, %v4299_v48 }
 0x3e9   :  { %v3315_v57 = vmul.f32 -1.442695, %v4300_v54  ;;  %v3882_v58 = vpop.f32.mrb[18].mxu0  ;;  %v6088_v54 = vld [vmem:[#allocation13_spill] sm:$0xff] }
 0x3ea   :  { %4496 = vpow2.f32 %v3316_v55  ;;  %v4301_v60 = vadd.f32 %v3882_v58, %v5174_v36  ;;  %v1244_v16 = vpop.f32.mrb[19].mxu0  ;;  %v6089_v58 = vld [vmem:[#allocation15_spill] sm:$0xff] }
 0x3eb   :  { %4498 = vpow2.f32 %v3315_v57  ;;  %v4302_v17 = vadd.f32 %v1244_v16, %v5172_v35 }
 0x3ec   :  { %v3318_v18 = vmul.f32 -1.442695, %v4301_v60  ;;  %v1155_v60 = vadd.f32 %v6089_v58, %v5200_v11 }
 0x3ed   :  { %v3317_v19 = vmul.f32 -1.442695, %v4302_v17  ;;  %v3885_v20 = vpop.f32.mrb[20].mxu0 }
 0x3ee   :  { %4500 = vpow2.f32 %v3318_v18  ;;  %v4303_v21 = vadd.f32 %v3885_v20, %v5178_v40  ;;  %v1254_v22 = vpop.f32.mrb[21].mxu0  ;;  %v6090_v18 = vld [vmem:[#allocation16_spill] sm:$0xff] }
 0x3ef   :  { %4502 = vpow2.f32 %v3317_v19  ;;  %v4304_v23 = vadd.f32 %v1254_v22, %v5176_v37  ;;  %v1150_v19 = vadd.f32 %v6090_v18, %v5195_v61 }
 0x3f0   :  { %v3320_v24 = vmul.f32 -1.442695, %v4303_v21 }
 0x3f1   :  { %v3319_v52 = vmul.f32 -1.442695, %v4304_v23  ;;  %v3888_v28 = vpop.f32.mrb[22].mxu0 }
 0x3f2   :  { %4504 = vpow2.f32 %v3320_v24  ;;  %v4305_v3 = vadd.f32 %v3888_v28, %v6078_v25  ;;  %v1264_v1 = vpop.f32.mrb[23].mxu0 }
 0x3f3   :  { %4506 = vpow2.f32 %v3319_v52  ;;  %v4306_v26 = vadd.f32 %v1264_v1, %v6079_v56  ;;  %v6091_v1 = vld [vmem:[#allocation17_spill] sm:$0xff] }
 0x3f4   :  { %v4497_v45 = vpop.eup %4496  ;;  %v3322_v8 = vmul.f32 -1.442695, %v4305_v3 }
 0x3f5   :  { %v4499_v59 = vpop.eup %4498  ;;  %v1310_v9 = vadd.f32 1.0, %v4497_v45  ;;  %v3321_v47 = vmul.f32 -1.442695, %v4306_v26  ;;  %v3891_v15 = vpop.f32.mrb[28].mxu0  ;;  %v1165_v26 = vadd.f32 %v6091_v1, %v5219_v7 }
 0x3f6   :  { %v1309_v12 = vadd.f32 1.0, %v4499_v59  ;;  %4508 = vpow2.f32 %v3322_v8  ;;  %v1274_v31 = vpop.f32.mrb[29].mxu0  ;;  %v1350_v46 = vadd.f32 %v3891_v15, %v6087_v44  ;;  %v6092_v8 = vld [vmem:[#allocation18_spill] sm:$0xff] }
 0x3f7   :  { %4510 = vrcp.f32 %v1310_v9  ;;  %v1349_v55 = vadd.f32 %v1274_v31, %v6088_v54  ;;  %v1160_v59 = vadd.f32 %v6092_v8, %v5210_v4  ;;  %v5481_v8 = vld [vmem:[%s6050_s4 + $0x10] sm:$0xff] }
 0x3f8   :  { %v4501_v63 = vpop.eup %4500  ;;  %4512 = vrcp.f32 %v1309_v12 }
 0x3f9   :  { %v4503_v27 = vpop.eup %4502  ;;  %v1312_v5 = vadd.f32 1.0, %v4501_v63  ;;  %4514 = vpow2.f32 %v3321_v47  ;;  %v3894_v6 = vpop.f32.mrb[30].mxu0 }
 0x3fa   :  { %v1311_v41 = vadd.f32 1.0, %v4503_v27  ;;  %v1284_v43 = vpop.f32.mrb[31].mxu0  ;;  %v1352_v23 = vadd.f32 %v3894_v6, %v5208_v53 }
 0x3fb   :  { %4516 = vrcp.f32 %v1312_v5  ;;  %v1351_v28 = vadd.f32 %v1284_v43, %v5205_v0 }
 0x3fc   :  { %v4505_v32 = vpop.eup %4504  ;;  %4518 = vrcp.f32 %v1311_v41 }
 0x3fd   :  { %v4507_v10 = vpop.eup %4506  ;;  %v1338_v38 = vadd.f32 1.0, %v4505_v32 }
 0x3fe   :  { %v1337_v42 = vadd.f32 1.0, %v4507_v10 }
 0x3ff   :  { %4520 = vrcp.f32 %v1338_v38 }
 0x400   :  { %v4509_v39 = vpop.eup %4508  ;;  %4522 = vrcp.f32 %v1337_v42 }
 0x401   :  { %v4511_v48 = vpop.eup %4510  ;;  %v1340_v50 = vadd.f32 1.0, %v4509_v39 }
 0x402   :  { %v4513_v57 = vpop.eup %4512  ;;  %v1354_v16 = vmul.f32 %v4511_v48, %v1350_v46 }
 0x403   :  { %v4515_v17 = vpop.eup %4514  ;;  %v1353_v20 = vmul.f32 %v4513_v57, %v1349_v55  ;;  %4524 = vrcp.f32 %v1340_v50 }
 0x404   :  { %v1339_v21 = vadd.f32 1.0, %v4515_v17  ;;  %v1358_v22 = vadd.f32 %v1354_v16, %v1155_v60 }
 0x405   :  { %v4517_v24 = vpop.eup %4516  ;;  %v1357_v52 = vadd.f32 %v1353_v20, %v1150_v19 }
 0x406   :  { %v4519_v3 = vpop.eup %4518  ;;  %4526 = vrcp.f32 %v1339_v21  ;;  %v1356_v45 = vmul.f32 %v4517_v24, %v1352_v23  ;;  %v2077_v23 = vld [vmem:[#allocation2 + $0xa0] sm:$0xff]  ;;  %v2078_v24 = vld [vmem:[#allocation2 + $0xa8] sm:$0xff] }
 0x407   :  { %4528 = vtanh.f32 %v1358_v22  ;;  %v1355_v9 = vmul.f32 %v4519_v3, %v1351_v28  ;;  %v2080_v28 = vld [vmem:[#allocation2 + $0xb8] sm:$0xff] }
 0x408   :  { %4530 = vtanh.f32 %v1357_v52  ;;  %v1360_v47 = vadd.f32 %v1356_v45, %v1165_v26  ;;  %v2079_v52 = vld [vmem:[#allocation2 + $0xb0] sm:$0xff]  ;;  %v5474_v26 = vld [vmem:[%s6050_s4 + $0x8] sm:$0xff] }
 0x409   :  { %v1359_v15 = vadd.f32 %v1355_v9, %v1160_v59  ;;  %v4521_v12 = vpop.eup %4520  ;;  %v4239_v1 = vpack.c.bf16 %v2080_v28, %v2079_v52  ;;  %v5488_v59 = vld [vmem:[%s6050_s4 + $0x18] sm:$0xff] }
 0x40a   :  { %4532 = vtanh.f32 %v1360_v47  ;;  %v4523_v63 = vpop.eup %4522  ;;  %v1366_v41 = vsub.f32 1.0, %v4521_v12  ;;  %v1374_v46 = vmul.f32 %v4521_v12, %v5340_v33  ;;  %v5495_v47 = vld [vmem:[%s6050_s4 + $0x20] sm:$0xff] }
 0x40b   :  { %4534 = vtanh.f32 %v1359_v15  ;;  %v1365_v10 = vsub.f32 1.0, %v4523_v63  ;;  %v1373_v50 = vmul.f32 %v4523_v63, %v5342_v34  ;;  %v5502_v15 = vld [vmem:[%s6050_s4 + $0x28] sm:$0xff]  ;;  %v5509_v63 = vld [vmem:[%s6050_s4 + $0x30] sm:$0xff] }
 0x40d   :  { %v5439_v31 = vpop.f32.mrb[40].mxu0  ;;  %v4525_v5 = vpop.eup %4524 }
 0x40e   :  { %6093 = vst [vmem:[#allocation8_spill] sm:$0xff] %v5439_v31  ;;  %v5441_v27 = vpop.f32.mrb[41].mxu0  ;;  %v1368_v55 = vsub.f32 1.0, %v4525_v5  ;;  %v1376_v19 = vmul.f32 %v4525_v5, %v5352_v51  ;;  %v5516_v5 = vld [vmem:[%s6050_s4 + $0x38] sm:$0xff] }
 0x40f   :  { %6094 = vst [vmem:[#allocation9_spill] sm:$0xff] %v5441_v27 }
 0x410   :  { %v4527_v6 = vpop.eup %4526 }
 0x411   :  { %v4529_v43 = vpop.eup %4528  ;;  %v5443_v32 = vpop.f32.mrb[42].mxu0  ;;  %v1367_v60 = vsub.f32 1.0, %v4527_v6  ;;  %v1375_v33 = vmul.f32 %v4527_v6, %v5354_v62  ;;  %v4235_v62 = vpack.c.bf16 %v2078_v24, %v2077_v23  ;;  %v5523_v6 = vld [vmem:[%s6050_s4 + $0x40] sm:$0xff] }
 0x412   :  { %6095 = vst [vmem:[#allocation10_spill] sm:$0xff] %v5443_v32  ;;  %v4531_v38 = vpop.eup %4530  ;;  %v5445_v39 = vpop.f32.mrb[43].mxu0  ;;  %v1370_v42 = vmul.f32 %v4529_v43, %v1366_v41  ;;  %v5530_v41 = vld [vmem:[%s6050_s4 + $0x48] sm:$0xff]  ;;  %v5537_v43 = vld [vmem:[%s6050_s4 + $0x50] sm:$0xff] }
 0x413   :  { %6096 = vst [vmem:[#allocation15_spill] sm:$0xff] %v5445_v39  ;;  %v1369_v48 = vmul.f32 %v4531_v38, %v1365_v10  ;;  %v5544_v10 = vld [vmem:[%s6050_s4 + $0x58] sm:$0xff]  ;;  %v5553_v38 = vld [vmem:[%s6049_s3 + $0x8] sm:$0xff] }
 0x414   :  { %v4533_v57 = vpop.eup %4532  ;;  %v5449_v58 = vadd.f32 %v1374_v46, %v1370_v42  ;;  %v5560_v42 = vld [vmem:[%s6049_s3 + $0x10] sm:$0xff]  ;;  %v5567_v46 = vld [vmem:[%s6049_s3 + $0x18] sm:$0xff] }
 0x415   :  { %v4535_v16 = vpop.eup %4534  ;;  %v5451_v17 = vadd.f32 %v1373_v50, %v1369_v48  ;;  %v1372_v18 = vmul.f32 %v4533_v57, %v1368_v55  ;;  %v5574_v48 = vld [vmem:[%s6049_s3 + $0x20] sm:$0xff]  ;;  %v5581_v50 = vld [vmem:[%s6049_s3 + $0x28] sm:$0xff]  ;;  %v5588_v55 = vld [vmem:[%s6049_s3 + $0x30] sm:$0xff] }
 0x416   :  { %1382 = vst.msk [vmem:[#allocation3 + $0x48] sm:$0xff] %vm97_vm1, %v5449_v58  ;;  %v1371_v20 = vmul.f32 %v4535_v16, %v1367_v60  ;;  %v5595_v57 = vld [vmem:[%s6049_s3 + $0x38] sm:$0xff]  ;;  %v5602_v60 = vld [vmem:[%s6049_s3 + $0x40] sm:$0xff]  ;;  %v5609_v16 = vld [vmem:[%s6049_s3 + $0x48] sm:$0xff] }
 0x417   :  { %1381 = vst.msk [vmem:[#allocation3 + $0x40] sm:$0xff] %vm97_vm1, %v5451_v17  ;;  %v4211_v34 = vpack.c.bf16 %v5449_v58, %v5451_v17  ;;  %v5461_v21 = vadd.f32 %v1376_v19, %v1372_v18  ;;  %v5616_v18 = vld [vmem:[%s6049_s3 + $0x50] sm:$0xff]  ;;  %v5623_v19 = vld [vmem:[%s6049_s3 + $0x58] sm:$0xff] }
 0x418   :  { %v5463_v22 = vadd.f32 %v1375_v33, %v1371_v20  ;;  %v5630_v20 = vld [vmem:[%s6050_s4] sm:$0xff]  ;;  %v89_v33 = vpop.trf.xlu1 }
 0x419   :  { %4212 = vmatprep.subr.bf16.mxu1 %v4211_v34  ;;  %1384 = vst.msk [vmem:[#allocation3 + $0x58] sm:$0xff] %vm97_vm1, %v5461_v21  ;;  %122 = vst.msk [vmem:[#allocation2 + $0xc0] sm:$0xff] %vm97_vm1, %v89_v33 }
 0x41a   :  { %4214 = vmatpush3.bf16.msra.mxu1 %v4211_v34  ;;  %1383 = vst.msk [vmem:[#allocation3 + $0x50] sm:$0xff] %vm97_vm1, %v5463_v22  ;;  %v4215_v51 = vpack.c.bf16 %v5461_v21, %v5463_v22 }
 0x41c   :  { %4216 = vmatprep.subr.bf16.mxu1 %v4215_v51  ;;  %v90_v34 = vpop.trf.xlu1 }
 0x41d   :  { %v3124_v45 = vld [vmem:[#allocation3 + $0x48] sm:$0xff]  ;;  %123 = vst.msk [vmem:[#allocation2 + $0xc8] sm:$0xff] %vm97_vm1, %v90_v34 }
 0x41e   :  { %4218 = vmatpush3.bf16.msra.mxu1 %v4215_v51  ;;  %v3123_v3 = vld [vmem:[#allocation3 + $0x40] sm:$0xff] }
 0x41f   :  { %3155 = vxpose.xlu0.b32.cont [9/16] (narrow) %v3123_v3, 8  ;;  %4236 = vmatprep.subr.bf16.mxu1 %v4235_v62 }
 0x420   :  { %v3126_v12 = vld [vmem:[#allocation3 + $0x58] sm:$0xff]  ;;  %v91_v23 = vpop.trf.xlu1 }
 0x421   :  { %3930 = vmatmul.mubr.msk.f32.vlgmr.msra.gmra.mrb[16].mxu1 %vm278_vm0, %v5474_v26  ;;  %v3125_v9 = vld [vmem:[#allocation3 + $0x50] sm:$0xff]  ;;  %124 = vst.msk [vmem:[#allocation2 + $0xd0] sm:$0xff] %vm97_vm1, %v91_v23 }
 0x422   :  { %3932 = vmatprep.mubr.msk.f32.mxu1 %vm278_vm0, %v5481_v8  ;;  %4238 = vmatpush3.bf16.msra.mxu1 %v4235_v62 }
 0x423   :  { %3156 = vxpose.xlu0.b32.cont [10/16] (narrow) %v3124_v45, 8  ;;  %4240 = vmatprep.subr.bf16.mxu1 %v4239_v1 }
 0x424   :  { %v92_v24 = vpop.trf.xlu1 }
 0x425   :  { %3933 = vmatmul.mubr.msk.f32.gmra.mrb[18].mxu1 %vm278_vm0, %v5488_v59  ;;  %125 = vst.msk [vmem:[#allocation2 + $0xd8] sm:$0xff] %vm97_vm1, %v92_v24 }
 0x426   :  { %3935 = vmatprep.mubr.msk.f32.mxu1 %vm278_vm0, %v5495_v47  ;;  %4242 = vmatpush3.bf16.msra.mxu1 %v4239_v1 }
 0x427   :  { %3157 = vxpose.xlu0.b32.cont [11/16] (narrow) %v3125_v9, 8 }
 0x429   :  { %3936 = vmatmul.mubr.msk.f32.gmra.mrb[20].mxu1 %vm278_vm0, %v5502_v15 }
 0x42a   :  { %3938 = vmatprep.mubr.msk.f32.mxu1 %vm278_vm0, %v5509_v63 }
 0x42b   :  { %3158 = vxpose.xlu0.b32.cont [12/16] (narrow) %v3126_v12, 8 }
 0x42d   :  { %3939 = vmatmul.mubr.msk.f32.gmra.mrb[22].mxu1 %vm278_vm0, %v5516_v5 }
 0x42e   :  { %3941 = vmatprep.mubr.msk.f32.mxu1 %vm278_vm0, %v5523_v6 }
 0x431   :  { %3942 = vmatmul.mubr.msk.f32.gmra.mrb[28].mxu1 %vm278_vm0, %v5530_v41 }
 0x432   :  { %3944 = vmatprep.mubr.msk.f32.mxu1 %vm278_vm0, %v5537_v43 }
 0x435   :  { %3945 = vmatmul.mubr.msk.f32.gmra.mrb[30].mxu1 %vm278_vm0, %v5544_v10 }
 0x436   :  { %4007 = vmatprep.mubr.msk.f32.mxu1 %vm278_vm0, %v5387_v14 }
 0x439   :  { %4008 = vmatmul.mubr.msk.f32.vlgmr.msra.gmra.mrb[32].mxu1 %vm278_vm0, %v5553_v38 }
 0x43a   :  { %4010 = vmatprep.mubr.msk.f32.mxu1 %vm278_vm0, %v5560_v42 }
 0x43d   :  { %4011 = vmatmul.mubr.msk.f32.gmra.mrb[34].mxu1 %vm278_vm0, %v5567_v46 }
 0x43e   :  { %4013 = vmatprep.mubr.msk.f32.mxu1 %vm278_vm0, %v5574_v48 }
 0x441   :  { %4014 = vmatmul.mubr.msk.f32.gmra.mrb[36].mxu1 %vm278_vm0, %v5581_v50 }
 0x442   :  { %4016 = vmatprep.mubr.msk.f32.mxu1 %vm278_vm0, %v5588_v55 }
 0x445   :  { %4017 = vmatmul.mubr.msk.f32.gmra.mrb[38].mxu1 %vm278_vm0, %v5595_v57 }
 0x446   :  { %4019 = vmatprep.mubr.msk.f32.mxu1 %vm278_vm0, %v5602_v60 }
 0x449   :  { %4020 = vmatmul.mubr.msk.f32.gmra.mrb[40].mxu1 %vm278_vm0, %v5609_v16 }
 0x44a   :  { %4022 = vmatprep.mubr.msk.f32.mxu1 %vm278_vm0, %v5616_v18 }
 0x44d   :  { %4023 = vmatmul.mubr.msk.f32.gmra.mrb[42].mxu1 %vm278_vm0, %v5623_v19 }
 0x44e   :  { %4033 = vmatprep.mubr.msk.f32.mxu1 %vm278_vm0, %v5630_v20 }
 0x4f4   :  { %v3931_v51 = vpop.f32.mrb[16].mxu1 }
 0x4f5   :  { %v4307_v62 = vadd.f32 %v3931_v51, %v5162_v30  ;;  %v1580_v52 = vpop.f32.mrb[17].mxu1 }
 0x4f6   :  { %v4308_v28 = vadd.f32 %v1580_v52, %v5160_v29 }
 0x4f7   :  { %v3348_v3 = vmul.f32 -1.442695, %v4307_v62 }
 0x4f8   :  { %v3347_v1 = vmul.f32 -1.442695, %v4308_v28  ;;  %v3934_v45 = vpop.f32.mrb[18].mxu1 }
 0x4f9   :  { %4536 = vpow2.f32 %v3348_v3  ;;  %v4309_v9 = vadd.f32 %v3934_v45, %v5174_v36  ;;  %v1590_v12 = vpop.f32.mrb[19].mxu1 }
 0x4fa   :  { %4538 = vpow2.f32 %v3347_v1  ;;  %v4310_v33 = vadd.f32 %v1590_v12, %v5172_v35 }
 0x4fb   :  { %v3350_v34 = vmul.f32 -1.442695, %v4309_v9 }
 0x4fc   :  { %v3349_v23 = vmul.f32 -1.442695, %v4310_v33  ;;  %v3937_v39 = vpop.f32.mrb[20].mxu1 }
 0x4fd   :  { %4540 = vpow2.f32 %v3350_v34  ;;  %v4311_v24 = vadd.f32 %v3937_v39, %v5178_v40  ;;  %v1600_v51 = vpop.f32.mrb[21].mxu1 }
 0x4fe   :  { %4542 = vpow2.f32 %v3349_v23  ;;  %v4312_v52 = vadd.f32 %v1600_v51, %v5176_v37 }
 0x4ff   :  { %v3352_v62 = vmul.f32 -1.442695, %v4311_v24 }
 0x500   :  { %v3351_v28 = vmul.f32 -1.442695, %v4312_v52  ;;  %v3940_v32 = vpop.f32.mrb[22].mxu1 }
 0x501   :  { %4544 = vpow2.f32 %v3352_v62  ;;  %v4313_v3 = vadd.f32 %v3940_v32, %v6078_v25  ;;  %v1610_v45 = vpop.f32.mrb[23].mxu1 }
 0x502   :  { %4546 = vpow2.f32 %v3351_v28  ;;  %v4314_v1 = vadd.f32 %v1610_v45, %v6079_v56 }
 0x503   :  { %v4537_v9 = vpop.eup %4536  ;;  %v3354_v12 = vmul.f32 -1.442695, %v4313_v3 }
 0x504   :  { %v4539_v33 = vpop.eup %4538  ;;  %v1656_v34 = vadd.f32 1.0, %v4537_v9  ;;  %v3353_v27 = vmul.f32 -1.442695, %v4314_v1  ;;  %v3943_v39 = vpop.f32.mrb[28].mxu1 }
 0x505   :  { %v1655_v31 = vadd.f32 1.0, %v4539_v33  ;;  %4548 = vpow2.f32 %v3354_v12  ;;  %v1620_v23 = vpop.f32.mrb[29].mxu1  ;;  %v1696_v33 = vadd.f32 %v3943_v39, %v6087_v44 }
 0x506   :  { %4550 = vrcp.f32 %v1656_v34  ;;  %v1695_v34 = vadd.f32 %v1620_v23, %v6088_v54 }
 0x507   :  { %v4541_v24 = vpop.eup %4540  ;;  %4552 = vrcp.f32 %v1655_v31 }
 0x508   :  { %v4543_v51 = vpop.eup %4542  ;;  %v1658_v52 = vadd.f32 1.0, %v4541_v24  ;;  %4554 = vpow2.f32 %v3353_v27  ;;  %v3946_v32 = vpop.f32.mrb[30].mxu1  ;;  %v1501_v27 = vadd.f32 %v5330_v49, %v5200_v11  ;;  %v6097_v49 = vld [vmem:[#allocation7_spill] sm:$0xff] }
 0x509   :  { %v1657_v62 = vadd.f32 1.0, %v4543_v51  ;;  %v1630_v28 = vpop.f32.mrb[31].mxu1  ;;  %v1698_v39 = vadd.f32 %v3946_v32, %v5208_v53 }
 0x50a   :  { %4556 = vrcp.f32 %v1658_v52  ;;  %v1496_v52 = vadd.f32 %v5332_v13, %v5195_v61  ;;  %v1697_v23 = vadd.f32 %v1630_v28, %v5205_v0 }
 0x50b   :  { %v4545_v45 = vpop.eup %4544  ;;  %4558 = vrcp.f32 %v1657_v62 }
 0x50c   :  { %v4547_v3 = vpop.eup %4546  ;;  %v1684_v56 = vadd.f32 1.0, %v4545_v45 }
 0x50d   :  { %v1683_v1 = vadd.f32 1.0, %v4547_v3 }
 0x50e   :  { %4560 = vrcp.f32 %v1684_v56  ;;  %v1506_v56 = vadd.f32 %v5336_v2, %v5210_v4 }
 0x50f   :  { %v4549_v9 = vpop.eup %4548  ;;  %4562 = vrcp.f32 %v1683_v1 }
 0x510   :  { %v4551_v12 = vpop.eup %4550  ;;  %v1686_v25 = vadd.f32 1.0, %v4549_v9 }
 0x511   :  { %v4553_v31 = vpop.eup %4552  ;;  %v1700_v24 = vmul.f32 %v4551_v12, %v1696_v33  ;;  %v1511_v33 = vadd.f32 %v6097_v49, %v5219_v7 }
 0x512   :  { %v4555_v51 = vpop.eup %4554  ;;  %v1699_v62 = vmul.f32 %v4553_v31, %v1695_v34  ;;  %4564 = vrcp.f32 %v1686_v25 }
 0x513   :  { %v1685_v45 = vadd.f32 1.0, %v4555_v51  ;;  %v1704_v3 = vadd.f32 %v1700_v24, %v1501_v27 }
 0x514   :  { %v4557_v44 = vpop.eup %4556  ;;  %v1703_v9 = vadd.f32 %v1699_v62, %v1496_v52 }
 0x515   :  { %v4559_v54 = vpop.eup %4558  ;;  %4566 = vrcp.f32 %v1685_v45  ;;  %v1702_v12 = vmul.f32 %v4557_v44, %v1698_v39 }
 0x516   :  { %4568 = vtanh.f32 %v1704_v3  ;;  %v1701_v13 = vmul.f32 %v4559_v54, %v1697_v23 }
 0x517   :  { %4570 = vtanh.f32 %v1703_v9  ;;  %v1706_v1 = vadd.f32 %v1702_v12, %v1511_v33 }
 0x518   :  { %v1705_v34 = vadd.f32 %v1701_v13, %v1506_v56  ;;  %v4561_v25 = vpop.eup %4560 }
 0x519   :  { %4572 = vtanh.f32 %v1706_v1  ;;  %v4563_v28 = vpop.eup %4562  ;;  %v1712_v51 = vsub.f32 1.0, %v4561_v25  ;;  %v1720_v3 = vmul.f32 %v4561_v25, %v5449_v58 }
 0x51a   :  { %4574 = vtanh.f32 %v1705_v34  ;;  %v1711_v2 = vsub.f32 1.0, %v4563_v28  ;;  %v1719_v9 = vmul.f32 %v4563_v28, %v5451_v17 }
 0x51c   :  { %v5658_v32 = vpop.f32.mrb[40].mxu1  ;;  %v4565_v27 = vpop.eup %4564 }
 0x51d   :  { %6098 = vst [vmem:[#allocation16_spill] sm:$0xff] %v5658_v32  ;;  %v5660_v31 = vpop.f32.mrb[41].mxu1  ;;  %v1714_v23 = vsub.f32 1.0, %v4565_v27  ;;  %v1722_v34 = vmul.f32 %v4565_v27, %v5461_v21  ;;  %v2425_v27 = vld [vmem:[#allocation2 + $0xd0] sm:$0xff] }
 0x51e   :  { %6099 = vst [vmem:[#allocation17_spill] sm:$0xff] %v5660_v31 }
 0x51f   :  { %v4567_v24 = vpop.eup %4566 }
 0x520   :  { %v4569_v44 = vpop.eup %4568  ;;  %v5662_v52 = vpop.f32.mrb[42].mxu1  ;;  %v1713_v12 = vsub.f32 1.0, %v4567_v24  ;;  %v1721_v58 = vmul.f32 %v4567_v24, %v5463_v22  ;;  %v2426_v24 = vld [vmem:[#allocation2 + $0xd8] sm:$0xff] }
 0x521   :  { %6100 = vst [vmem:[#allocation18_spill] sm:$0xff] %v5662_v52  ;;  %v4571_v62 = vpop.eup %4570  ;;  %v5664_v54 = vpop.f32.mrb[43].mxu1  ;;  %v1716_v45 = vmul.f32 %v4569_v44, %v1712_v51  ;;  %v2423_v44 = vld [vmem:[#allocation2 + $0xc0] sm:$0xff] }
 0x522   :  { %6101 = vst [vmem:[#allocation7_spill] sm:$0xff] %v5664_v54  ;;  %v1715_v39 = vmul.f32 %v4571_v62, %v1711_v2  ;;  %v2424_v2 = vld [vmem:[#allocation2 + $0xc8] sm:$0xff] }
 0x523   :  { %v4573_v49 = vpop.eup %4572  ;;  %v5668_v33 = vadd.f32 %v1720_v3, %v1716_v45  ;;  %v4251_v22 = vpack.c.bf16 %v2424_v2, %v2423_v44  ;;  %v4255_v45 = vpack.c.bf16 %v2426_v24, %v2425_v27 }
 0x524   :  { %v4575_v56 = vpop.eup %4574  ;;  %v5670_v13 = vadd.f32 %v1719_v9, %v1715_v39  ;;  %v1718_v1 = vmul.f32 %v4573_v49, %v1714_v23 }
 0x525   :  { %1728 = vst.msk [vmem:[#allocation3 + $0x68] sm:$0xff] %vm97_vm1, %v5668_v33  ;;  %v1717_v51 = vmul.f32 %v4575_v56, %v1713_v12 }
 0x526   :  { %1727 = vst.msk [vmem:[#allocation3 + $0x60] sm:$0xff] %vm97_vm1, %v5670_v13  ;;  %v4227_v17 = vpack.c.bf16 %v5668_v33, %v5670_v13  ;;  %v5680_v25 = vadd.f32 %v1722_v34, %v1718_v1 }
 0x527   :  { %v5682_v28 = vadd.f32 %v1721_v58, %v1717_v51 }
 0x528   :  { %4228 = vmatprep.subr.bf16.mxu0 %v4227_v17  ;;  %1730 = vst.msk [vmem:[#allocation3 + $0x78] sm:$0xff] %vm97_vm1, %v5680_v25 }
 0x529   :  { %4230 = vmatpush3.bf16.msra.mxu0 %v4227_v17  ;;  %1729 = vst.msk [vmem:[#allocation3 + $0x70] sm:$0xff] %vm97_vm1, %v5682_v28  ;;  %v4231_v21 = vpack.c.bf16 %v5680_v25, %v5682_v28 }
 0x52b   :  { %4232 = vmatprep.subr.bf16.mxu0 %v4231_v21 }
 0x52c   :  { %v3128_v3 = vld [vmem:[#allocation3 + $0x68] sm:$0xff] }
 0x52d   :  { %4234 = vmatpush3.bf16.msra.mxu0 %v4231_v21  ;;  %v3127_v62 = vld [vmem:[#allocation3 + $0x60] sm:$0xff] }
 0x52e   :  { %3159 = vxpose.xlu0.b32.cont [13/16] (narrow) %v3127_v62, 8  ;;  %4252 = vmatprep.subr.bf16.mxu0 %v4251_v22 }
 0x52f   :  { %v3130_v9 = vld [vmem:[#allocation3 + $0x78] sm:$0xff] }
 0x530   :  { %3982 = vmatmul.mubr.msk.f32.vlgmr.msra.gmra.mrb[32].mxu0 %vm278_vm0, %v5474_v26  ;;  %v3129_v39 = vld [vmem:[#allocation3 + $0x70] sm:$0xff] }
 0x531   :  { %3984 = vmatprep.mubr.msk.f32.mxu0 %vm278_vm0, %v5481_v8  ;;  %4254 = vmatpush3.bf16.msra.mxu0 %v4251_v22 }
 0x532   :  { %3160 = vxpose.xlu0.b32.cont [14/16] (narrow) %v3128_v3, 8  ;;  %4256 = vmatprep.subr.bf16.mxu0 %v4255_v45 }
 0x534   :  { %3985 = vmatmul.mubr.msk.f32.gmra.mrb[34].mxu0 %vm278_vm0, %v5488_v59 }
 0x535   :  { %3987 = vmatprep.mubr.msk.f32.mxu0 %vm278_vm0, %v5495_v47  ;;  %4258 = vmatpush3.bf16.msra.mxu0 %v4255_v45 }
 0x536   :  { %3161 = vxpose.xlu0.b32.cont [15/16] (narrow) %v3129_v39, 8 }
 0x538   :  { %3988 = vmatmul.mubr.msk.f32.gmra.mrb[36].mxu0 %vm278_vm0, %v5502_v15 }
 0x539   :  { %3990 = vmatprep.mubr.msk.f32.mxu0 %vm278_vm0, %v5509_v63 }
 0x53a   :  { %3162 = vxpose.xlu0.b32.end [16/16] (narrow) %v3130_v9, 8 }
 0x53c   :  { %3991 = vmatmul.mubr.msk.f32.gmra.mrb[38].mxu0 %vm278_vm0, %v5516_v5 }
 0x53d   :  { %3993 = vmatprep.mubr.msk.f32.mxu0 %vm278_vm0, %v5523_v6 }
 0x540   :  { %3994 = vmatmul.mubr.msk.f32.gmra.mrb[44].mxu0 %vm278_vm0, %v5530_v41 }
 0x541   :  { %3996 = vmatprep.mubr.msk.f32.mxu0 %vm278_vm0, %v5537_v43 }
 0x544   :  { %3997 = vmatmul.mubr.msk.f32.gmra.mrb[46].mxu0 %vm278_vm0, %v5544_v10 }
 0x545   :  { %4059 = vmatprep.mubr.msk.f32.mxu0 %vm278_vm0, %v5387_v14  ;;  %v93_v14 = vpop.trf.xlu1 }
 0x546   :  { %126 = vst.msk [vmem:[#allocation2 + $0xe0] sm:$0xff] %vm97_vm1, %v93_v14 }
 0x548   :  { %4060 = vmatmul.mubr.msk.f32.vlgmr.msra.gmra.mrb[48].mxu0 %vm278_vm0, %v5553_v38 }
 0x549   :  { %4062 = vmatprep.mubr.msk.f32.mxu0 %vm278_vm0, %v5560_v42  ;;  %v94_v23 = vpop.trf.xlu1 }
 0x54a   :  { %127 = vst.msk [vmem:[#allocation2 + $0xe8] sm:$0xff] %vm97_vm1, %v94_v23 }
 0x54c   :  { %4063 = vmatmul.mubr.msk.f32.gmra.mrb[50].mxu0 %vm278_vm0, %v5567_v46 }
 0x54d   :  { %4065 = vmatprep.mubr.msk.f32.mxu0 %vm278_vm0, %v5574_v48  ;;  %v95_v49 = vpop.trf.xlu1 }
 0x54e   :  { %128 = vst.msk [vmem:[#allocation2 + $0xf0] sm:$0xff] %vm97_vm1, %v95_v49  ;;  %v6102_v49 = vld [vmem:[#allocation12_spill] sm:$0xff] }
 0x550   :  { %4066 = vmatmul.mubr.msk.f32.gmra.mrb[52].mxu0 %vm278_vm0, %v5581_v50 }
 0x551   :  { %4068 = vmatprep.mubr.msk.f32.mxu0 %vm278_vm0, %v5588_v55  ;;  %v96_v12 = vpop.trf.xlu1 }
 0x552   :  { %129 = vst.msk [vmem:[#allocation2 + $0xf8] sm:$0xff] %vm97_vm1, %v96_v12 }
 0x554   :  { %4069 = vmatmul.mubr.msk.f32.gmra.mrb[54].mxu0 %vm278_vm0, %v5595_v57 }
 0x555   :  { %4071 = vmatprep.mubr.msk.f32.mxu0 %vm278_vm0, %v5602_v60 }
 0x558   :  { %4072 = vmatmul.mubr.msk.f32.gmra.mrb[56].mxu0 %vm278_vm0, %v5609_v16 }
 0x559   :  { %4074 = vmatprep.mubr.msk.f32.mxu0 %vm278_vm0, %v5616_v18 }
 0x55c   :  { %4075 = vmatmul.mubr.msk.f32.gmra.mrb[58].mxu0 %vm278_vm0, %v5623_v19 }
 0x55d   :  { %4085 = vmatprep.mubr.msk.f32.mxu0 %vm278_vm0, %v5630_v20 }
 0x603   :  { %v3983_v56 = vpop.f32.mrb[32].mxu0 }
 0x604   :  { %v4315_v1 = vadd.f32 %v3983_v56, %v5162_v30  ;;  %v1926_v34 = vpop.f32.mrb[33].mxu0 }
 0x605   :  { %v4316_v51 = vadd.f32 %v1926_v34, %v5160_v29 }
 0x606   :  { %v3380_v58 = vmul.f32 -1.442695, %v4315_v1  ;;  %v6103_v1 = vld [vmem:[#allocation11_spill] sm:$0xff] }
 0x607   :  { %v3379_v17 = vmul.f32 -1.442695, %v4316_v51  ;;  %v3986_v44 = vpop.f32.mrb[34].mxu0 }
 0x608   :  { %4576 = vpow2.f32 %v3380_v58  ;;  %v4317_v2 = vadd.f32 %v3986_v44, %v5174_v36  ;;  %v1936_v21 = vpop.f32.mrb[35].mxu0 }
 0x609   :  { %4578 = vpow2.f32 %v3379_v17  ;;  %v4318_v22 = vadd.f32 %v1936_v21, %v5172_v35 }
 0x60a   :  { %v3382_v27 = vmul.f32 -1.442695, %v4317_v2 }
 0x60b   :  { %v3381_v24 = vmul.f32 -1.442695, %v4318_v22  ;;  %v3989_v62 = vpop.f32.mrb[36].mxu0 }
 0x60c   :  { %4580 = vpow2.f32 %v3382_v27  ;;  %v4319_v45 = vadd.f32 %v3989_v62, %v5178_v40  ;;  %v1946_v3 = vpop.f32.mrb[37].mxu0 }
 0x60d   :  { %4582 = vpow2.f32 %v3381_v24  ;;  %v4320_v39 = vadd.f32 %v1946_v3, %v5176_v37 }
 0x60e   :  { %v3384_v9 = vmul.f32 -1.442695, %v4319_v45 }
 0x60f   :  { %v3383_v14 = vmul.f32 -1.442695, %v4320_v39  ;;  %v3992_v23 = vpop.f32.mrb[38].mxu0 }
 0x610   :  { %4584 = vpow2.f32 %v3384_v9  ;;  %v4321_v12 = vadd.f32 %v3992_v23, %v6102_v49  ;;  %v1956_v56 = vpop.f32.mrb[39].mxu0 }
 0x611   :  { %4586 = vpow2.f32 %v3383_v14  ;;  %v4322_v34 = vadd.f32 %v1956_v56, %v6103_v1 }
 0x612   :  { %v4577_v51 = vpop.eup %4576  ;;  %v3386_v58 = vmul.f32 -1.442695, %v4321_v12 }
 0x613   :  { %v4579_v17 = vpop.eup %4578  ;;  %v2002_v44 = vadd.f32 1.0, %v4577_v51  ;;  %v3385_v2 = vmul.f32 -1.442695, %v4322_v34  ;;  %v3995_v21 = vpop.f32.mrb[44].mxu0  ;;  %v6104_v51 = vld [vmem:[#allocation14_spill] sm:$0xff] }
 0x614   :  { %v2001_v22 = vadd.f32 1.0, %v4579_v17  ;;  %4588 = vpow2.f32 %v3386_v58  ;;  %v1966_v27 = vpop.f32.mrb[45].mxu0  ;;  %v2042_v17 = vadd.f32 %v3995_v21, %v6104_v51 }
 0x615   :  { %4590 = vrcp.f32 %v2002_v44  ;;  %v6105_v44 = vld [vmem:[#allocation13_spill] sm:$0xff] }
 0x616   :  { %v4581_v24 = vpop.eup %4580  ;;  %4592 = vrcp.f32 %v2001_v22  ;;  %v2041_v52 = vadd.f32 %v1966_v27, %v6105_v44 }
 0x617   :  { %v4583_v62 = vpop.eup %4582  ;;  %v2004_v45 = vadd.f32 1.0, %v4581_v24  ;;  %4594 = vpow2.f32 %v3385_v2  ;;  %v3998_v3 = vpop.f32.mrb[46].mxu0  ;;  %v6106_v24 = vld [vmem:[#allocation8_spill] sm:$0xff] }
 0x618   :  { %v2003_v39 = vadd.f32 1.0, %v4583_v62  ;;  %v1976_v9 = vpop.f32.mrb[47].mxu0  ;;  %v1847_v2 = vadd.f32 %v6106_v24, %v5200_v11  ;;  %v2044_v21 = vadd.f32 %v3998_v3, %v5208_v53  ;;  %v6108_v24 = vld [vmem:[#allocation10_spill] sm:$0xff] }
 0x619   :  { %4596 = vrcp.f32 %v2004_v45  ;;  %v6107_v45 = vld [vmem:[#allocation9_spill] sm:$0xff]  ;;  %v2043_v27 = vadd.f32 %v1976_v9, %v5205_v0 }
 0x61a   :  { %v4585_v14 = vpop.eup %4584  ;;  %4598 = vrcp.f32 %v2003_v39  ;;  %v1842_v32 = vadd.f32 %v6107_v45, %v5195_v61  ;;  %v6109_v45 = vld [vmem:[#allocation15_spill] sm:$0xff] }
 0x61b   :  { %v4587_v23 = vpop.eup %4586  ;;  %v2030_v12 = vadd.f32 1.0, %v4585_v14 }
 0x61c   :  { %v2029_v34 = vadd.f32 1.0, %v4587_v23 }
 0x61d   :  { %4600 = vrcp.f32 %v2030_v12  ;;  %v1852_v12 = vadd.f32 %v6109_v45, %v5210_v4 }
 0x61e   :  { %v4589_v56 = vpop.eup %4588  ;;  %4602 = vrcp.f32 %v2029_v34 }
 0x61f   :  { %v4591_v58 = vpop.eup %4590  ;;  %v2032_v54 = vadd.f32 1.0, %v4589_v56 }
 0x620   :  { %v4593_v22 = vpop.eup %4592  ;;  %v2046_v31 = vmul.f32 %v4591_v58, %v2042_v17  ;;  %v1857_v17 = vadd.f32 %v6108_v24, %v5219_v7 }
 0x621   :  { %v4595_v62 = vpop.eup %4594  ;;  %v2045_v39 = vmul.f32 %v4593_v22, %v2041_v52  ;;  %4604 = vrcp.f32 %v2032_v54 }
 0x622   :  { %v2031_v14 = vadd.f32 1.0, %v4595_v62  ;;  %v2050_v23 = vadd.f32 %v2046_v31, %v1847_v2 }
 0x623   :  { %v4597_v51 = vpop.eup %4596  ;;  %v2049_v56 = vadd.f32 %v2045_v39, %v1842_v32 }
 0x624   :  { %v4599_v44 = vpop.eup %4598  ;;  %4606 = vrcp.f32 %v2031_v14  ;;  %v2048_v58 = vmul.f32 %v4597_v51, %v2044_v21 }
 0x625   :  { %4608 = vtanh.f32 %v2050_v23  ;;  %v2047_v52 = vmul.f32 %v4599_v44, %v2043_v27 }
 0x626   :  { %4610 = vtanh.f32 %v2049_v56  ;;  %v2052_v31 = vadd.f32 %v2048_v58, %v1857_v17 }
 0x627   :  { %v2051_v34 = vadd.f32 %v2047_v52, %v1852_v12  ;;  %v4601_v54 = vpop.eup %4600 }
 0x628   :  { %4612 = vtanh.f32 %v2052_v31  ;;  %v4603_v3 = vpop.eup %4602  ;;  %v2058_v62 = vsub.f32 1.0, %v4601_v54  ;;  %v2066_v56 = vmul.f32 %v4601_v54, %v5668_v33 }
 0x629   :  { %4614 = vtanh.f32 %v2051_v34  ;;  %v2057_v14 = vsub.f32 1.0, %v4603_v3  ;;  %v2065_v24 = vmul.f32 %v4603_v3, %v5670_v13 }
 0x62b   :  { %v5762_v32 = vpop.f32.mrb[56].mxu0  ;;  %v4605_v22 = vpop.eup %4604 }
 0x62c   :  { %v5764_v9 = vpop.f32.mrb[57].mxu0  ;;  %v2060_v17 = vsub.f32 1.0, %v4605_v22 }
 0x62e   :  { %v4607_v2 = vpop.eup %4606 }
 0x62f   :  { %v4609_v51 = vpop.eup %4608  ;;  %v5766_v39 = vpop.f32.mrb[58].mxu0  ;;  %v2059_v12 = vsub.f32 1.0, %v4607_v2  ;;  %v2067_v33 = vmul.f32 %v4607_v2, %v5682_v28  ;;  %v2772_v2 = vld [vmem:[#allocation2 + $0xf8] sm:$0xff] }
 0x630   :  { %6110 = vst [vmem:[#allocation12_spill] sm:$0xff] %v5766_v39  ;;  %v4611_v23 = vpop.eup %4610  ;;  %v5768_v44 = vpop.f32.mrb[59].mxu0  ;;  %v2062_v21 = vmul.f32 %v4609_v51, %v2058_v62  ;;  %v2068_v39 = vmul.f32 %v4605_v22, %v5680_v25  ;;  %v2769_v51 = vld [vmem:[#allocation2 + $0xe0] sm:$0xff]  ;;  %v2771_v22 = vld [vmem:[#allocation2 + $0xf0] sm:$0xff] }
 0x631   :  { %v2061_v27 = vmul.f32 %v4611_v23, %v2057_v14  ;;  %v2770_v14 = vld [vmem:[#allocation2 + $0xe8] sm:$0xff]  ;;  %v4271_v23 = vpack.c.bf16 %v2772_v2, %v2771_v22 }
 0x632   :  { %v4613_v58 = vpop.eup %4612  ;;  %v5772_v45 = vadd.f32 %v2066_v56, %v2062_v21  ;;  %v4267_v28 = vpack.c.bf16 %v2770_v14, %v2769_v51 }
 0x633   :  { %v4615_v52 = vpop.eup %4614  ;;  %v5774_v31 = vadd.f32 %v2065_v24, %v2061_v27  ;;  %v2064_v34 = vmul.f32 %v4613_v58, %v2060_v17  ;;  %v4760_v24 = vld [vmem:[%s6049_s3] sm:$0xff] }
 0x634   :  { %2074 = vst.msk [vmem:[#allocation3 + $0x88] sm:$0xff] %vm97_vm1, %v5772_v45  ;;  %v2063_v62 = vmul.f32 %v4615_v52, %v2059_v12 }
 0x635   :  { %2073 = vst.msk [vmem:[#allocation3 + $0x80] sm:$0xff] %vm97_vm1, %v5774_v31  ;;  %v4243_v13 = vpack.c.bf16 %v5772_v45, %v5774_v31  ;;  %v5784_v54 = vadd.f32 %v2068_v39, %v2064_v34 }
 0x636   :  { %v5786_v3 = vadd.f32 %v2067_v33, %v2063_v62 }
 0x637   :  { %4244 = vmatprep.subr.bf16.mxu1 %v4243_v13  ;;  %2076 = vst.msk [vmem:[#allocation3 + $0x98] sm:$0xff] %vm97_vm1, %v5784_v54 }
 0x638   :  { %4246 = vmatpush3.bf16.msra.mxu1 %v4243_v13  ;;  %2075 = vst.msk [vmem:[#allocation3 + $0x90] sm:$0xff] %vm97_vm1, %v5786_v3  ;;  %v4247_v25 = vpack.c.bf16 %v5784_v54, %v5786_v3 }
 0x63a   :  { %4248 = vmatprep.subr.bf16.mxu1 %v4247_v25 }
 0x63b   :  { %v3132_v21 = vld [vmem:[#allocation3 + $0x88] sm:$0xff] }
 0x63c   :  { %4250 = vmatpush3.bf16.msra.mxu1 %v4247_v25  ;;  %v3131_v39 = vld [vmem:[#allocation3 + $0x80] sm:$0xff] }
 0x63d   :  { %3179 = vxpose.xlu1.b32.start [1/16] (narrow) %v3131_v39, 8  ;;  %4268 = vmatprep.subr.bf16.mxu1 %v4267_v28 }
 0x63e   :  { %v3134_v27 = vld [vmem:[#allocation3 + $0x98] sm:$0xff] }
 0x63f   :  { %4034 = vmatmul.mubr.msk.f32.vlgmr.msra.gmra.mrb[32].mxu1 %vm278_vm0, %v5474_v26  ;;  %v3133_v56 = vld [vmem:[#allocation3 + $0x90] sm:$0xff] }
 0x640   :  { %4036 = vmatprep.mubr.msk.f32.mxu1 %vm278_vm0, %v5481_v8  ;;  %4270 = vmatpush3.bf16.msra.mxu1 %v4267_v28 }
 0x641   :  { %3180 = vxpose.xlu1.b32.cont [2/16] (narrow) %v3132_v21, 8  ;;  %4272 = vmatprep.subr.bf16.mxu1 %v4271_v23 }
 0x643   :  { %4037 = vmatmul.mubr.msk.f32.gmra.mrb[34].mxu1 %vm278_vm0, %v5488_v59 }
 0x644   :  { %4039 = vmatprep.mubr.msk.f32.mxu1 %vm278_vm0, %v5495_v47  ;;  %4274 = vmatpush3.bf16.msra.mxu1 %v4271_v23 }
 0x645   :  { %3181 = vxpose.xlu1.b32.cont [3/16] (narrow) %v3133_v56, 8 }
 0x647   :  { %4040 = vmatmul.mubr.msk.f32.gmra.mrb[36].mxu1 %vm278_vm0, %v5502_v15 }
 0x648   :  { %4042 = vmatprep.mubr.msk.f32.mxu1 %vm278_vm0, %v5509_v63 }
 0x649   :  { %3182 = vxpose.xlu1.b32.cont [4/16] (narrow) %v3134_v27, 8 }
 0x64b   :  { %4043 = vmatmul.mubr.msk.f32.gmra.mrb[38].mxu1 %vm278_vm0, %v5516_v5 }
 0x64c   :  { %4045 = vmatprep.mubr.msk.f32.mxu1 %vm278_vm0, %v5523_v6 }
 0x64f   :  { %4046 = vmatmul.mubr.msk.f32.gmra.mrb[44].mxu1 %vm278_vm0, %v5530_v41 }
 0x650   :  { %4048 = vmatprep.mubr.msk.f32.mxu1 %vm278_vm0, %v5537_v43 }
 0x653   :  { %4049 = vmatmul.mubr.msk.f32.gmra.mrb[46].mxu1 %vm278_vm0, %v5544_v10 }
 0x654   :  { %4111 = vmatprep.mubr.msk.f32.mxu1 %vm278_vm0, %v4760_v24 }
 0x657   :  { %4112 = vmatmul.mubr.msk.f32.vlgmr.msra.gmra.mrb[48].mxu1 %vm278_vm0, %v5553_v38 }
 0x658   :  { %4114 = vmatprep.mubr.msk.f32.mxu1 %vm278_vm0, %v5560_v42 }
 0x65b   :  { %4115 = vmatmul.mubr.msk.f32.gmra.mrb[50].mxu1 %vm278_vm0, %v5567_v46 }
 0x65c   :  { %4117 = vmatprep.mubr.msk.f32.mxu1 %vm278_vm0, %v5574_v48 }
 0x65f   :  { %4118 = vmatmul.mubr.msk.f32.gmra.mrb[52].mxu1 %vm278_vm0, %v5581_v50 }
 0x660   :  { %4120 = vmatprep.mubr.msk.f32.mxu1 %vm278_vm0, %v5588_v55 }
 0x663   :  { %4121 = vmatmul.mubr.msk.f32.gmra.mrb[54].mxu1 %vm278_vm0, %v5595_v57 }
 0x664   :  { %4123 = vmatprep.mubr.msk.f32.mxu1 %vm278_vm0, %v5602_v60 }
 0x667   :  { %4124 = vmatmul.mubr.msk.f32.gmra.mrb[56].mxu1 %vm278_vm0, %v5609_v16 }
 0x668   :  { %4126 = vmatprep.mubr.msk.f32.mxu1 %vm278_vm0, %v5616_v18 }
 0x66b   :  { %4127 = vmatmul.mubr.msk.f32.gmra.mrb[58].mxu1 %vm278_vm0, %v5623_v19 }
 0x66c   :  { %4137 = vmatprep.mubr.msk.f32.mxu1 %vm278_vm0, %v5630_v20 }
 0x712   :  { %v4035_v38 = vpop.f32.mrb[32].mxu1 }
 0x713   :  { %v4323_v42 = vadd.f32 %v4035_v38, %v5162_v30  ;;  %v2272_v46 = vpop.f32.mrb[33].mxu1 }
 0x714   :  { %v4324_v48 = vadd.f32 %v2272_v46, %v5160_v29 }
 0x715   :  { %v3412_v50 = vmul.f32 -1.442695, %v4323_v42 }
 0x716   :  { %v3411_v55 = vmul.f32 -1.442695, %v4324_v48  ;;  %v4038_v57 = vpop.f32.mrb[34].mxu1 }
 0x717   :  { %4616 = vpow2.f32 %v3412_v50  ;;  %v4325_v60 = vadd.f32 %v4038_v57, %v5174_v36  ;;  %v2282_v16 = vpop.f32.mrb[35].mxu1 }
 0x718   :  { %4618 = vpow2.f32 %v3411_v55  ;;  %v4326_v18 = vadd.f32 %v2282_v16, %v5172_v35 }
 0x719   :  { %v3414_v19 = vmul.f32 -1.442695, %v4325_v60 }
 0x71a   :  { %v3413_v17 = vmul.f32 -1.442695, %v4326_v18  ;;  %v4041_v58 = vpop.f32.mrb[36].mxu1  ;;  %v6111_v18 = vld [vmem:[#allocation14_spill] sm:$0xff] }
 0x71b   :  { %4620 = vpow2.f32 %v3414_v19  ;;  %v4327_v20 = vadd.f32 %v4041_v58, %v5178_v40  ;;  %v2292_v12 = vpop.f32.mrb[37].mxu1 }
 0x71c   :  { %4622 = vpow2.f32 %v3413_v17  ;;  %v4328_v52 = vadd.f32 %v2292_v12, %v5176_v37 }
 0x71d   :  { %v3416_v34 = vmul.f32 -1.442695, %v4327_v20  ;;  %v6112_v20 = vld [vmem:[#allocation13_spill] sm:$0xff] }
 0x71e   :  { %v3415_v62 = vmul.f32 -1.442695, %v4328_v52  ;;  %v4044_v33 = vpop.f32.mrb[38].mxu1 }
 0x71f   :  { %4624 = vpow2.f32 %v3416_v34  ;;  %v4329_v13 = vadd.f32 %v4044_v33, %v6102_v49  ;;  %v2302_v51 = vpop.f32.mrb[39].mxu1  ;;  %v6113_v34 = vld [vmem:[#allocation16_spill] sm:$0xff] }
 0x720   :  { %4626 = vpow2.f32 %v3415_v62  ;;  %v4330_v14 = vadd.f32 %v2302_v51, %v6103_v1  ;;  %v2193_v62 = vadd.f32 %v6113_v34, %v5200_v11  ;;  %v6114_v51 = vld [vmem:[#allocation17_spill] sm:$0xff] }
 0x721   :  { %v4617_v25 = vpop.eup %4616  ;;  %v3418_v28 = vmul.f32 -1.442695, %v4329_v13 }
 0x722   :  { %v4619_v22 = vpop.eup %4618  ;;  %v2348_v2 = vadd.f32 1.0, %v4617_v25  ;;  %v3417_v39 = vmul.f32 -1.442695, %v4330_v14  ;;  %v4047_v23 = vpop.f32.mrb[44].mxu1  ;;  %v2188_v14 = vadd.f32 %v6114_v51, %v5195_v61 }
 0x723   :  { %v2347_v21 = vadd.f32 1.0, %v4619_v22  ;;  %4628 = vpow2.f32 %v3418_v28  ;;  %v2312_v56 = vpop.f32.mrb[45].mxu1  ;;  %v2388_v19 = vadd.f32 %v4047_v23, %v6111_v18 }
 0x724   :  { %4630 = vrcp.f32 %v2348_v2  ;;  %v2387_v12 = vadd.f32 %v2312_v56, %v6112_v20 }
 0x725   :  { %v4621_v27 = vpop.eup %4620  ;;  %4632 = vrcp.f32 %v2347_v21 }
 0x726   :  { %v4623_v24 = vpop.eup %4622  ;;  %v2350_v38 = vadd.f32 1.0, %v4621_v27  ;;  %4634 = vpow2.f32 %v3417_v39  ;;  %v4050_v42 = vpop.f32.mrb[46].mxu1  ;;  %v6115_v27 = vld [vmem:[#allocation18_spill] sm:$0xff] }
 0x727   :  { %v2349_v46 = vadd.f32 1.0, %v4623_v24  ;;  %v2322_v48 = vpop.f32.mrb[47].mxu1  ;;  %v2390_v2 = vadd.f32 %v4050_v42, %v5208_v53  ;;  %v2203_v24 = vadd.f32 %v6115_v27, %v5219_v7 }
 0x728   :  { %4636 = vrcp.f32 %v2350_v38  ;;  %v2389_v21 = vadd.f32 %v2322_v48, %v5205_v0 }
 0x729   :  { %v4625_v50 = vpop.eup %4624  ;;  %4638 = vrcp.f32 %v2349_v46  ;;  %v6116_v46 = vld [vmem:[#allocation7_spill] sm:$0xff] }
 0x72a   :  { %v4627_v55 = vpop.eup %4626  ;;  %v2376_v57 = vadd.f32 1.0, %v4625_v50  ;;  %v2198_v50 = vadd.f32 %v6116_v46, %v5210_v4 }
 0x72b   :  { %v2375_v16 = vadd.f32 1.0, %v4627_v55 }
 0x72c   :  { %4640 = vrcp.f32 %v2376_v57 }
 0x72d   :  { %v4629_v60 = vpop.eup %4628  ;;  %4642 = vrcp.f32 %v2375_v16 }
 0x72e   :  { %v4631_v17 = vpop.eup %4630  ;;  %v2378_v58 = vadd.f32 1.0, %v4629_v60 }
 0x72f   :  { %v4633_v52 = vpop.eup %4632  ;;  %v2392_v33 = vmul.f32 %v4631_v17, %v2388_v19 }
 0x730   :  { %v4635_v13 = vpop.eup %4634  ;;  %v2391_v25 = vmul.f32 %v4633_v52, %v2387_v12  ;;  %4644 = vrcp.f32 %v2378_v58 }
 0x731   :  { %v2377_v28 = vadd.f32 1.0, %v4635_v13  ;;  %v2396_v22 = vadd.f32 %v2392_v33, %v2193_v62 }
 0x732   :  { %v4637_v39 = vpop.eup %4636  ;;  %v2395_v23 = vadd.f32 %v2391_v25, %v2188_v14 }
 0x733   :  { %v4639_v56 = vpop.eup %4638  ;;  %4646 = vrcp.f32 %v2377_v28  ;;  %v2394_v38 = vmul.f32 %v4637_v39, %v2390_v2 }
 0x734   :  { %4648 = vtanh.f32 %v2396_v22  ;;  %v2393_v55 = vmul.f32 %v4639_v56, %v2389_v21 }
 0x735   :  { %4650 = vtanh.f32 %v2395_v23  ;;  %v2398_v57 = vadd.f32 %v2394_v38, %v2203_v24 }
 0x736   :  { %v2397_v60 = vadd.f32 %v2393_v55, %v2198_v50  ;;  %v4641_v42 = vpop.eup %4640 }
 0x737   :  { %4652 = vtanh.f32 %v2398_v57  ;;  %v4643_v48 = vpop.eup %4642  ;;  %v2404_v12 = vsub.f32 1.0, %v4641_v42  ;;  %v2412_v14 = vmul.f32 %v4641_v42, %v5772_v45 }
 0x738   :  { %4654 = vtanh.f32 %v2397_v60  ;;  %v2403_v62 = vsub.f32 1.0, %v4643_v48  ;;  %v2411_v28 = vmul.f32 %v4643_v48, %v5774_v31 }
 0x73a   :  { %v5864_v16 = vpop.f32.mrb[56].mxu1  ;;  %v4645_v17 = vpop.eup %4644 }
 0x73b   :  { %v5866_v19 = vpop.f32.mrb[57].mxu1  ;;  %v2406_v22 = vsub.f32 1.0, %v4645_v17  ;;  %v2414_v24 = vmul.f32 %v4645_v17, %v5784_v54 }
 0x73d   :  { %v4647_v58 = vpop.eup %4646 }
 0x73e   :  { %v4649_v52 = vpop.eup %4648  ;;  %v5868_v34 = vpop.f32.mrb[58].mxu1  ;;  %v2405_v23 = vsub.f32 1.0, %v4647_v58  ;;  %v2413_v45 = vmul.f32 %v4647_v58, %v5786_v3 }
 0x73f   :  { %v4651_v33 = vpop.eup %4650  ;;  %v5870_v13 = vpop.f32.mrb[59].mxu1  ;;  %v2408_v51 = vmul.f32 %v4649_v52, %v2404_v12 }
 0x740   :  { %v2407_v25 = vmul.f32 %v4651_v33, %v2403_v62 }
 0x741   :  { %v4653_v2 = vpop.eup %4652  ;;  %v5874_v39 = vadd.f32 %v2412_v14, %v2408_v51 }
 0x742   :  { %v4655_v21 = vpop.eup %4654  ;;  %v5876_v56 = vadd.f32 %v2411_v28, %v2407_v25  ;;  %v2410_v27 = vmul.f32 %v4653_v2, %v2406_v22 }
 0x743   :  { %2420 = vst.msk [vmem:[#allocation3 + $0xa8] sm:$0xff] %vm97_vm1, %v5874_v39  ;;  %v2409_v38 = vmul.f32 %v4655_v21, %v2405_v23 }
 0x744   :  { %2419 = vst.msk [vmem:[#allocation3 + $0xa0] sm:$0xff] %vm97_vm1, %v5876_v56  ;;  %v4259_v31 = vpack.c.bf16 %v5874_v39, %v5876_v56  ;;  %v5886_v46 = vadd.f32 %v2414_v24, %v2410_v27 }
 0x745   :  { %v5888_v50 = vadd.f32 %v2413_v45, %v2409_v38 }
 0x746   :  { %4260 = vmatprep.subr.bf16.mxu0 %v4259_v31  ;;  %2422 = vst.msk [vmem:[#allocation3 + $0xb8] sm:$0xff] %vm97_vm1, %v5886_v46 }
 0x747   :  { %4262 = vmatpush3.bf16.msra.mxu0 %v4259_v31  ;;  %2421 = vst.msk [vmem:[#allocation3 + $0xb0] sm:$0xff] %vm97_vm1, %v5888_v50  ;;  %v4263_v54 = vpack.c.bf16 %v5886_v46, %v5888_v50 }
 0x749   :  { %4264 = vmatprep.subr.bf16.mxu0 %v4263_v54 }
 0x74a   :  { %v3136_v55 = vld [vmem:[#allocation3 + $0xa8] sm:$0xff] }
 0x74b   :  { %4266 = vmatpush3.bf16.msra.mxu0 %v4263_v54  ;;  %v3135_v3 = vld [vmem:[#allocation3 + $0xa0] sm:$0xff] }
 0x74c   :  { %3183 = vxpose.xlu1.b32.cont [5/16] (narrow) %v3135_v3, 8 }
 0x74d   :  { %v3138_v60 = vld [vmem:[#allocation3 + $0xb8] sm:$0xff] }
 0x74e   :  { %4086 = vmatmul.mubr.msk.f32.vlgmr.msra.gmra.mrb[48].mxu0 %vm278_vm0, %v5474_v26  ;;  %v3137_v57 = vld [vmem:[#allocation3 + $0xb0] sm:$0xff] }
 0x74f   :  { %4088 = vmatprep.mubr.msk.f32.mxu0 %vm278_vm0, %v5481_v8 }
 0x750   :  { %3184 = vxpose.xlu1.b32.cont [6/16] (narrow) %v3136_v55, 8 }
 0x752   :  { %4089 = vmatmul.mubr.msk.f32.gmra.mrb[50].mxu0 %vm278_vm0, %v5488_v59 }
 0x753   :  { %4091 = vmatprep.mubr.msk.f32.mxu0 %vm278_vm0, %v5495_v47 }
 0x754   :  { %3185 = vxpose.xlu1.b32.cont [7/16] (narrow) %v3137_v57, 8 }
 0x756   :  { %4092 = vmatmul.mubr.msk.f32.gmra.mrb[52].mxu0 %vm278_vm0, %v5502_v15 }
 0x757   :  { %4094 = vmatprep.mubr.msk.f32.mxu0 %vm278_vm0, %v5509_v63 }
 0x758   :  { %3186 = vxpose.xlu1.b32.cont [8/16] (narrow) %v3138_v60, 8 }
 0x75a   :  { %4095 = vmatmul.mubr.msk.f32.gmra.mrb[54].mxu0 %vm278_vm0, %v5516_v5 }
 0x75b   :  { %4097 = vmatprep.mubr.msk.f32.mxu0 %vm278_vm0, %v5523_v6 }
 0x75e   :  { %4098 = vmatmul.mubr.msk.f32.gmra.mrb[60].mxu0 %vm278_vm0, %v5530_v41 }
 0x75f   :  { %4100 = vmatprep.mubr.msk.f32.mxu0 %vm278_vm0, %v5537_v43 }
 0x762   :  { %4101 = vmatmul.mubr.msk.f32.gmra.mrb[62].mxu0 %vm278_vm0, %v5544_v10 }
 0x821   :  { %v4087_v26 = vpop.f32.mrb[48].mxu0 }
 0x822   :  { %v4331_v8 = vadd.f32 %v4087_v26, %v5162_v30  ;;  %v2618_v59 = vpop.f32.mrb[49].mxu0 }
 0x823   :  { %v4332_v47 = vadd.f32 %v2618_v59, %v5160_v29 }
 0x824   :  { %v3444_v15 = vmul.f32 -1.442695, %v4331_v8 }
 0x825   :  { %v3443_v63 = vmul.f32 -1.442695, %v4332_v47  ;;  %v4090_v5 = vpop.f32.mrb[50].mxu0 }
 0x826   :  { %4656 = vpow2.f32 %v3444_v15  ;;  %v4333_v6 = vadd.f32 %v4090_v5, %v5174_v36  ;;  %v2628_v42 = vpop.f32.mrb[51].mxu0 }
 0x827   :  { %4658 = vpow2.f32 %v3443_v63  ;;  %v4334_v41 = vadd.f32 %v2628_v42, %v5172_v35 }
 0x828   :  { %v3446_v43 = vmul.f32 -1.442695, %v4333_v6 }
 0x829   :  { %v3445_v48 = vmul.f32 -1.442695, %v4334_v41  ;;  %v4093_v17 = vpop.f32.mrb[52].mxu0  ;;  %v2539_v41 = vadd.f32 %v5762_v32, %v5200_v11  ;;  %v6117_v32 = vld [vmem:[#allocation12_spill] sm:$0xff] }
 0x82a   :  { %4660 = vpow2.f32 %v3446_v43  ;;  %v4335_v10 = vadd.f32 %v4093_v17, %v5178_v40  ;;  %v2638_v58 = vpop.f32.mrb[53].mxu0  ;;  %v2534_v17 = vadd.f32 %v5764_v9, %v5195_v61  ;;  %v2544_v9 = vadd.f32 %v5768_v44, %v5210_v4 }
 0x82b   :  { %4662 = vpow2.f32 %v3445_v48  ;;  %v4336_v12 = vadd.f32 %v2638_v58, %v5176_v37 }
 0x82c   :  { %v3448_v52 = vmul.f32 -1.442695, %v4335_v10 }
 0x82d   :  { %v3447_v62 = vmul.f32 -1.442695, %v4336_v12  ;;  %v4096_v33 = vpop.f32.mrb[54].mxu0 }
 0x82e   :  { %4664 = vpow2.f32 %v3448_v52  ;;  %v4337_v51 = vadd.f32 %v4096_v33, %v6102_v49  ;;  %v2648_v14 = vpop.f32.mrb[55].mxu0 }
 0x82f   :  { %4666 = vpow2.f32 %v3447_v62  ;;  %v4338_v25 = vadd.f32 %v2648_v14, %v6103_v1 }
 0x830   :  { %v4657_v28 = vpop.eup %4656  ;;  %v3450_v22 = vmul.f32 -1.442695, %v4337_v51 }
 0x831   :  { %v4659_v2 = vpop.eup %4658  ;;  %v2694_v23 = vadd.f32 1.0, %v4657_v28  ;;  %v3449_v21 = vmul.f32 -1.442695, %v4338_v25  ;;  %v4099_v27 = vpop.f32.mrb[60].mxu0  ;;  %v2549_v25 = vadd.f32 %v6117_v32, %v5219_v7  ;;  %v4768_v32 = vld [vmem:[%s6050_s4 + $0x40] sm:$0xff] }
 0x832   :  { %v2693_v24 = vadd.f32 1.0, %v4659_v2  ;;  %4668 = vpow2.f32 %v3450_v22  ;;  %v2658_v38 = vpop.f32.mrb[61].mxu0  ;;  %v2734_v15 = vadd.f32 %v4099_v27, %v6111_v18 }
 0x833   :  { %4670 = vrcp.f32 %v2694_v23  ;;  %v2733_v6 = vadd.f32 %v2658_v38, %v6112_v20 }
 0x834   :  { %v4661_v45 = vpop.eup %4660  ;;  %4672 = vrcp.f32 %v2693_v24 }
 0x835   :  { %v4663_v31 = vpop.eup %4662  ;;  %v2696_v54 = vadd.f32 1.0, %v4661_v45  ;;  %4674 = vpow2.f32 %v3449_v21  ;;  %v4102_v3 = vpop.f32.mrb[62].mxu0 }
 0x836   :  { %v2695_v55 = vadd.f32 1.0, %v4663_v31  ;;  %v2668_v57 = vpop.f32.mrb[63].mxu0  ;;  %v2736_v52 = vadd.f32 %v4102_v3, %v5208_v53 }
 0x837   :  { %4676 = vrcp.f32 %v2696_v54  ;;  %v2735_v51 = vadd.f32 %v2668_v57, %v5205_v0 }
 0x838   :  { %v4665_v60 = vpop.eup %4664  ;;  %4678 = vrcp.f32 %v2695_v55 }
 0x839   :  { %v4667_v26 = vpop.eup %4666  ;;  %v2722_v8 = vadd.f32 1.0, %v4665_v60 }
 0x83a   :  { %v2721_v47 = vadd.f32 1.0, %v4667_v26 }
 0x83b   :  { %4680 = vrcp.f32 %v2722_v8 }
 0x83c   :  { %v4669_v59 = vpop.eup %4668  ;;  %4682 = vrcp.f32 %v2721_v47 }
 0x83d   :  { %v4671_v63 = vpop.eup %4670  ;;  %v2724_v5 = vadd.f32 1.0, %v4669_v59 }
 0x83e   :  { %v4673_v42 = vpop.eup %4672  ;;  %v2738_v43 = vmul.f32 %v4671_v63, %v2734_v15 }
 0x83f   :  { %v4675_v48 = vpop.eup %4674  ;;  %v2737_v10 = vmul.f32 %v4673_v42, %v2733_v6  ;;  %4684 = vrcp.f32 %v2724_v5 }
 0x840   :  { %v2723_v58 = vadd.f32 1.0, %v4675_v48  ;;  %v2742_v12 = vadd.f32 %v2738_v43, %v2539_v41  ;;  %v4761_v48 = vld [vmem:[%s6050_s4 + $0x8] sm:$0xff] }
 0x841   :  { %v4677_v62 = vpop.eup %4676  ;;  %v2741_v33 = vadd.f32 %v2737_v10, %v2534_v17  ;;  %v4762_v10 = vld [vmem:[%s6050_s4 + $0x10] sm:$0xff] }
 0x842   :  { %v4679_v14 = vpop.eup %4678  ;;  %4686 = vrcp.f32 %v2723_v58  ;;  %v2740_v28 = vmul.f32 %v4677_v62, %v2736_v52  ;;  %v4763_v58 = vld [vmem:[%s6050_s4 + $0x18] sm:$0xff]  ;;  %v4764_v52 = vld [vmem:[%s6050_s4 + $0x20] sm:$0xff]  ;;  %v4765_v62 = vld [vmem:[%s6050_s4 + $0x28] sm:$0xff] }
 0x843   :  { %4688 = vtanh.f32 %v2742_v12  ;;  %v2739_v22 = vmul.f32 %v4679_v14, %v2735_v51  ;;  %v4766_v51 = vld [vmem:[%s6050_s4 + $0x30] sm:$0xff]  ;;  %v4767_v14 = vld [vmem:[%s6050_s4 + $0x38] sm:$0xff] }
 0x844   :  { %4690 = vtanh.f32 %v2741_v33  ;;  %v2744_v2 = vadd.f32 %v2740_v28, %v2549_v25  ;;  %v4769_v25 = vld [vmem:[%s6050_s4 + $0x48] sm:$0xff]  ;;  %v4770_v28 = vld [vmem:[%s6050_s4 + $0x50] sm:$0xff] }
 0x845   :  { %v2743_v23 = vadd.f32 %v2739_v22, %v2544_v9  ;;  %v4681_v21 = vpop.eup %4680  ;;  %v4771_v9 = vld [vmem:[%s6050_s4 + $0x58] sm:$0xff]  ;;  %s4797_s4 = smov [#allocation4]  }
 0x846   :  { %4692 = vtanh.f32 %v2744_v2  ;;  %v4683_v27 = vpop.eup %4682  ;;  %v2750_v45 = vsub.f32 1.0, %v4681_v21  ;;  %v2758_v57 = vmul.f32 %v4681_v21, %v5874_v39  ;;  %s3219_s9 = sshll.u32 %s4797_s4, 4  ;;  %s3220_s9 = int_to_ptr.vmem [resolvable:$true] %s3219_s9 }
 0x847   :  { %4694 = vtanh.f32 %v2743_v23  ;;  %v2749_v54 = vsub.f32 1.0, %v4683_v27  ;;  %v2757_v44 = vmul.f32 %v4683_v27, %v5876_v56  ;;  %s4772_s10 = scalar_lea.vmem %s3220_s9, 256  ;;  %p4777_p1 = scmp.lt.s32.totalorder %s3220_s9, %s3220_s9 }
 0x848   :  { %p4773_p0 = scmp.ne.s32.totalorder %s3220_s9, %s4772_s10  ;;  %p4778_p2 = scmp.lt.s32.totalorder %s4772_s10, %s4772_s10 }
 0x849   :  { %v4685_v24 = vpop.eup %4684 }
 0x84a   :  { %v2752_v26 = vsub.f32 1.0, %v4685_v24  ;;  %v2760_v6 = vmul.f32 %v4685_v24, %v5886_v46  ;;  %p4779_p3 = por %p4778_p2, %p4777_p1 }
 0x84c   :  { %v4687_v38 = vpop.eup %4686  ;;  %p4780_p4 = pnand %p4779_p3, %p4773_p0 }
 0x84d   :  { %v4689_v31 = vpop.eup %4688  ;;  %v2751_v47 = vsub.f32 1.0, %v4687_v38  ;;  %v2759_v39 = vmul.f32 %v4687_v38, %v5888_v50 }
 0x84e   :  { %v4691_v3 = vpop.eup %4690  ;;  %v2754_v55 = vmul.f32 %v4689_v31, %v2750_v45 }
 0x84f   :  { %v2753_v60 = vmul.f32 %v4691_v3, %v2749_v54 }
 0x850   :  { %v4693_v8 = vpop.eup %4692  ;;  %v5940_v59 = vadd.f32 %v2758_v57, %v2754_v55 }
 0x851   :  { %v4695_v15 = vpop.eup %4694  ;;  %v5942_v63 = vadd.f32 %v2757_v44, %v2753_v60  ;;  %v2756_v5 = vmul.f32 %v4693_v8, %v2752_v26  ;;  %v3163_v26 = vpop.trf.xlu0 }
 0x852   :  { %2766 = vst.msk [vmem:[#allocation3 + $0xc8] sm:$0xff] %vm97_vm1, %v5940_v59  ;;  %v2755_v42 = vmul.f32 %v4695_v15, %v2751_v47  ;;  %3211 = vst [vmem:[#allocation4] sm:$0xff] %v3163_v26 }
 0x853   :  { %2765 = vst.msk [vmem:[#allocation3 + $0xc0] sm:$0xff] %vm97_vm1, %v5942_v63  ;;  %v4275_v56 = vpack.c.bf16 %v5940_v59, %v5942_v63  ;;  %v5952_v41 = vadd.f32 %v2760_v6, %v2756_v5 }
 0x854   :  { %v5954_v43 = vadd.f32 %v2759_v39, %v2755_v42 }
 0x855   :  { %4276 = vmatprep.subr.bf16.mxu1 %v4275_v56  ;;  %2768 = vst.msk [vmem:[#allocation3 + $0xd8] sm:$0xff] %vm97_vm1, %v5952_v41 }
 0x856   :  { %4278 = vmatpush3.bf16.msra.mxu1 %v4275_v56  ;;  %2767 = vst.msk [vmem:[#allocation3 + $0xd0] sm:$0xff] %vm97_vm1, %v5954_v43  ;;  %v4279_v46 = vpack.c.bf16 %v5952_v41, %v5954_v43 }
 0x858   :  { %4280 = vmatprep.subr.bf16.mxu1 %v4279_v46 }
 0x859   :  { %v3140_v17 = vld [vmem:[#allocation3 + $0xc8] sm:$0xff] }
 0x85a   :  { %4282 = vmatpush3.bf16.msra.mxu1 %v4279_v46  ;;  %v3139_v50 = vld [vmem:[#allocation3 + $0xc0] sm:$0xff] }
 0x85b   :  { %3187 = vxpose.xlu1.b32.cont [9/16] (narrow) %v3139_v50, 8 }
 0x85c   :  { %v3142_v33 = vld [vmem:[#allocation3 + $0xd8] sm:$0xff] }
 0x85d   :  { %4138 = vmatmul.mubr.msk.f32.vlgmr.msra.gmra.mrb[48].mxu1 %vm278_vm0, %v4761_v48  ;;  %v3141_v12 = vld [vmem:[#allocation3 + $0xd0] sm:$0xff] }
 0x85e   :  { %4140 = vmatprep.mubr.msk.f32.mxu1 %vm278_vm0, %v4762_v10 }
 0x85f   :  { %3188 = vxpose.xlu1.b32.cont [10/16] (narrow) %v3140_v17, 8 }
 0x861   :  { %4141 = vmatmul.mubr.msk.f32.gmra.mrb[50].mxu1 %vm278_vm0, %v4763_v58 }
 0x862   :  { %4143 = vmatprep.mubr.msk.f32.mxu1 %vm278_vm0, %v4764_v52 }
 0x863   :  { %3189 = vxpose.xlu1.b32.cont [11/16] (narrow) %v3141_v12, 8 }
 0x865   :  { %4144 = vmatmul.mubr.msk.f32.gmra.mrb[52].mxu1 %vm278_vm0, %v4765_v62 }
 0x866   :  { %4146 = vmatprep.mubr.msk.f32.mxu1 %vm278_vm0, %v4766_v51 }
 0x867   :  { %3190 = vxpose.xlu1.b32.cont [12/16] (narrow) %v3142_v33, 8 }
 0x869   :  { %4147 = vmatmul.mubr.msk.f32.gmra.mrb[54].mxu1 %vm278_vm0, %v4767_v14 }
 0x86a   :  { %4149 = vmatprep.mubr.msk.f32.mxu1 %vm278_vm0, %v4768_v32 }
 0x86d   :  { %4150 = vmatmul.mubr.msk.f32.gmra.mrb[60].mxu1 %vm278_vm0, %v4769_v25 }
 0x86e   :  { %4152 = vmatprep.mubr.msk.f32.mxu1 %vm278_vm0, %v4770_v28 }
 0x871   :  { %4153 = vmatmul.mubr.msk.f32.gmra.mrb[62].mxu1 %vm278_vm0, %v4771_v9  ;;  %v2885_v9 = vadd.f32 %v5864_v16, %v5200_v11  ;;  %v2895_v11 = vadd.f32 %v5868_v34, %v5219_v7 }
 0x930   :  { %v4139_v22 = vpop.f32.mrb[48].mxu1 }
 0x931   :  { %v4339_v2 = vadd.f32 %v4139_v22, %v5162_v30  ;;  %v2964_v23 = vpop.f32.mrb[49].mxu1 }
 0x932   :  { %v4340_v21 = vadd.f32 %v2964_v23, %v5160_v29  ;;  %v2880_v23 = vadd.f32 %v5866_v19, %v5195_v61  ;;  %v2890_v61 = vadd.f32 %v5870_v13, %v5210_v4 }
 0x933   :  { %v3476_v27 = vmul.f32 -1.442695, %v4339_v2 }
 0x934   :  { %v3475_v24 = vmul.f32 -1.442695, %v4340_v21  ;;  %v4142_v38 = vpop.f32.mrb[50].mxu1 }
 0x935   :  { %4696 = vpow2.f32 %v3476_v27  ;;  %v4341_v45 = vadd.f32 %v4142_v38, %v5174_v36  ;;  %v2974_v31 = vpop.f32.mrb[51].mxu1 }
 0x936   :  { %4698 = vpow2.f32 %v3475_v24  ;;  %v4342_v54 = vadd.f32 %v2974_v31, %v5172_v35 }
 0x937   :  { %v3478_v3 = vmul.f32 -1.442695, %v4341_v45 }
 0x938   :  { %v3477_v55 = vmul.f32 -1.442695, %v4342_v54  ;;  %v4145_v57 = vpop.f32.mrb[52].mxu1 }
 0x939   :  { %4700 = vpow2.f32 %v3478_v3  ;;  %v4343_v60 = vadd.f32 %v4145_v57, %v5178_v40  ;;  %v2984_v30 = vpop.f32.mrb[53].mxu1 }
 0x93a   :  { %4702 = vpow2.f32 %v3477_v55  ;;  %v4344_v29 = vadd.f32 %v2984_v30, %v5176_v37 }
 0x93b   :  { %v3480_v44 = vmul.f32 -1.442695, %v4343_v60 }
 0x93c   :  { %v3479_v8 = vmul.f32 -1.442695, %v4344_v29  ;;  %v4148_v47 = vpop.f32.mrb[54].mxu1 }
 0x93d   :  { %4704 = vpow2.f32 %v3480_v44  ;;  %v4345_v36 = vadd.f32 %v4148_v47, %v6102_v49  ;;  %v2994_v15 = vpop.f32.mrb[55].mxu1 }
 0x93e   :  { %4706 = vpow2.f32 %v3479_v8  ;;  %v4346_v35 = vadd.f32 %v2994_v15, %v6103_v1 }
 0x93f   :  { %v4697_v5 = vpop.eup %4696  ;;  %v3482_v6 = vmul.f32 -1.442695, %v4345_v36 }
 0x940   :  { %v4699_v42 = vpop.eup %4698  ;;  %v3040_v40 = vadd.f32 1.0, %v4697_v5  ;;  %v3481_v39 = vmul.f32 -1.442695, %v4346_v35  ;;  %v4151_v56 = vpop.f32.mrb[60].mxu1 }
 0x941   :  { %v3039_v46 = vadd.f32 1.0, %v4699_v42  ;;  %4708 = vpow2.f32 %v3482_v6  ;;  %v3004_v37 = vpop.f32.mrb[61].mxu1  ;;  %v3080_v51 = vadd.f32 %v4151_v56, %v6111_v18 }
 0x942   :  { %4710 = vrcp.f32 %v3040_v40  ;;  %v3079_v25 = vadd.f32 %v3004_v37, %v6112_v20 }
 0x943   :  { %v4701_v50 = vpop.eup %4700  ;;  %4712 = vrcp.f32 %v3039_v46 }
 0x944   :  { %v4703_v48 = vpop.eup %4702  ;;  %v3042_v17 = vadd.f32 1.0, %v4701_v50  ;;  %4714 = vpow2.f32 %v3481_v39  ;;  %v4154_v49 = vpop.f32.mrb[62].mxu1 }
 0x945   :  { %v3041_v10 = vadd.f32 1.0, %v4703_v48  ;;  %v3014_v58 = vpop.f32.mrb[63].mxu1  ;;  %v3082_v18 = vadd.f32 %v4154_v49, %v5208_v53 }
 0x946   :  { %4716 = vrcp.f32 %v3042_v17  ;;  %v3081_v20 = vadd.f32 %v3014_v58, %v5205_v0 }
 0x947   :  { %v4705_v1 = vpop.eup %4704  ;;  %4718 = vrcp.f32 %v3041_v10 }
 0x948   :  { %v4707_v12 = vpop.eup %4706  ;;  %v3068_v52 = vadd.f32 1.0, %v4705_v1 }
 0x949   :  { %v3067_v33 = vadd.f32 1.0, %v4707_v12 }
 0x94a   :  { %4720 = vrcp.f32 %v3068_v52 }
 0x94b   :  { %v4709_v62 = vpop.eup %4708  ;;  %4722 = vrcp.f32 %v3067_v33 }
 0x94c   :  { %v4711_v14 = vpop.eup %4710  ;;  %v3070_v32 = vadd.f32 1.0, %v4709_v62 }
 0x94d   :  { %v4713_v28 = vpop.eup %4712  ;;  %v3084_v22 = vmul.f32 %v4711_v14, %v3080_v51 }
 0x94e   :  { %v4715_v2 = vpop.eup %4714  ;;  %v3083_v21 = vmul.f32 %v4713_v28, %v3079_v25  ;;  %4724 = vrcp.f32 %v3070_v32 }
 0x94f   :  { %v3069_v27 = vadd.f32 1.0, %v4715_v2  ;;  %v3088_v24 = vadd.f32 %v3084_v22, %v2885_v9 }
 0x950   :  { %v4717_v38 = vpop.eup %4716  ;;  %v3087_v45 = vadd.f32 %v3083_v21, %v2880_v23 }
 0x951   :  { %v4719_v31 = vpop.eup %4718  ;;  %4726 = vrcp.f32 %v3069_v27  ;;  %v3086_v16 = vmul.f32 %v4717_v38, %v3082_v18 }
 0x952   :  { %4728 = vtanh.f32 %v3088_v24  ;;  %v3085_v19 = vmul.f32 %v4719_v31, %v3081_v20 }
 0x953   :  { %4730 = vtanh.f32 %v3087_v45  ;;  %v3090_v54 = vadd.f32 %v3086_v16, %v2895_v11 }
 0x954   :  { %v3089_v3 = vadd.f32 %v3085_v19, %v2890_v61  ;;  %v4721_v53 = vpop.eup %4720 }
 0x955   :  { %4732 = vtanh.f32 %v3090_v54  ;;  %v4723_v55 = vpop.eup %4722  ;;  %v3096_v60 = vsub.f32 1.0, %v4721_v53  ;;  %v3104_v34 = vmul.f32 %v4721_v53, %v5940_v59 }
 0x956   :  { %4734 = vtanh.f32 %v3089_v3  ;;  %v3095_v29 = vsub.f32 1.0, %v4723_v55  ;;  %v3103_v4 = vmul.f32 %v4723_v55, %v5942_v63 }
 0x958   :  { %v4725_v57 = vpop.eup %4724 }
 0x959   :  { %v3098_v13 = vsub.f32 1.0, %v4725_v57  ;;  %v3106_v35 = vmul.f32 %v4725_v57, %v5952_v41 }
 0x95b   :  { %v4727_v0 = vpop.eup %4726 }
 0x95c   :  { %v4729_v30 = vpop.eup %4728  ;;  %v3097_v47 = vsub.f32 1.0, %v4727_v0  ;;  %v3105_v42 = vmul.f32 %v4727_v0, %v5954_v43 }
 0x95d   :  { %v4731_v7 = vpop.eup %4730  ;;  %v3100_v44 = vmul.f32 %v4729_v30, %v3096_v60 }
 0x95e   :  { %v3099_v26 = vmul.f32 %v4731_v7, %v3095_v29 }
 0x95f   :  { %v4733_v8 = vpop.eup %4732  ;;  %v3108_v36 = vadd.f32 %v3104_v34, %v3100_v44 }
 0x960   :  { %v4735_v15 = vpop.eup %4734  ;;  %v3107_v5 = vadd.f32 %v3103_v4, %v3099_v26  ;;  %v3102_v6 = vmul.f32 %v4733_v8, %v3098_v13 }
 0x961   :  { %3112 = vst.msk [vmem:[#allocation3 + $0xe8] sm:$0xff] %vm97_vm1, %v3108_v36  ;;  %v3101_v40 = vmul.f32 %v4735_v15, %v3097_v47 }
 0x962   :  { %3111 = vst.msk [vmem:[#allocation3 + $0xe0] sm:$0xff] %vm97_vm1, %v3107_v5  ;;  %v3110_v59 = vadd.f32 %v3106_v35, %v3102_v6 }
 0x963   :  { %v3109_v39 = vadd.f32 %v3105_v42, %v3101_v40 }
 0x964   :  { %3114 = vst.msk [vmem:[#allocation3 + $0xf8] sm:$0xff] %vm97_vm1, %v3110_v59 }
 0x965   :  { %3113 = vst.msk [vmem:[#allocation3 + $0xf0] sm:$0xff] %vm97_vm1, %v3109_v39 }
 0x968   :  { %v3144_v56 = vld [vmem:[#allocation3 + $0xe8] sm:$0xff] }
 0x969   :  { %v3143_v63 = vld [vmem:[#allocation3 + $0xe0] sm:$0xff] }
 0x96a   :  { %3191 = vxpose.xlu1.b32.cont [13/16] (narrow) %v3143_v63, 8 }
 0x96b   :  { %v3146_v46 = vld [vmem:[#allocation3 + $0xf8] sm:$0xff] }
 0x96c   :  { %v3145_v41 = vld [vmem:[#allocation3 + $0xf0] sm:$0xff] }
 0x96e   :  { %3192 = vxpose.xlu1.b32.cont [14/16] (narrow) %v3144_v56, 8 }
 0x972   :  { %3193 = vxpose.xlu1.b32.cont [15/16] (narrow) %v3145_v41, 8 }
 0x976   :  { %3194 = vxpose.xlu1.b32.end [16/16] (narrow) %v3146_v46, 8 }
 0x9ba   :  { %v3195_v43 = vpop.trf.xlu1 }
 0x9bb   :  { %3212 = vst [vmem:[#allocation4 + $0x8] sm:$0xff] %v3195_v43 }
 0x9bc   :  { %4783 = shalt.err (!%p4780_p4)
}
 0x9bd   :  { %s4784_s13 = scalar_lea.hbm %s6053_s7, 256 }
 0x9be   :  { %p4785_p5 = scmp.ne.s32.totalorder %s6053_s7, %s4784_s13  ;;  %p4788_p6 = scmp.lt.u32.totalorder %s4784_s13, %s6053_s7 }
 0x9c0   :  { %p4790_p7 = pnand %p4788_p6, %p4785_p5 }
 0x9c2   :  { %4793 = shalt.err (!%p4790_p7)
}
 0x9c3   :  { %3222 = dma.vmem_to_hbm [thread:$0]  %s3220_s9, 256, %s6053_s7, [#allocation5]  }
 0x9c4   :  { %4794 = dma.done.wait [#allocation5], 256  }
 0x9c5   :  { %4795 = vsyncadd [#allocation5], 4294967040 }
 0x9c6   :  { %3226 = vsyncpa [#allocation5], 1 }

</bundles_post_ra>
